<compile_context>
chip_gen: v5e
topology: v5e:2x2
jax: 0.10.0
libtpu: 0.0.40
codegen_flags: <defaults>
</compile_context>

<pallas_src>
import math
import functools

import numpy as np
import jax
import jax.numpy as jnp
from jax.experimental import pallas as pl
from jax.experimental.pallas import tpu as pltpu

SQRT2 = math.sqrt(2.0)
LRELU_SLOPE = 0.2
IN_EPS = 1e-5                       # nn.InstanceNorm2d default eps
MXU_DTYPE = jnp.float32             # set to jnp.bfloat16 on v5e/v6e: halves DMA
                                    # bytes / doubles MXU rate, f32 accumulation.


# ----------------------------------------------------------------------------
# Fused StyledConv kernel
# ----------------------------------------------------------------------------
def _im2col(ref, B, H, W, K, Cin):
    """Read K*K shifted views of a zero-padded (B, H+K-1, W+K-1, Cin) ref and
    pack them lane-wise into one (B*H*W, K*K*Cin) matrix so the whole conv
    collapses into a single MXU dot with contraction depth K*K*Cin."""
    cols = []
    for kh in range(K):
        for kw in range(K):
            tap = ref[:, kh:kh + H, kw:kw + W, :]           # strided VMEM load
            cols.append(tap.reshape(B * H * W, Cin))
    return jnp.concatenate(cols, axis=-1)


def _styled_conv_kernel(x_ref, sp_ref, wgb_ref, bgb_ref, wm_ref, bm_ref,
                        o_ref, xmpad_ref, *, B, H, W, S, C, K):
    # x_ref    : (B, H, W, C)              un-padded input activations
    # sp_ref   : (B, H+2, W+2, S)          zero-padded style code
    # wgb_ref  : (9*S, 2*C)                merged gamma||beta 3x3 conv weight
    # bgb_ref  : (1, 2*C)                  merged gamma||beta bias
    # wm_ref   : (K*K*C, Ceff)             main conv weight (blur/sub-pixel folded)
    # bm_ref   : (1, Ceff)                 FusedLeakyReLU bias (tiled x4 if upsample)
    # o_ref    : (B*H*W, Ceff)
    # xmpad_ref: (B, H+2P, W+2P, C)        VMEM scratch, zero-padded modulated x
    HW = H * W
    P = K // 2

    # (1) gamma||beta = one 3x3 conv over the style code (single 9*S-deep dot).
    scol = _im2col(sp_ref, B, H, W, 3, S)                   # (BHW, 9S)
    gb = jnp.dot(scol.astype(MXU_DTYPE), wgb_ref[...].astype(MXU_DTYPE),
                 preferred_element_type=jnp.float32) + bgb_ref[...]
    gb = gb.reshape(B, HW, 2 * C)

    # (2) InstanceNorm2d (affine=False, biased variance, eps=1e-5) + modulation.
    x = x_ref[...].reshape(B, HW, C)
    mean = jnp.mean(x, axis=1, keepdims=True)
    var = jnp.mean(jnp.square(x - mean), axis=1, keepdims=True)
    xm = (x - mean) * jax.lax.rsqrt(var + IN_EPS) * gb[:, :, :C] + gb[:, :, C:]

    # (3) Write the modulated activations into a zero-padded VMEM scratch so the
    #     conv taps read zeros at the border (no HBM im2col materialization).
    xmpad_ref[...] = jnp.zeros(xmpad_ref.shape, xmpad_ref.dtype)
    xmpad_ref[:, P:P + H, P:P + W, :] = xm.reshape(B, H, W, C)

    # (4) Main conv: all K*K taps folded into ONE dot of depth K*K*C, then
    #     FusedLeakyReLU (bias -> leaky_relu(0.2) -> * sqrt(2)).
    xcol = _im2col(xmpad_ref, B, H, W, K, C)                # (BHW, KKC)
    y = jnp.dot(xcol.astype(MXU_DTYPE), wm_ref[...].astype(MXU_DTYPE),
                preferred_element_type=jnp.float32) + bm_ref[...]
    y = jnp.where(y >= 0.0, y, LRELU_SLOPE * y) * SQRT2
    o_ref[...] = y.astype(o_ref.dtype)


def _styled_conv_pallas(x_nhwc, style_nhwc, prep):
    B, H, W, C = x_nhwc.shape
    S = style_nhwc.shape[-1]
    assert style_nhwc.shape[:3] == (B, H, W)
    K = prep["K"]
    P = K // 2
    Ceff = prep["wm"].shape[1]
    sp = jnp.pad(style_nhwc, ((0, 0), (1, 1), (1, 1), (0, 0)))
    vmem = pl.BlockSpec(memory_space=pltpu.MemorySpace.VMEM)
    return pl.pallas_call(
        functools.partial(_styled_conv_kernel, B=B, H=H, W=W, S=S, C=C, K=K),
        out_shape=jax.ShapeDtypeStruct((B * H * W, Ceff), jnp.float32),
        in_specs=[vmem] * 6,
        out_specs=vmem,
        scratch_shapes=[pltpu.VMEM((B, H + 2 * P, W + 2 * P, C), jnp.float32)],
    )(x_nhwc, sp, prep["wgb"], prep["bgb"], prep["wm"], prep["bm"])


# ----------------------------------------------------------------------------
# One-time weight preparation (hoisted out of the forward pass)
# ----------------------------------------------------------------------------
def _prep_equal_conv_gb(gamma_w, gamma_b, beta_w, beta_b, style_dim):
    # gamma_w / beta_w: (C, S, 3, 3) OIHW.  Merged into one (9S, 2C) weight.
    scale = 1.0 / math.sqrt(style_dim * 9)

    def flat(w):
        return jnp.transpose(w, (2, 3, 1, 0)).reshape(9 * style_dim, -1) * scale

    wgb = jnp.concatenate([flat(gamma_w), flat(beta_w)], axis=1)
    bgb = jnp.concatenate([gamma_b, beta_b]).reshape(1, -1)
    return wgb.astype(jnp.float32), bgb.astype(jnp.float32)


def _prep_plain_weight(weight, flrelu_bias):
    # weight: (1, O, I, K, K) OIHW -> flattened HWIO (K*K*I, O), equalized-lr scaled.
    _, O, I, K, _ = weight.shape
    scale = 1.0 / math.sqrt(I * K * K)
    w = jnp.transpose(weight[0] * scale, (2, 3, 1, 0)).reshape(K * K * I, O)
    return w.astype(jnp.float32), flrelu_bias.reshape(1, O).astype(jnp.float32)


def _prep_upsample_weight(weight, flrelu_bias, blur_kernel=(1.0, 3.0, 3.0, 1.0)):
    # conv_transpose2d(stride=2, pad=0) followed by Blur([1,3,3,1], pad=(1,1), *4):
    # fold the blur into the (spatially flipped) weight, then extract the 4
    # parity sub-kernels of the sub-pixel decomposition -> 4 parallel 3x3 convs
    # (pad=1) on the *un-dilated* input, interleaved afterwards.
    _, O, I, K, _ = weight.shape
    assert K == 3, "upsample path implemented for kernel_size=3"
    scale = 1.0 / math.sqrt(I * K * K)
    w = np.asarray(weight[0], np.float64) * scale            # (O, I, 3, 3)
    wf = np.transpose(w[:, :, ::-1, ::-1], (2, 3, 1, 0))     # HWIO, flipped
    k1 = np.asarray(blur_kernel, np.float64)
    bk = np.outer(k1, k1)
    bk = bk / bk.sum() * 4.0                                  # * upsample_factor**2
    g = np.zeros((6, 6, I, O), np.float64)                    # wf (*) blur
    for a in range(3):
        for b in range(3):
            g[a:a + 4, b:b + 4] += wf[a, b][None, None] * bk[:, :, None, None]
    h = np.zeros((3, 3, I, 4, O), np.float64)                 # parity sub-kernels
    for dh in range(2):
        for dw in range(2):
            for rh in range(3):
                for rw in range(3):
                    h[rh, rw, :, dh * 2 + dw, :] = g[2 * rh + 1 - dh, 2 * rw + 1 - dw]
    w_flat = jnp.asarray(h.reshape(9 * I, 4 * O), jnp.float32)
    b_flat = jnp.tile(flrelu_bias.reshape(1, O), (1, 4)).astype(jnp.float32)
    return w_flat, b_flat


def init_styled_conv(key, in_channel, out_channel, kernel_size, style_dim):
    k0, k1, k2 = jax.random.split(key, 3)
    return {
        "gamma_w": jax.random.normal(k0, (in_channel, style_dim, 3, 3), jnp.float32),
        "gamma_b": jnp.ones((in_channel,), jnp.float32),           # bias_init=1
        "beta_w": jax.random.normal(k1, (in_channel, style_dim, 3, 3), jnp.float32),
        "beta_b": jnp.zeros((in_channel,), jnp.float32),           # bias_init=0
        "weight": jax.random.normal(
            k2, (1, out_channel, in_channel, kernel_size, kernel_size), jnp.float32),
        "flrelu_bias": jnp.zeros((out_channel,), jnp.float32),     # FusedLeakyReLU bias
    }


def prepare_styled_conv(raw, style_dim, kernel_size, upsample):
    wgb, bgb = _prep_equal_conv_gb(raw["gamma_w"], raw["gamma_b"],
                                   raw["beta_w"], raw["beta_b"], style_dim)
    if upsample:
        wm, bm = _prep_upsample_weight(raw["weight"], raw["flrelu_bias"])
        K = 3
    else:
        wm, bm = _prep_plain_weight(raw["weight"], raw["flrelu_bias"])
        K = kernel_size
    return {"wgb": wgb, "bgb": bgb, "wm": wm, "bm": bm, "K": K,
            "upsample": upsample, "out_channel": int(raw["flrelu_bias"].shape[0])}


def styled_conv_forward(prep, x_nchw, style_nchw):
    # x: (B, C, H, W), style: (B, S, H, W) -> (B, O, H', W'); H' = 2H if upsample.
    B, _, H, W = x_nchw.shape
    O = prep["out_channel"]
    x = jnp.transpose(x_nchw, (0, 2, 3, 1))
    s = jnp.transpose(style_nchw, (0, 2, 3, 1))
    y = _styled_conv_pallas(x, s, prep)
    if prep["upsample"]:
        # interleave the 4 parity outputs into the 2x-upsampled grid
        y = y.reshape(B, H, W, 2, 2, O)
        y = jnp.transpose(y, (0, 1, 3, 2, 4, 5)).reshape(B, 2 * H, 2 * W, O)
    else:
        y = y.reshape(B, H, W, O)
    return jnp.transpose(y, (0, 3, 1, 2))


# ----------------------------------------------------------------------------
# Pure jax.lax reference (validates transpose-conv / blur folding / modulation)
# ----------------------------------------------------------------------------
def _reference_styled_conv(raw, x, style, upsample, kernel_size):
    HI = jax.lax.Precision.HIGHEST
    dn = ("NCHW", "OIHW", "NCHW")
    C, S = raw["gamma_w"].shape[0], raw["gamma_w"].shape[1]
    s_scale = 1.0 / math.sqrt(S * 9)
    gamma = jax.lax.conv_general_dilated(style, raw["gamma_w"] * s_scale, (1, 1),
                                         [(1, 1), (1, 1)], dimension_numbers=dn,
                                         precision=HI) + raw["gamma_b"].reshape(1, C, 1, 1)
    beta = jax.lax.conv_general_dilated(style, raw["beta_w"] * s_scale, (1, 1),
                                        [(1, 1), (1, 1)], dimension_numbers=dn,
                                        precision=HI) + raw["beta_b"].reshape(1, C, 1, 1)
    mean = jnp.mean(x, axis=(2, 3), keepdims=True)
    var = jnp.mean(jnp.square(x - mean), axis=(2, 3), keepdims=True)
    xm = (x - mean) * jax.lax.rsqrt(var + IN_EPS) * gamma + beta

    O, K = raw["weight"].shape[1], kernel_size
    scale = 1.0 / math.sqrt(C * K * K)
    w = raw["weight"][0] * scale
    if upsample:
        wf = jnp.flip(w, axis=(2, 3))
        y = jax.lax.conv_general_dilated(xm, wf, (1, 1), [(K - 1, K - 1)] * 2,
                                         lhs_dilation=(2, 2), dimension_numbers=dn,
                                         precision=HI)
        k1 = jnp.array([1.0, 3.0, 3.0, 1.0], jnp.float32)
        bk = jnp.outer(k1, k1)
        bk = bk / jnp.sum(bk) * 4.0
        bw = jnp.tile(bk.reshape(1, 1, 4, 4), (O, 1, 1, 1))
        y = jax.lax.conv_general_dilated(y, bw, (1, 1), [(1, 1), (1, 1)],
                                         dimension_numbers=dn,
                                         feature_group_count=O, precision=HI)
    else:
        y = jax.lax.conv_general_dilated(xm, w, (1, 1), [(K // 2, K // 2)] * 2,
                                         dimension_numbers=dn, precision=HI)
    y = y + raw["flrelu_bias"].reshape(1, O, 1, 1)
    return jnp.where(y >= 0, y, LRELU_SLOPE * y) * SQRT2


def _check(name, got, want):
    err = float(jnp.max(jnp.abs(got - want)))
    tol = 5e-2 * float(jnp.max(jnp.abs(want))) + 1e-3
    assert err <= tol, f"{name}: max_err={err} tol={tol}"


# ----------------------------------------------------------------------------
if __name__ == "__main__":
    # Small but TPU-friendly instantiation (multiples of 128 keep the in-kernel
    # im2col packing and all stores lane-aligned; real model uses 512 channels).
    B, S, C, O, HSP = 2, 128, 128, 128, 8
    key = jax.random.PRNGKey(0)
    kp0, kp1, kx, ks = jax.random.split(key, 4)

    raw_plain = init_styled_conv(kp0, C, O, 3, S)
    raw_up = init_styled_conv(kp1, C, O, 3, S)
    prep_plain = prepare_styled_conv(raw_plain, S, 3, upsample=False)
    prep_up = prepare_styled_conv(raw_up, S, 3, upsample=True)

    x = jax.random.normal(kx, (B, C, HSP, HSP), jnp.float32)
    style = jax.random.normal(ks, (B, S, HSP, HSP), jnp.float32)

    fwd_plain = jax.jit(functools.partial(styled_conv_forward, prep_plain))
    fwd_up = jax.jit(functools.partial(styled_conv_forward, prep_up))

    y_plain = jax.block_until_ready(fwd_plain(x, style))
    y_up = jax.block_until_ready(fwd_up(x, style))

    assert y_plain.shape == (B, O, HSP, HSP), y_plain.shape
    assert y_up.shape == (B, O, 2 * HSP, 2 * HSP), y_up.shape
    assert bool(jnp.all(jnp.isfinite(y_plain))) and bool(jnp.all(jnp.isfinite(y_up)))

    # Numerical check vs. lax reference (covers the transpose-conv + blur fold).
    _check("styled_conv", y_plain,
           _reference_styled_conv(raw_plain, x, style, upsample=False, kernel_size=3))
    _check("styled_conv_upsample", y_up,
           _reference_styled_conv(raw_up, x, style, upsample=True, kernel_size=3))

    print("KERNEL_OK")
</pallas_src>

<mosaic_0001>
module attributes {stable_mosaic.version = 11 : i64} {
  func.func @_styled_conv_kernel(%arg0: memref<2x8x8x128xf32, #tpu.memory_space<vmem>>, %arg1: memref<2x10x10x128xf32, #tpu.memory_space<vmem>>, %arg2: memref<1152x256xf32, #tpu.memory_space<vmem>>, %arg3: memref<1x256xf32, #tpu.memory_space<vmem>>, %arg4: memref<1152x128xf32, #tpu.memory_space<vmem>>, %arg5: memref<1x128xf32, #tpu.memory_space<vmem>>, %arg6: memref<128x128xf32, #tpu.memory_space<vmem>>, %arg7: memref<2x10x10x128xf32, #tpu.memory_space<vmem>>) attributes {dimension_semantics = [], scalar_prefetch = 0 : i64, scratch_operands = 1 : i64, tpu.core_type = #tpu.core_type<tc>} {
    %c0 = arith.constant 0 : index
    %c0_0 = arith.constant 0 : index
    %c0_1 = arith.constant 0 : index
    %c0_2 = arith.constant 0 : index
    %0 = vector.load %arg1[%c0, %c0_0, %c0_1, %c0_2] : memref<2x10x10x128xf32, #tpu.memory_space<vmem>>, vector<2x8x8x128xf32>
    %1 = vector.shape_cast %0 : vector<2x8x8x128xf32> to vector<128x128xf32>
    %c0_3 = arith.constant 0 : index
    %c0_4 = arith.constant 0 : index
    %c1 = arith.constant 1 : index
    %c0_5 = arith.constant 0 : index
    %2 = vector.load %arg1[%c0_3, %c0_4, %c1, %c0_5] : memref<2x10x10x128xf32, #tpu.memory_space<vmem>>, vector<2x8x8x128xf32>
    %3 = vector.shape_cast %2 : vector<2x8x8x128xf32> to vector<128x128xf32>
    %c0_6 = arith.constant 0 : index
    %c0_7 = arith.constant 0 : index
    %c2 = arith.constant 2 : index
    %c0_8 = arith.constant 0 : index
    %4 = vector.load %arg1[%c0_6, %c0_7, %c2, %c0_8] : memref<2x10x10x128xf32, #tpu.memory_space<vmem>>, vector<2x8x8x128xf32>
    %5 = vector.shape_cast %4 : vector<2x8x8x128xf32> to vector<128x128xf32>
    %c0_9 = arith.constant 0 : index
    %c1_10 = arith.constant 1 : index
    %c0_11 = arith.constant 0 : index
    %c0_12 = arith.constant 0 : index
    %6 = vector.load %arg1[%c0_9, %c1_10, %c0_11, %c0_12] : memref<2x10x10x128xf32, #tpu.memory_space<vmem>>, vector<2x8x8x128xf32>
    %7 = vector.shape_cast %6 : vector<2x8x8x128xf32> to vector<128x128xf32>
    %c0_13 = arith.constant 0 : index
    %c1_14 = arith.constant 1 : index
    %c1_15 = arith.constant 1 : index
    %c0_16 = arith.constant 0 : index
    %8 = vector.load %arg1[%c0_13, %c1_14, %c1_15, %c0_16] : memref<2x10x10x128xf32, #tpu.memory_space<vmem>>, vector<2x8x8x128xf32>
    %9 = vector.shape_cast %8 : vector<2x8x8x128xf32> to vector<128x128xf32>
    %c0_17 = arith.constant 0 : index
    %c1_18 = arith.constant 1 : index
    %c2_19 = arith.constant 2 : index
    %c0_20 = arith.constant 0 : index
    %10 = vector.load %arg1[%c0_17, %c1_18, %c2_19, %c0_20] : memref<2x10x10x128xf32, #tpu.memory_space<vmem>>, vector<2x8x8x128xf32>
    %11 = vector.shape_cast %10 : vector<2x8x8x128xf32> to vector<128x128xf32>
    %c0_21 = arith.constant 0 : index
    %c2_22 = arith.constant 2 : index
    %c0_23 = arith.constant 0 : index
    %c0_24 = arith.constant 0 : index
    %12 = vector.load %arg1[%c0_21, %c2_22, %c0_23, %c0_24] : memref<2x10x10x128xf32, #tpu.memory_space<vmem>>, vector<2x8x8x128xf32>
    %13 = vector.shape_cast %12 : vector<2x8x8x128xf32> to vector<128x128xf32>
    %c0_25 = arith.constant 0 : index
    %c2_26 = arith.constant 2 : index
    %c1_27 = arith.constant 1 : index
    %c0_28 = arith.constant 0 : index
    %14 = vector.load %arg1[%c0_25, %c2_26, %c1_27, %c0_28] : memref<2x10x10x128xf32, #tpu.memory_space<vmem>>, vector<2x8x8x128xf32>
    %15 = vector.shape_cast %14 : vector<2x8x8x128xf32> to vector<128x128xf32>
    %c0_29 = arith.constant 0 : index
    %c2_30 = arith.constant 2 : index
    %c2_31 = arith.constant 2 : index
    %c0_32 = arith.constant 0 : index
    %16 = vector.load %arg1[%c0_29, %c2_30, %c2_31, %c0_32] : memref<2x10x10x128xf32, #tpu.memory_space<vmem>>, vector<2x8x8x128xf32>
    %17 = vector.shape_cast %16 : vector<2x8x8x128xf32> to vector<128x128xf32>
    %18 = tpu.concatenate %1, %3, %5, %7, %9, %11, %13, %15, %17 in 1 : vector<128x128xf32>, vector<128x128xf32>, vector<128x128xf32>, vector<128x128xf32>, vector<128x128xf32>, vector<128x128xf32>, vector<128x128xf32>, vector<128x128xf32>, vector<128x128xf32> -> vector<128x1152xf32>
    %c0_33 = arith.constant 0 : index
    %c0_34 = arith.constant 0 : index
    %19 = vector.load %arg2[%c0_33, %c0_34] : memref<1152x256xf32, #tpu.memory_space<vmem>>, vector<1152x256xf32>
    %cst = arith.constant dense<0.000000e+00> : vector<128x256xf32>
    %20 = tpu.matmul %18, %19, %cst {dimension_numbers = #tpu.dot_dimension_numbers<[1], [0], [0], [1], [0, 0, 1, 1], [], []>} : vector<128x1152xf32>, vector<1152x256xf32>, vector<128x256xf32> -> vector<128x256xf32>
    %c0_35 = arith.constant 0 : index
    %c0_36 = arith.constant 0 : index
    %21 = vector.load %arg3[%c0_35, %c0_36] : memref<1x256xf32, #tpu.memory_space<vmem>>, vector<1x256xf32>
    %22 = vector.broadcast %21 : vector<1x256xf32> to vector<128x256xf32>
    %23 = arith.addf %20, %22 : vector<128x256xf32>
    %24 = vector.shape_cast %23 : vector<128x256xf32> to vector<2x64x256xf32>
    %c0_37 = arith.constant 0 : index
    %c0_38 = arith.constant 0 : index
    %c0_39 = arith.constant 0 : index
    %c0_40 = arith.constant 0 : index
    %25 = vector.load %arg0[%c0_37, %c0_38, %c0_39, %c0_40] : memref<2x8x8x128xf32, #tpu.memory_space<vmem>>, vector<2x8x8x128xf32>
    %26 = vector.shape_cast %25 : vector<2x8x8x128xf32> to vector<2x64x128xf32>
    %cst_41 = arith.constant dense<0.000000e+00> : vector<2x128xf32>
    %27 = vector.multi_reduction <add>, %26, %cst_41 [1] : vector<2x64x128xf32> to vector<2x128xf32>
    %28 = vector.shape_cast %27 : vector<2x128xf32> to vector<2x1x128xf32>
    %cst_42 = arith.constant 6.400000e+01 : f32
    %29 = vector.broadcast %cst_42 : f32 to vector<2x1x128xf32>
    %30 = arith.divf %28, %29 : vector<2x1x128xf32>
    %31 = vector.broadcast %30 : vector<2x1x128xf32> to vector<2x64x128xf32>
    %32 = arith.subf %26, %31 : vector<2x64x128xf32>
    %33 = arith.mulf %32, %32 : vector<2x64x128xf32>
    %cst_43 = arith.constant dense<0.000000e+00> : vector<2x128xf32>
    %34 = vector.multi_reduction <add>, %33, %cst_43 [1] : vector<2x64x128xf32> to vector<2x128xf32>
    %35 = vector.shape_cast %34 : vector<2x128xf32> to vector<2x1x128xf32>
    %cst_44 = arith.constant 6.400000e+01 : f32
    %36 = vector.broadcast %cst_44 : f32 to vector<2x1x128xf32>
    %37 = arith.divf %35, %36 : vector<2x1x128xf32>
    %38 = vector.broadcast %30 : vector<2x1x128xf32> to vector<2x64x128xf32>
    %39 = arith.subf %26, %38 : vector<2x64x128xf32>
    %cst_45 = arith.constant 9.99999974E-6 : f32
    %40 = vector.broadcast %cst_45 : f32 to vector<2x1x128xf32>
    %41 = arith.addf %37, %40 : vector<2x1x128xf32>
    %42 = math.rsqrt %41 : vector<2x1x128xf32>
    %43 = vector.broadcast %42 : vector<2x1x128xf32> to vector<2x64x128xf32>
    %44 = arith.mulf %39, %43 : vector<2x64x128xf32>
    %45 = vector.extract_strided_slice %24 {offsets = [0, 0, 0], sizes = [2, 64, 128], strides = [1, 1, 1]} : vector<2x64x256xf32> to vector<2x64x128xf32>
    %46 = arith.mulf %44, %45 : vector<2x64x128xf32>
    %47 = vector.extract_strided_slice %24 {offsets = [0, 0, 128], sizes = [2, 64, 128], strides = [1, 1, 1]} : vector<2x64x256xf32> to vector<2x64x128xf32>
    %48 = arith.addf %46, %47 : vector<2x64x128xf32>
    %cst_46 = arith.constant 0.000000e+00 : f32
    %49 = vector.broadcast %cst_46 : f32 to vector<2x10x10x128xf32>
    %c0_47 = arith.constant 0 : index
    %c0_48 = arith.constant 0 : index
    %c0_49 = arith.constant 0 : index
    %c0_50 = arith.constant 0 : index
    %50 = vector.load %arg7[%c0_47, %c0_48, %c0_49, %c0_50] : memref<2x10x10x128xf32, #tpu.memory_space<vmem>>, vector<2x10x10x128xf32>
    tpu.vector_store %arg7[%c0_47, %c0_48, %c0_49, %c0_50], %49 {strides = array<i32>} : memref<2x10x10x128xf32, #tpu.memory_space<vmem>>, vector<2x10x10x128xf32>,
    %51 = vector.shape_cast %48 : vector<2x64x128xf32> to vector<2x8x8x128xf32>
    %c0_51 = arith.constant 0 : index
    %c1_52 = arith.constant 1 : index
    %c1_53 = arith.constant 1 : index
    %c0_54 = arith.constant 0 : index
    %52 = vector.load %arg7[%c0_51, %c1_52, %c1_53, %c0_54] : memref<2x10x10x128xf32, #tpu.memory_space<vmem>>, vector<2x8x8x128xf32>
    tpu.vector_store %arg7[%c0_51, %c1_52, %c1_53, %c0_54], %51 {strides = array<i32>} : memref<2x10x10x128xf32, #tpu.memory_space<vmem>>, vector<2x8x8x128xf32>,
    %c0_55 = arith.constant 0 : index
    %c0_56 = arith.constant 0 : index
    %c0_57 = arith.constant 0 : index
    %c0_58 = arith.constant 0 : index
    %53 = vector.load %arg7[%c0_55, %c0_56, %c0_57, %c0_58] : memref<2x10x10x128xf32, #tpu.memory_space<vmem>>, vector<2x8x8x128xf32>
    %54 = vector.shape_cast %53 : vector<2x8x8x128xf32> to vector<128x128xf32>
    %c0_59 = arith.constant 0 : index
    %c0_60 = arith.constant 0 : index
    %c1_61 = arith.constant 1 : index
    %c0_62 = arith.constant 0 : index
    %55 = vector.load %arg7[%c0_59, %c0_60, %c1_61, %c0_62] : memref<2x10x10x128xf32, #tpu.memory_space<vmem>>, vector<2x8x8x128xf32>
    %56 = vector.shape_cast %55 : vector<2x8x8x128xf32> to vector<128x128xf32>
    %c0_63 = arith.constant 0 : index
    %c0_64 = arith.constant 0 : index
    %c2_65 = arith.constant 2 : index
    %c0_66 = arith.constant 0 : index
    %57 = vector.load %arg7[%c0_63, %c0_64, %c2_65, %c0_66] : memref<2x10x10x128xf32, #tpu.memory_space<vmem>>, vector<2x8x8x128xf32>
    %58 = vector.shape_cast %57 : vector<2x8x8x128xf32> to vector<128x128xf32>
    %c0_67 = arith.constant 0 : index
    %c1_68 = arith.constant 1 : index
    %c0_69 = arith.constant 0 : index
    %c0_70 = arith.constant 0 : index
    %59 = vector.load %arg7[%c0_67, %c1_68, %c0_69, %c0_70] : memref<2x10x10x128xf32, #tpu.memory_space<vmem>>, vector<2x8x8x128xf32>
    %60 = vector.shape_cast %59 : vector<2x8x8x128xf32> to vector<128x128xf32>
    %c0_71 = arith.constant 0 : index
    %c1_72 = arith.constant 1 : index
    %c1_73 = arith.constant 1 : index
    %c0_74 = arith.constant 0 : index
    %61 = vector.load %arg7[%c0_71, %c1_72, %c1_73, %c0_74] : memref<2x10x10x128xf32, #tpu.memory_space<vmem>>, vector<2x8x8x128xf32>
    %62 = vector.shape_cast %61 : vector<2x8x8x128xf32> to vector<128x128xf32>
    %c0_75 = arith.constant 0 : index
    %c1_76 = arith.constant 1 : index
    %c2_77 = arith.constant 2 : index
    %c0_78 = arith.constant 0 : index
    %63 = vector.load %arg7[%c0_75, %c1_76, %c2_77, %c0_78] : memref<2x10x10x128xf32, #tpu.memory_space<vmem>>, vector<2x8x8x128xf32>
    %64 = vector.shape_cast %63 : vector<2x8x8x128xf32> to vector<128x128xf32>
    %c0_79 = arith.constant 0 : index
    %c2_80 = arith.constant 2 : index
    %c0_81 = arith.constant 0 : index
    %c0_82 = arith.constant 0 : index
    %65 = vector.load %arg7[%c0_79, %c2_80, %c0_81, %c0_82] : memref<2x10x10x128xf32, #tpu.memory_space<vmem>>, vector<2x8x8x128xf32>
    %66 = vector.shape_cast %65 : vector<2x8x8x128xf32> to vector<128x128xf32>
    %c0_83 = arith.constant 0 : index
    %c2_84 = arith.constant 2 : index
    %c1_85 = arith.constant 1 : index
    %c0_86 = arith.constant 0 : index
    %67 = vector.load %arg7[%c0_83, %c2_84, %c1_85, %c0_86] : memref<2x10x10x128xf32, #tpu.memory_space<vmem>>, vector<2x8x8x128xf32>
    %68 = vector.shape_cast %67 : vector<2x8x8x128xf32> to vector<128x128xf32>
    %c0_87 = arith.constant 0 : index
    %c2_88 = arith.constant 2 : index
    %c2_89 = arith.constant 2 : index
    %c0_90 = arith.constant 0 : index
    %69 = vector.load %arg7[%c0_87, %c2_88, %c2_89, %c0_90] : memref<2x10x10x128xf32, #tpu.memory_space<vmem>>, vector<2x8x8x128xf32>
    %70 = vector.shape_cast %69 : vector<2x8x8x128xf32> to vector<128x128xf32>
    %71 = tpu.concatenate %54, %56, %58, %60, %62, %64, %66, %68, %70 in 1 : vector<128x128xf32>, vector<128x128xf32>, vector<128x128xf32>, vector<128x128xf32>, vector<128x128xf32>, vector<128x128xf32>, vector<128x128xf32>, vector<128x128xf32>, vector<128x128xf32> -> vector<128x1152xf32>
    %c0_91 = arith.constant 0 : index
    %c0_92 = arith.constant 0 : index
    %72 = vector.load %arg4[%c0_91, %c0_92] : memref<1152x128xf32, #tpu.memory_space<vmem>>, vector<1152x128xf32>
    %cst_93 = arith.constant dense<0.000000e+00> : vector<128x128xf32>
    %73 = tpu.matmul %71, %72, %cst_93 {dimension_numbers = #tpu.dot_dimension_numbers<[1], [0], [0], [1], [0, 0, 1, 1], [], []>} : vector<128x1152xf32>, vector<1152x128xf32>, vector<128x128xf32> -> vector<128x128xf32>
    %c0_94 = arith.constant 0 : index
    %c0_95 = arith.constant 0 : index
    %74 = vector.load %arg5[%c0_94, %c0_95] : memref<1x128xf32, #tpu.memory_space<vmem>>, vector<1x128xf32>
    %75 = vector.broadcast %74 : vector<1x128xf32> to vector<128x128xf32>
    %76 = arith.addf %73, %75 : vector<128x128xf32>
    %cst_96 = arith.constant 0.000000e+00 : f32
    %77 = vector.broadcast %cst_96 : f32 to vector<128x128xf32>
    %78 = arith.cmpf oge, %76, %77 : vector<128x128xf32>
    %cst_97 = arith.constant 2.000000e-01 : f32
    %79 = vector.broadcast %cst_97 : f32 to vector<128x128xf32>
    %80 = arith.mulf %79, %76 : vector<128x128xf32>
    %81 = arith.select %78, %76, %80 : vector<128x128xi1>, vector<128x128xf32>
    %cst_98 = arith.constant 1.41421354 : f32
    %82 = vector.broadcast %cst_98 : f32 to vector<128x128xf32>
    %83 = arith.mulf %81, %82 : vector<128x128xf32>
    %c0_99 = arith.constant 0 : index
    %c0_100 = arith.constant 0 : index
    %84 = vector.load %arg6[%c0_99, %c0_100] : memref<128x128xf32, #tpu.memory_space<vmem>>, vector<128x128xf32>
    tpu.vector_store %arg6[%c0_99, %c0_100], %83 {strides = array<i32>} : memref<128x128xf32, #tpu.memory_space<vmem>>, vector<128x128xf32>,
    return
  }
}

</mosaic_0001>

<bundles_post_ra>
// kernel: styled_conv_forward.1
= control target key start
LH: loop header
LB: loop body
LE: loop exit
PB: predicated region body
PF: predicated region fallthrough
CT: control target
= control target key end

     0   :  { %11 = vsyncpa [#allocation4], 0  ;;  %s5359_s0 = inlined_call_operand.hbm [shape: f32[2,8,8,128], index: 0, kind: input, shape index: {}]   ;;  %s5360_s1 = inlined_call_operand.vmem [shape: f32[2,10,10,128], index: 1, kind: input, shape index: {}]   ;;  %s5361_s2 = inlined_call_operand.hbm [shape: f32[1152,256], index: 2, kind: input, shape index: {}]   ;;  %s5362_s3 = inlined_call_operand.hbm [shape: f32[1,256], index: 3, kind: input, shape index: {}]   ;;  %s5363_s4 = inlined_call_operand.hbm [shape: f32[1152,128], index: 4, kind: input, shape index: {}]   ;;  %s5364_s5 = inlined_call_operand.vmem [shape: f32[1,128], index: 5, kind: input, shape index: {}]   ;;  %s5365_s6 = inlined_call_operand.hbm [shape: f32[128,128], index: 6, kind: output, shape index: {}]  }
   0x1   :  { %12 = vsyncpa [#allocation7], 0 }
   0x2   :  { %13 = vsyncpa [#allocation10], 0  ;;  %s34_s23 = sshll.u32 %s5361_s2, 4  ;;  %s35_s23 = int_to_ptr.hbm [resolvable:$true] %s34_s23 }
   0x3   :  { %14 = vsyncpa [#allocation5], 0  ;;  %s3294_s24 = smov [#allocation6]   ;;  %s19_s28 = sshll.u32 %s5359_s0, 4  ;;  %s20_s28 = int_to_ptr.hbm [resolvable:$true] %s19_s28 }
   0x4   :  { %s36_s25 = sshll.u32 %s3294_s24, 4  ;;  %s3295_s29 = smov 256   ;;  %s37_s25 = int_to_ptr.vmem [resolvable:$true] %s36_s25 }
   0x5   :  { %s3296_s30 = smov 16   ;;  %s3297_s7 = smov [#allocation3]  }
   0x6   :  { %42 = dma.hbm_to_vmem [thread:$0]  %s35_s23, 36864, %s37_s25, [#allocation7], %s3295_s29, %s3295_s29, %s3296_s30  }
   0x7   :  { %s21_s8 = sshll.u32 %s3297_s7, 4  ;;  %s3298_s9 = smov 128   ;;  %s22_s8 = int_to_ptr.vmem [resolvable:$true] %s21_s8 }
   0x8   :  { %s3299_s10 = smov 8   ;;  %s48_s12 = sshll.u32 %s5362_s3, 4  ;;  %s49_s12 = int_to_ptr.hbm [resolvable:$true] %s48_s12 }
   0x9   :  { %27 = dma.hbm_to_vmem [thread:$0]  %s20_s28, 2048, %s22_s8, [#allocation4], %s3298_s9, %s3298_s9, %s3299_s10  }
   0xa   :  { %s3300_s13 = smov [#allocation8]   ;;  %s58_s16 = sshll.u32 %s5363_s4, 4  ;;  %s59_s16 = int_to_ptr.hbm [resolvable:$true] %s58_s16 }
   0xb   :  { %s50_s0 = sshll.u32 %s3300_s13, 4  ;;  %s3301_s17 = smov [#allocation9]   ;;  %s51_s0 = int_to_ptr.vmem [resolvable:$true] %s50_s0 }
   0xc   :  { %53 = dma.hbm_to_vmem [thread:$0]  %s49_s12, 32, %s51_s0, [#allocation7]  }
   0xd   :  { %s60_s18 = sshll.u32 %s3301_s17, 4  ;;  %s61_s18 = int_to_ptr.vmem [resolvable:$true] %s60_s18 }
   0xe   :  { %66 = dma.hbm_to_vmem [thread:$0]  %s59_s16, 18432, %s61_s18, [#allocation10], %s3298_s9, %s3298_s9, %s3299_s10  }
   0xf   :  { %3286 = dma.done.wait [#allocation4], 2048  }
  0x10   :  { %3287 = vsyncadd [#allocation4], 4294965248 }
  0x11   :  { %3288 = dma.done.wait [#allocation7], 36896  }
  0x12   :  { %3289 = vsyncadd [#allocation7], 4294930400 }
  0x13   :  { %3290 = dma.done.wait [#allocation10], 18432  }
  0x14   :  { %3291 = vsyncadd [#allocation10], 4294948864  ;;  %v261_v0 = vld [vmem:[#allocation6 + $0xf0] sm:$0xff]  ;;  %v259_v1 = vld [vmem:[#allocation6 + $0xe0] sm:$0xff]  ;;  %s2897_s23 = sshll.u32 %s5365_s6, 4  ;;  %s2898_s23 = int_to_ptr.hbm [resolvable:$true] %s2897_s23 }
  0x15   :  { %525 = vmatpush.msra.mxu0 %v261_v0  ;;  %3008 = vmatpush.msra.mxu3 %v261_v0  ;;  %v3358_v2 = vld [vmem:[#allocation6 + $0x2f0] sm:$0xff]  ;;  %v3360_v3 = vld [vmem:[#allocation6 + $0x2e0] sm:$0xff] }
  0x16   :  { %v257_v4 = vld [vmem:[#allocation6 + $0xd0] sm:$0xff]  ;;  %3040 = vmatpush.msra.mxu2 %v3358_v2  ;;  %v3367_v7 = vld [vmem:[#allocation6 + $0x1e0] sm:$0xff] }
  0x17   :  { %v3363_v5 = vld [vmem:[#allocation6 + $0x1f0] sm:$0xff]  ;;  %526 = vmatpush.msra.mxu0 %v259_v1  ;;  %3009 = vmatpush.msra.mxu3 %v259_v1  ;;  %v255_v8 = vld [vmem:[#allocation6 + $0xc0] sm:$0xff] }
  0x18   :  { %v3365_v6 = vld [vmem:[#allocation6 + $0x2d0] sm:$0xff]  ;;  %3041 = vmatpush.msra.mxu2 %v3360_v3  ;;  %3024 = vmatpush.msra.mxu1 %v3363_v5  ;;  %v3371_v9 = vld [vmem:[#allocation6 + $0x2c0] sm:$0xff] }
  0x19   :  { %527 = vmatpush.msra.mxu0 %v257_v4  ;;  %3010 = vmatpush.msra.mxu3 %v257_v4  ;;  %v3373_v10 = vld [vmem:[#allocation6 + $0x1d0] sm:$0xff]  ;;  %v3379_v13 = vld [vmem:[#allocation6 + $0x1c0] sm:$0xff] }
  0x1a   :  { %v253_v11 = vld [vmem:[#allocation6 + $0xb0] sm:$0xff]  ;;  %3042 = vmatpush.msra.mxu2 %v3365_v6  ;;  %3025 = vmatpush.msra.mxu1 %v3367_v7  ;;  %v251_v14 = vld [vmem:[#allocation6 + $0xa0] sm:$0xff] }
  0x1b   :  { %528 = vmatpush.msra.mxu0 %v255_v8  ;;  %3011 = vmatpush.msra.mxu3 %v255_v8  ;;  %v3377_v12 = vld [vmem:[#allocation6 + $0x2b0] sm:$0xff]  ;;  %v3383_v15 = vld [vmem:[#allocation6 + $0x2a0] sm:$0xff] }
  0x1c   :  { %3043 = vmatpush.msra.mxu2 %v3371_v9  ;;  %3026 = vmatpush.msra.mxu1 %v3373_v10  ;;  %v3385_v16 = vld [vmem:[#allocation6 + $0x1b0] sm:$0xff]  ;;  %v3391_v19 = vld [vmem:[#allocation6 + $0x1a0] sm:$0xff] }
  0x1d   :  { %529 = vmatpush.msra.mxu0 %v253_v11  ;;  %3012 = vmatpush.msra.mxu3 %v253_v11  ;;  %v249_v17 = vld [vmem:[#allocation6 + $0x90] sm:$0xff]  ;;  %v247_v20 = vld [vmem:[#allocation6 + $0x80] sm:$0xff] }
  0x1e   :  { %3044 = vmatpush.msra.mxu2 %v3377_v12  ;;  %3027 = vmatpush.msra.mxu1 %v3379_v13  ;;  %v3389_v18 = vld [vmem:[#allocation6 + $0x290] sm:$0xff]  ;;  %v3395_v21 = vld [vmem:[#allocation6 + $0x280] sm:$0xff] }
  0x1f   :  { %530 = vmatpush.msra.mxu0 %v251_v14  ;;  %3013 = vmatpush.msra.mxu3 %v251_v14  ;;  %v3397_v22 = vld [vmem:[#allocation6 + $0x190] sm:$0xff]  ;;  %v3403_v25 = vld [vmem:[#allocation6 + $0x180] sm:$0xff] }
  0x20   :  { %3045 = vmatpush.msra.mxu2 %v3383_v15  ;;  %3028 = vmatpush.msra.mxu1 %v3385_v16  ;;  %v245_v23 = vld [vmem:[#allocation6 + $0x70] sm:$0xff]  ;;  %v243_v26 = vld [vmem:[#allocation6 + $0x60] sm:$0xff] }
  0x21   :  { %531 = vmatpush.msra.mxu0 %v249_v17  ;;  %3014 = vmatpush.msra.mxu3 %v249_v17  ;;  %v3401_v24 = vld [vmem:[#allocation6 + $0x270] sm:$0xff]  ;;  %v3407_v27 = vld [vmem:[#allocation6 + $0x260] sm:$0xff] }
  0x22   :  { %3046 = vmatpush.msra.mxu2 %v3389_v18  ;;  %3029 = vmatpush.msra.mxu1 %v3391_v19  ;;  %v3409_v28 = vld [vmem:[#allocation6 + $0x170] sm:$0xff]  ;;  %v3415_v31 = vld [vmem:[#allocation6 + $0x160] sm:$0xff] }
  0x23   :  { %532 = vmatpush.msra.mxu0 %v247_v20  ;;  %3015 = vmatpush.msra.mxu3 %v247_v20  ;;  %v241_v29 = vld [vmem:[#allocation6 + $0x50] sm:$0xff]  ;;  %v239_v32 = vld [vmem:[#allocation6 + $0x40] sm:$0xff] }
  0x24   :  { %3047 = vmatpush.msra.mxu2 %v3395_v21  ;;  %3030 = vmatpush.msra.mxu1 %v3397_v22  ;;  %v3413_v30 = vld [vmem:[#allocation6 + $0x250] sm:$0xff]  ;;  %v3419_v33 = vld [vmem:[#allocation6 + $0x240] sm:$0xff] }
  0x25   :  { %533 = vmatpush.msra.mxu0 %v245_v23  ;;  %3016 = vmatpush.msra.mxu3 %v245_v23  ;;  %v3421_v34 = vld [vmem:[#allocation6 + $0x150] sm:$0xff]  ;;  %v3427_v37 = vld [vmem:[#allocation6 + $0x140] sm:$0xff] }
  0x26   :  { %3048 = vmatpush.msra.mxu2 %v3401_v24  ;;  %3031 = vmatpush.msra.mxu1 %v3403_v25  ;;  %v237_v35 = vld [vmem:[#allocation6 + $0x30] sm:$0xff]  ;;  %v235_v38 = vld [vmem:[#allocation6 + $0x20] sm:$0xff] }
  0x27   :  { %534 = vmatpush.msra.mxu0 %v243_v26  ;;  %3017 = vmatpush.msra.mxu3 %v243_v26  ;;  %v3425_v36 = vld [vmem:[#allocation6 + $0x230] sm:$0xff]  ;;  %v3431_v39 = vld [vmem:[#allocation6 + $0x220] sm:$0xff] }
  0x28   :  { %3049 = vmatpush.msra.mxu2 %v3407_v27  ;;  %3032 = vmatpush.msra.mxu1 %v3409_v28  ;;  %v3433_v40 = vld [vmem:[#allocation6 + $0x130] sm:$0xff]  ;;  %v3439_v43 = vld [vmem:[#allocation6 + $0x120] sm:$0xff] }
  0x29   :  { %535 = vmatpush.msra.mxu0 %v241_v29  ;;  %3018 = vmatpush.msra.mxu3 %v241_v29  ;;  %v233_v41 = vld [vmem:[#allocation6 + $0x10] sm:$0xff]  ;;  %v231_v44 = vld [vmem:[#allocation6] sm:$0xff] }
  0x2a   :  { %3050 = vmatpush.msra.mxu2 %v3413_v30  ;;  %3033 = vmatpush.msra.mxu1 %v3415_v31  ;;  %v3437_v42 = vld [vmem:[#allocation6 + $0x210] sm:$0xff]  ;;  %v85_v45 = vld [vmem:[%s5360_s1] sm:$0xff] }
  0x2b   :  { %536 = vmatpush.msra.mxu0 %v239_v32  ;;  %3019 = vmatpush.msra.mxu3 %v239_v32  ;;  %v3449_v46 = vld [vmem:[%s5360_s1 + $0x40] sm:$0xff]  ;;  %v357_v47 = vld [vmem:[#allocation6 + $0x3f0] sm:$0xff] }
  0x2c   :  { %3051 = vmatpush.msra.mxu2 %v3419_v33  ;;  %3034 = vmatpush.msra.mxu1 %v3421_v34  ;;  %v3453_v48 = vld [vmem:[#allocation6 + $0x200] sm:$0xff]  ;;  %v3455_v49 = vld [vmem:[#allocation6 + $0x110] sm:$0xff] }
  0x2d   :  { %537 = vmatpush.msra.mxu0 %v237_v35  ;;  %3020 = vmatpush.msra.mxu3 %v237_v35  ;;  %v3461_v50 = vld [vmem:[%s5360_s1 + $0x42] sm:$0xff]  ;;  %v421_v54 = vld [vmem:[#allocation6 + $0x5f0] sm:$0xff] }
  0x2e   :  { %3052 = vmatpush.msra.mxu2 %v3425_v36  ;;  %3035 = vmatpush.msra.mxu1 %v3427_v37  ;;  %v355_v51 = vld [vmem:[#allocation6 + $0x3e0] sm:$0xff]  ;;  %v353_v55 = vld [vmem:[#allocation6 + $0x3d0] sm:$0xff] }
  0x2f   :  { %538 = vmatpush.msra.mxu0 %v235_v38  ;;  %3021 = vmatpush.msra.mxu3 %v235_v38  ;;  %v3464_v52 = vld [vmem:[#allocation6 + $0x100] sm:$0xff]  ;;  %v3480_v56 = vld [vmem:[%s5360_s1 + $0x10] sm:$0xff] }
  0x30   :  { %3053 = vmatpush.msra.mxu2 %v3431_v39  ;;  %3036 = vmatpush.msra.mxu1 %v3433_v40  ;;  %v3471_v53 = vld [vmem:[%s5360_s1 + $0x41] sm:$0xff]  ;;  %v3485_v57 = vld [vmem:[%s5360_s1 + $0x50] sm:$0xff] }
  0x31   :  { %539 = vmatpush.msra.mxu0 %v233_v41  ;;  %3022 = vmatpush.msra.mxu3 %v233_v41  ;;  %v419_v58 = vld [vmem:[#allocation6 + $0x5e0] sm:$0xff]  ;;  %v3494_v60 = vld [vmem:[%s5360_s1 + $0x52] sm:$0xff] }
  0x32   :  { %3054 = vmatpush.msra.mxu2 %v3437_v42  ;;  %3037 = vmatpush.msra.mxu1 %v3439_v43  ;;  %v351_v59 = vld [vmem:[#allocation6 + $0x3c0] sm:$0xff]  ;;  %v417_v61 = vld [vmem:[#allocation6 + $0x5d0] sm:$0xff] }
  0x33   :  { %540 = vmatpush.msra.mxu0 %v231_v44  ;;  %3023 = vmatpush.msra.mxu3 %v231_v44  ;;  %v349_v62 = vld [vmem:[#allocation6 + $0x3b0] sm:$0xff]  ;;  %v415_v0 = vld [vmem:[#allocation6 + $0x5c0] sm:$0xff] }
  0x34   :  { %541 = vmatmul.f32.vlgmr.msra.gmra.mxu0 %v85_v45  ;;  %553 = vmatmul.f32.vlgmr.msra.gmra.mxu3 %v3449_v46  ;;  %v3500_v63 = vld [vmem:[%s5360_s1 + $0x51] sm:$0xff]  ;;  %v347_v1 = vld [vmem:[#allocation6 + $0x3a0] sm:$0xff] }
  0x35   :  { %720 = vmatpush.msrb.mxu3 %v357_v47  ;;  %590 = vmatpush.msrb.mxu0 %v3363_v5  ;;  %v3508_v4 = vld [vmem:[%s5360_s1 + $0x20] sm:$0xff]  ;;  %v345_v8 = vld [vmem:[#allocation6 + $0x390] sm:$0xff] }
  0x36   :  { %3055 = vmatpush.msra.mxu2 %v3453_v48  ;;  %3038 = vmatpush.msra.mxu1 %v3455_v49  ;;  %v3513_v5 = vld [vmem:[%s5360_s1 + $0x60] sm:$0xff]  ;;  %v341_v17 = vld [vmem:[#allocation6 + $0x370] sm:$0xff] }
  0x37   :  { %591 = vmatpush.msrb.mxu0 %v3367_v7  ;;  %683 = vmatmul.f32.vlgmr.msra.gmra.mxu2 %v3461_v50  ;;  %v413_v7 = vld [vmem:[#allocation6 + $0x5b0] sm:$0xff]  ;;  %v411_v11 = vld [vmem:[#allocation6 + $0x5a0] sm:$0xff] }
  0x38   :  { %721 = vmatpush.msrb.mxu3 %v355_v51  ;;  %3039 = vmatpush.msra.mxu1 %v3464_v52  ;;  %v3528_v14 = vld [vmem:[%s5360_s1 + $0x61] sm:$0xff]  ;;  %v3541_v20 = vld [vmem:[%s5360_s1 + $0x70] sm:$0xff] }
  0x39   :  { %592 = vmatpush.msrb.mxu0 %v3373_v10  ;;  %618 = vmatmul.f32.vlgmr.msra.gmra.mxu1 %v3471_v53  ;;  %v3522_v10 = vld [vmem:[%s5360_s1 + $0x62] sm:$0xff]  ;;  %v405_v26 = vld [vmem:[#allocation6 + $0x570] sm:$0xff] }
  0x3a   :  { %850 = vmatpush.msrb.mxu1 %v421_v54  ;;  %722 = vmatpush.msrb.mxu3 %v353_v55  ;;  %v339_v23 = vld [vmem:[#allocation6 + $0x360] sm:$0xff]  ;;  %v337_v29 = vld [vmem:[#allocation6 + $0x350] sm:$0xff] }
  0x3b   :  { %593 = vmatpush.msrb.mxu0 %v3379_v13  ;;  %v343_v13 = vld [vmem:[#allocation6 + $0x380] sm:$0xff]  ;;  %v453_v41 = vld [vmem:[#allocation6 + $0x6f0] sm:$0xff] }
  0x3c   :  { %544 = vmatmul.f32.gmra.mxu0 %v3480_v56  ;;  %556 = vmatmul.f32.gmra.mxu3 %v3485_v57  ;;  %v3567_v32 = vld [vmem:[%s5360_s1 + $0x1] sm:$0xff]  ;;  %v449_v45 = vld [vmem:[#allocation6 + $0x6d0] sm:$0xff] }
  0x3d   :  { %594 = vmatpush.msrb.mxu0 %v3385_v16  ;;  %851 = vmatpush.msrb.mxu1 %v419_v58  ;;  %v409_v16 = vld [vmem:[#allocation6 + $0x590] sm:$0xff]  ;;  %v403_v35 = vld [vmem:[#allocation6 + $0x560] sm:$0xff] }
  0x3e   :  { %723 = vmatpush.msrb.mxu3 %v351_v59  ;;  %v109_v38 = vld [vmem:[%s5360_s1 + $0xa1] sm:$0xff]  ;;  %915 = vmatpush.msrb.mxu2 %v453_v41  ;;  %v3603_v47 = vld [vmem:[%s5360_s1 + $0xb1] sm:$0xff] }
  0x3f   :  { %595 = vmatpush.msrb.mxu0 %v3391_v19  ;;  %686 = vmatmul.f32.gmra.mxu2 %v3494_v60  ;;  %v3536_v19 = vld [vmem:[%s5360_s1 + $0x30] sm:$0xff]  ;;  %v451_v44 = vld [vmem:[#allocation6 + $0x6e0] sm:$0xff] }
  0x40   :  { %852 = vmatpush.msrb.mxu1 %v417_v61  ;;  %724 = vmatpush.msrb.mxu3 %v349_v62  ;;  %v331_v51 = vld [vmem:[#allocation6 + $0x320] sm:$0xff]  ;;  %v397_v55 = vld [vmem:[#allocation6 + $0x530] sm:$0xff] }
  0x41   :  { %596 = vmatpush.msrb.mxu0 %v3397_v22  ;;  %621 = vmatmul.f32.gmra.mxu1 %v3500_v63  ;;  %v407_v22 = vld [vmem:[#allocation6 + $0x580] sm:$0xff]  ;;  %v329_v59 = vld [vmem:[#allocation6 + $0x310] sm:$0xff] }
  0x42   :  { %853 = vmatpush.msrb.mxu1 %v415_v0  ;;  %725 = vmatpush.msrb.mxu3 %v347_v1  ;;  %v443_v54 = vld [vmem:[#allocation6 + $0x6a0] sm:$0xff]  ;;  %v3644_v61 = vld [vmem:[%s5360_s1 + $0x31] sm:$0xff] }
  0x43   :  { %597 = vmatpush.msrb.mxu0 %v3403_v25  ;;  %v3550_v25 = vld [vmem:[%s5360_s1 + $0x72] sm:$0xff]  ;;  %916 = vmatpush.msrb.mxu2 %v451_v44  ;;  %v3631_v58 = vld [vmem:[%s5360_s1 + $0xc1] sm:$0xff] }
  0x44   :  { %547 = vmatmul.f32.gmra.mxu0 %v3508_v4  ;;  %559 = vmatmul.f32.gmra.mxu3 %v3513_v5  ;;  %v395_v62 = vld [vmem:[#allocation6 + $0x520] sm:$0xff]  ;;  %v437_v0 = vld [vmem:[#allocation6 + $0x670] sm:$0xff]  ;;  %v262_v44 = vld [vmem:[#allocation6 + $0xf8] sm:$0xff] }
  0x45   :  { %598 = vmatpush.msrb.mxu0 %v3409_v28  ;;  %854 = vmatpush.msrb.mxu1 %v413_v7  ;;  %v3556_v28 = vld [vmem:[%s5360_s1 + $0x71] sm:$0xff]  ;;  %v327_v1 = vld [vmem:[#allocation6 + $0x300] sm:$0xff] }
  0x46   :  { %726 = vmatpush.msrb.mxu3 %v345_v8  ;;  %917 = vmatpush.msrb.mxu2 %v449_v45  ;;  %v3659_v7 = vld [vmem:[%s5360_s1 + $0xd1] sm:$0xff]  ;;  %v379_v41 = vld [vmem:[#allocation6 + $0x4a0] sm:$0xff] }
  0x47   :  { %599 = vmatpush.msrb.mxu0 %v3415_v31  ;;  %689 = vmatmul.f32.gmra.mxu2 %v3522_v10  ;;  %v93_v31 = vld [vmem:[%s5360_s1 + $0xa0] sm:$0xff]  ;;  %v393_v8 = vld [vmem:[#allocation6 + $0x510] sm:$0xff] }
  0x48   :  { %855 = vmatpush.msrb.mxu1 %v411_v11  ;;  %727 = vmatpush.msrb.mxu3 %v343_v13  ;;  %v117_v11 = vld [vmem:[%s5360_s1 + $0x2] sm:$0xff]  ;;  %v389_v13 = vld [vmem:[#allocation6 + $0x4f0] sm:$0xff] }
  0x49   :  { %600 = vmatpush.msrb.mxu0 %v3421_v34  ;;  %624 = vmatmul.f32.gmra.mxu1 %v3528_v14  ;;  %v125_v34 = vld [vmem:[%s5360_s1 + $0xa2] sm:$0xff]  ;;  %v425_v45 = vld [vmem:[#allocation6 + $0x610] sm:$0xff] }
  0x4a   :  { %856 = vmatpush.msrb.mxu1 %v409_v16  ;;  %728 = vmatpush.msrb.mxu3 %v341_v17  ;;  %v387_v16 = vld [vmem:[#allocation6 + $0x4e0] sm:$0xff]  ;;  %v485_v17 = vld [vmem:[#allocation6 + $0x7f0] sm:$0xff] }
  0x4b   :  { %601 = vmatpush.msrb.mxu0 %v3427_v37  ;;  %v335_v37 = vld [vmem:[#allocation6 + $0x340] sm:$0xff] }
  0x4c   :  { %550 = vmatmul.f32.gmra.mxu0 %v3536_v19  ;;  %562 = vmatmul.f32.gmra.mxu3 %v3541_v20 }
  0x4d   :  { %602 = vmatpush.msrb.mxu0 %v3433_v40  ;;  %857 = vmatpush.msrb.mxu1 %v407_v22  ;;  %v401_v40 = vld [vmem:[#allocation6 + $0x550] sm:$0xff]  ;;  %v431_v22 = vld [vmem:[#allocation6 + $0x640] sm:$0xff] }
  0x4e   :  { %729 = vmatpush.msrb.mxu3 %v339_v23  ;;  %v3683_v23 = vld [vmem:[%s5360_s1 + $0xe1] sm:$0xff] }
  0x4f   :  { %603 = vmatpush.msrb.mxu0 %v3439_v43  ;;  %692 = vmatmul.f32.gmra.mxu2 %v3550_v25  ;;  %v3584_v43 = vld [vmem:[%s5360_s1 + $0xb0] sm:$0xff] }
  0x50   :  { %858 = vmatpush.msrb.mxu1 %v405_v26  ;;  %730 = vmatpush.msrb.mxu3 %v337_v29  ;;  %v385_v26 = vld [vmem:[#allocation6 + $0x4d0] sm:$0xff] }
  0x51   :  { %604 = vmatpush.msrb.mxu0 %v3455_v49  ;;  %627 = vmatmul.f32.gmra.mxu1 %v3556_v28  ;;  %v447_v49 = vld [vmem:[#allocation6 + $0x6c0] sm:$0xff]  ;;  %v429_v29 = vld [vmem:[#allocation6 + $0x630] sm:$0xff] }
  0x52   :  { %859 = vmatpush.msrb.mxu1 %v403_v35  ;;  %731 = vmatpush.msrb.mxu3 %v335_v37  ;;  %v3695_v35 = vld [vmem:[%s5360_s1 + $0x12] sm:$0xff] }
  0x53   :  { %605 = vmatpush.msrb.mxu0 %v3464_v52  ;;  %v3616_v52 = vld [vmem:[%s5360_s1 + $0x21] sm:$0xff]  ;;  %918 = vmatpush.msrb.mxu2 %v447_v49  ;;  %v381_v37 = vld [vmem:[#allocation6 + $0x4b0] sm:$0xff] }
  0x54   :  { %565 = vmatmul.f32.gmra.mxu3 %v93_v31  ;;  %606 = vmatmul.f32.vlgmr.msrb.gmra.mxu0 %v3567_v32  ;;  %v383_v31 = vld [vmem:[#allocation6 + $0x4c0] sm:$0xff]  ;;  %v377_v49 = vld [vmem:[#allocation6 + $0x490] sm:$0xff] }
  0x55   :  { %655 = vmatpush.msra.mxu0 %v3358_v2  ;;  %860 = vmatpush.msrb.mxu1 %v401_v40  ;;  %v3589_v2 = vld [vmem:[%s5360_s1 + $0x11] sm:$0xff] }
  0x56   :  { %v3700_v40 = vld [vmem:[%s5360_s1 + $0xf2] sm:$0xff] }
  0x57   :  { %656 = vmatpush.msra.mxu0 %v3360_v3  ;;  %695 = vmatmul.f32.gmra.mxu2 %v125_v34  ;;  %v3597_v3 = vld [vmem:[%s5360_s1 + $0xb2] sm:$0xff] }
  0x58   :  { %v3689_v34 = vld [vmem:[%s5360_s1 + $0xf0] sm:$0xff] }
  0x59   :  { %657 = vmatpush.msra.mxu0 %v3365_v6  ;;  %630 = vmatmul.f32.gmra.mxu1 %v109_v38  ;;  %v333_v6 = vld [vmem:[#allocation6 + $0x330] sm:$0xff]  ;;  %v427_v38 = vld [vmem:[#allocation6 + $0x620] sm:$0xff] }
  0x5a   :  { %732 = vmatpush.msrb.mxu3 %v333_v6  ;;  %v483_v6 = vld [vmem:[#allocation6 + $0x7e0] sm:$0xff] }
  0x5b   :  { %658 = vmatpush.msra.mxu0 %v3371_v9  ;;  %v399_v9 = vld [vmem:[#allocation6 + $0x540] sm:$0xff] }
  0x5c   :  { %568 = vmatmul.f32.gmra.mxu3 %v3584_v43  ;;  %609 = vmatmul.f32.gmra.mxu0 %v3589_v2 }
  0x5d   :  { %659 = vmatpush.msra.mxu0 %v3377_v12  ;;  %861 = vmatpush.msrb.mxu1 %v399_v9  ;;  %v3611_v12 = vld [vmem:[%s5360_s1 + $0xc0] sm:$0xff]  ;;  %v3707_v9 = vld [vmem:[%s5360_s1 + $0xf1] sm:$0xff] }
  0x5e   :  { %733 = vmatpush.msrb.mxu3 %v331_v51  ;;  %v423_v51 = vld [vmem:[#allocation6 + $0x600] sm:$0xff] }
  0x5f   :  { %660 = vmatpush.msra.mxu0 %v3383_v15  ;;  %698 = vmatmul.f32.gmra.mxu2 %v3597_v3  ;;  %v445_v15 = vld [vmem:[#allocation6 + $0x6b0] sm:$0xff] }
  0x60   :  { %919 = vmatpush.msrb.mxu2 %v445_v15  ;;  %862 = vmatpush.msrb.mxu1 %v397_v55  ;;  %v375_v15 = vld [vmem:[#allocation6 + $0x480] sm:$0xff] }
  0x61   :  { %661 = vmatpush.msra.mxu0 %v3389_v18  ;;  %633 = vmatmul.f32.gmra.mxu1 %v3603_v47  ;;  %v3625_v18 = vld [vmem:[%s5360_s1 + $0xc2] sm:$0xff] }
  0x62   :  { %920 = vmatpush.msrb.mxu2 %v443_v54  ;;  %734 = vmatpush.msrb.mxu3 %v329_v59  ;;  %v3713_v54 = vld [vmem:[%s5360_s1 + $0x100] sm:$0xff] }
  0x63   :  { %662 = vmatpush.msra.mxu0 %v3395_v21  ;;  %v441_v21 = vld [vmem:[#allocation6 + $0x690] sm:$0xff]  ;;  %863 = vmatpush.msrb.mxu1 %v395_v62  ;;  %v3719_v55 = vld [vmem:[%s5360_s1 + $0x22] sm:$0xff] }
  0x64   :  { %571 = vmatmul.f32.gmra.mxu3 %v3611_v12  ;;  %612 = vmatmul.f32.gmra.mxu0 %v3616_v52  ;;  %v3724_v59 = vld [vmem:[%s5360_s1 + $0x102] sm:$0xff]  ;;  %v481_v62 = vld [vmem:[#allocation6 + $0x7d0] sm:$0xff] }
  0x65   :  { %663 = vmatpush.msra.mxu0 %v3401_v24  ;;  %v3639_v24 = vld [vmem:[%s5360_s1 + $0xd0] sm:$0xff]  ;;  %921 = vmatpush.msrb.mxu2 %v441_v21 }
  0x66   :  { %735 = vmatpush.msrb.mxu3 %v327_v1  ;;  %864 = vmatpush.msrb.mxu1 %v393_v8  ;;  %v373_v21 = vld [vmem:[#allocation6 + $0x470] sm:$0xff]  ;;  %v3731_v1 = vld [vmem:[%s5360_s1 + $0x101] sm:$0xff] }
  0x67   :  { %664 = vmatpush.msra.mxu0 %v3407_v27  ;;  %701 = vmatmul.f32.gmra.mxu2 %v3625_v18  ;;  %v439_v27 = vld [vmem:[#allocation6 + $0x680] sm:$0xff] }
  0x68   :  { %922 = vmatpush.msrb.mxu2 %v439_v27  ;;  %980 = vmatpush.msra.mxu3 %v485_v17  ;;  %v371_v27 = vld [vmem:[#allocation6 + $0x460] sm:$0xff] }
  0x69   :  { %665 = vmatpush.msra.mxu0 %v3413_v30  ;;  %636 = vmatmul.f32.gmra.mxu1 %v3631_v58  ;;  %v3653_v30 = vld [vmem:[%s5360_s1 + $0xd2] sm:$0xff]  ;;  %v367_v8 = vld [vmem:[#allocation6 + $0x440] sm:$0xff] }
  0x6a   :  { %923 = vmatpush.msrb.mxu2 %v437_v0  ;;  %981 = vmatpush.msra.mxu3 %v483_v6  ;;  %v260_v0 = vld [vmem:[#allocation6 + $0xe8] sm:$0xff]  ;;  %v363_v17 = vld [vmem:[#allocation6 + $0x420] sm:$0xff] }
  0x6b   :  { %666 = vmatpush.msra.mxu0 %v3419_v33  ;;  %v435_v33 = vld [vmem:[#allocation6 + $0x660] sm:$0xff]  ;;  %v256_v6 = vld [vmem:[#allocation6 + $0xc8] sm:$0xff] }
  0x6c   :  { %574 = vmatmul.f32.gmra.mxu3 %v3639_v24  ;;  %615 = vmatmul.f32.gmra.mxu0 %v3644_v61 }
  0x6d   :  { %667 = vmatpush.msra.mxu0 %v3425_v36  ;;  %v3667_v36 = vld [vmem:[%s5360_s1 + $0xe0] sm:$0xff]  ;;  %924 = vmatpush.msrb.mxu2 %v435_v33  ;;  %v369_v33 = vld [vmem:[#allocation6 + $0x450] sm:$0xff] }
  0x6e   :  { %982 = vmatpush.msra.mxu3 %v481_v62  ;;  %v250_v62 = vld [vmem:[#allocation6 + $0x98] sm:$0xff] }
  0x6f   :  { %668 = vmatpush.msra.mxu0 %v3431_v39  ;;  %704 = vmatmul.f32.gmra.mxu2 %v3653_v30  ;;  %v433_v39 = vld [vmem:[#allocation6 + $0x650] sm:$0xff] }
  0x70   :  { %925 = vmatpush.msrb.mxu2 %v433_v39  ;;  %v365_v39 = vld [vmem:[#allocation6 + $0x430] sm:$0xff] }
  0x71   :  { %669 = vmatpush.msra.mxu0 %v3437_v42  ;;  %639 = vmatmul.f32.gmra.mxu1 %v3659_v7  ;;  %v3678_v42 = vld [vmem:[%s5360_s1 + $0xe2] sm:$0xff] }
  0x72   :  { %926 = vmatpush.msrb.mxu2 %v431_v22  ;;  %v479_v22 = vld [vmem:[#allocation6 + $0x7c0] sm:$0xff] }
  0x73   :  { %670 = vmatpush.msra.mxu0 %v3453_v48  ;;  %v391_v48 = vld [vmem:[#allocation6 + $0x500] sm:$0xff]  ;;  %983 = vmatpush.msra.mxu3 %v479_v22 }
  0x74   :  { %577 = vmatmul.f32.gmra.mxu3 %v3667_v36  ;;  %671 = vmatmul.f32.vlgmr.msra.gmra.mxu0 %v117_v11  ;;  %v3737_v11 = vld [vmem:[%s5360_s1 + $0x110] sm:$0xff] }
  0x75   :  { %785 = vmatpush.msrb.mxu0 %v389_v13  ;;  %865 = vmatpush.msrb.mxu1 %v391_v48  ;;  %v3743_v13 = vld [vmem:[%s5360_s1 + $0x32] sm:$0xff] }
  0x76   :  { %927 = vmatpush.msrb.mxu2 %v429_v29  ;;  %v3755_v48 = vld [vmem:[%s5360_s1 + $0x111] sm:$0xff] }
  0x77   :  { %707 = vmatmul.f32.gmra.mxu2 %v3678_v42  ;;  %786 = vmatpush.msrb.mxu0 %v387_v16  ;;  %v3748_v16 = vld [vmem:[%s5360_s1 + $0x112] sm:$0xff] }
  0x78   :  { %928 = vmatpush.msrb.mxu2 %v427_v38  ;;  %1110 = vmatpush.msra.mxu1 %v262_v44  ;;  %v361_v29 = vld [vmem:[#allocation6 + $0x410] sm:$0xff]  ;;  %v515_v38 = vld [vmem:[#allocation6 + $0x8e0] sm:$0xff] }
  0x79   :  { %642 = vmatmul.f32.gmra.mxu1 %v3683_v23  ;;  %787 = vmatpush.msrb.mxu0 %v385_v26  ;;  %v258_v26 = vld [vmem:[#allocation6 + $0xd8] sm:$0xff]  ;;  %v513_v44 = vld [vmem:[#allocation6 + $0x8d0] sm:$0xff] }
  0x7a   :  { %929 = vmatpush.msrb.mxu2 %v425_v45  ;;  %1111 = vmatpush.msra.mxu1 %v260_v0  ;;  %v511_v45 = vld [vmem:[#allocation6 + $0x8c0] sm:$0xff] }
  0x7b   :  { %788 = vmatpush.msrb.mxu0 %v383_v31  ;;  %v359_v31 = vld [vmem:[#allocation6 + $0x400] sm:$0xff] }
  0x7c   :  { %580 = vmatmul.f32.gmra.mxu3 %v3689_v34  ;;  %674 = vmatmul.f32.gmra.mxu0 %v3695_v35 }
  0x7d   :  { %789 = vmatpush.msrb.mxu0 %v381_v37  ;;  %930 = vmatpush.msrb.mxu2 %v423_v51  ;;  %v517_v37 = vld [vmem:[#allocation6 + $0x8f0] sm:$0xff]  ;;  %v254_v51 = vld [vmem:[#allocation6 + $0xb8] sm:$0xff] }
  0x7e   :  { %1112 = vmatpush.msra.mxu1 %v258_v26 }
  0x7f   :  { %710 = vmatmul.f32.gmra.mxu2 %v3700_v40  ;;  %790 = vmatpush.msrb.mxu0 %v379_v41  ;;  %v477_v41 = vld [vmem:[#allocation6 + $0x7b0] sm:$0xff] }
  0x80   :  { %984 = vmatpush.msra.mxu3 %v477_v41  ;;  %1113 = vmatpush.msra.mxu1 %v256_v6 }
  0x81   :  { %645 = vmatmul.f32.gmra.mxu1 %v3707_v9  ;;  %791 = vmatpush.msrb.mxu0 %v377_v49  ;;  %v509_v49 = vld [vmem:[#allocation6 + $0x8b0] sm:$0xff] }
  0x82   :  { %1114 = vmatpush.msra.mxu1 %v254_v51  ;;  %v244_v51 = vld [vmem:[#allocation6 + $0x68] sm:$0xff] }
  0x83   :  { %792 = vmatpush.msrb.mxu0 %v375_v15  ;;  %v507_v15 = vld [vmem:[#allocation6 + $0x8a0] sm:$0xff] }
  0x84   :  { %583 = vmatmul.f32.gmra.mxu3 %v3713_v54  ;;  %677 = vmatmul.f32.gmra.mxu0 %v3719_v55 }
  0x85   :  { %793 = vmatpush.msrb.mxu0 %v373_v21  ;;  %v252_v21 = vld [vmem:[#allocation6 + $0xa8] sm:$0xff] }
  0x86   :  { %1115 = vmatpush.msra.mxu1 %v252_v21 }
  0x87   :  { %713 = vmatmul.f32.gmra.mxu2 %v3724_v59  ;;  %794 = vmatpush.msrb.mxu0 %v371_v27  ;;  %v505_v27 = vld [vmem:[#allocation6 + $0x890] sm:$0xff] }
  0x88   :  { %1116 = vmatpush.msra.mxu1 %v250_v62 }
  0x89   :  { %648 = vmatmul.f32.gmra.mxu1 %v3731_v1  ;;  %795 = vmatpush.msrb.mxu0 %v369_v33 }
  0x8b   :  { %796 = vmatpush.msrb.mxu0 %v367_v8  ;;  %v248_v8 = vld [vmem:[#allocation6 + $0x88] sm:$0xff] }
  0x8c   :  { %586 = vmatmul.f32.gmra.mxu3 %v3737_v11  ;;  %680 = vmatmul.f32.gmra.mxu0 %v3743_v13 }
  0x8d   :  { %797 = vmatpush.msrb.mxu0 %v365_v39  ;;  %1117 = vmatpush.msra.mxu1 %v248_v8  ;;  %v3820_v8 = vld [vmem:[%s5360_s1 + $0x82] sm:$0xff] }
  0x8f   :  { %716 = vmatmul.f32.gmra.mxu2 %v3748_v16  ;;  %798 = vmatpush.msrb.mxu0 %v363_v17 }
  0x91   :  { %651 = vmatmul.f32.gmra.mxu1 %v3755_v48  ;;  %799 = vmatpush.msrb.mxu0 %v361_v29 }
  0x93   :  { %800 = vmatpush.msrb.mxu0 %v359_v31  ;;  %v501_v31 = vld [vmem:[#allocation6 + $0x870] sm:$0xff] }
  0x94   :  { %736 = vmatmul.f32.vlgmr.msrb.gmra.mxu3 %v3480_v56  ;;  %801 = vmatmul.f32.vlgmr.msrb.gmra.mxu0 %v3589_v2  ;;  %v475_v56 = vld [vmem:[#allocation6 + $0x7a0] sm:$0xff] }
  0x95   :  { %1045 = vmatpush.msra.mxu0 %v517_v37  ;;  %985 = vmatpush.msra.mxu3 %v475_v56  ;;  %v246_v37 = vld [vmem:[#allocation6 + $0x78] sm:$0xff]  ;;  %v465_v56 = vld [vmem:[#allocation6 + $0x750] sm:$0xff] }
  0x96   :  { %1118 = vmatpush.msra.mxu1 %v246_v37  ;;  %v495_v37 = vld [vmem:[#allocation6 + $0x840] sm:$0xff] }
  0x97   :  { %931 = vmatmul.f32.vlgmr.msrb.gmra.mxu2 %v3508_v4  ;;  %1046 = vmatpush.msra.mxu0 %v515_v38 }
  0x98   :  { %1119 = vmatpush.msra.mxu1 %v244_v51  ;;  %v493_v51 = vld [vmem:[#allocation6 + $0x830] sm:$0xff] }
  0x99   :  { %866 = vmatmul.f32.vlgmr.msrb.gmra.mxu1 %v3695_v35  ;;  %1047 = vmatpush.msra.mxu0 %v513_v44  ;;  %v473_v35 = vld [vmem:[#allocation6 + $0x790] sm:$0xff] }
  0x9a   :  { %986 = vmatpush.msra.mxu3 %v473_v35 }
  0x9b   :  { %1048 = vmatpush.msra.mxu0 %v511_v45 }
  0x9c   :  { %739 = vmatmul.f32.gmra.mxu3 %v3508_v4  ;;  %804 = vmatmul.f32.gmra.mxu0 %v3616_v52  ;;  %v471_v4 = vld [vmem:[#allocation6 + $0x780] sm:$0xff] }
  0x9d   :  { %1049 = vmatpush.msra.mxu0 %v509_v49  ;;  %987 = vmatpush.msra.mxu3 %v471_v4  ;;  %v499_v49 = vld [vmem:[#allocation6 + $0x860] sm:$0xff] }
  0x9f   :  { %934 = vmatmul.f32.gmra.mxu2 %v3536_v19  ;;  %1050 = vmatpush.msra.mxu0 %v507_v15 }
  0xa1   :  { %869 = vmatmul.f32.gmra.mxu1 %v3719_v55  ;;  %1051 = vmatpush.msra.mxu0 %v505_v27  ;;  %v2967_v27 = vld [vmem:[%s5360_s1 + $0x90] sm:$0xff] }
  0xa4   :  { %742 = vmatmul.f32.gmra.mxu3 %v3536_v19  ;;  %807 = vmatmul.f32.gmra.mxu0 %v3644_v61  ;;  %v519_v19 = vld [vmem:[#allocation8] sm:$0x3] }
  0xa5   :  { %v3777_v33 = vperm.slane %v519_v19, 0  ;;  %v463_v19 = vld [vmem:[#allocation6 + $0x740] sm:$0xff] }
  0xa7   :  { %937 = vmatmul.f32.gmra.mxu2 %v3449_v46 }
  0xa9   :  { %872 = vmatmul.f32.gmra.mxu1 %v3743_v13 }
  0xac   :  { %745 = vmatmul.f32.gmra.mxu3 %v3449_v46  ;;  %810 = vmatmul.f32.gmra.mxu0 %v3471_v53  ;;  %v469_v46 = vld [vmem:[#allocation6 + $0x770] sm:$0xff]  ;;  %v503_v53 = vld [vmem:[#allocation6 + $0x880] sm:$0xff] }
  0xad   :  { %988 = vmatpush.msra.mxu3 %v469_v46  ;;  %1052 = vmatpush.msra.mxu0 %v503_v53  ;;  %v497_v46 = vld [vmem:[#allocation6 + $0x850] sm:$0xff]  ;;  %v242_v53 = vld [vmem:[#allocation6 + $0x58] sm:$0xff] }
  0xae   :  { %1120 = vmatpush.msra.mxu1 %v242_v53 }
  0xaf   :  { %940 = vmatmul.f32.gmra.mxu2 %v3485_v57  ;;  %1053 = vmatpush.msra.mxu0 %v501_v31  ;;  %v461_v31 = vld [vmem:[#allocation6 + $0x730] sm:$0xff] }
  0xb1   :  { %v3774_v0 = vpop.f32.mrf.mxu0  ;;  %875 = vmatmul.f32.gmra.mxu1 %v3461_v50  ;;  %1054 = vmatpush.msra.mxu0 %v499_v49  ;;  %v459_v49 = vld [vmem:[#allocation6 + $0x720] sm:$0xff] }
  0xb3   :  { %1055 = vmatpush.msra.mxu0 %v497_v46  ;;  %v286_v46 = vld [vmem:[#allocation6 + $0x1b8] sm:$0xff] }
  0xb4   :  { %748 = vmatmul.f32.gmra.mxu3 %v3485_v57  ;;  %813 = vmatmul.f32.gmra.mxu0 %v3500_v63  ;;  %v467_v63 = vld [vmem:[#allocation6 + $0x760] sm:$0xff] }
  0xb5   :  { %989 = vmatpush.msra.mxu3 %v467_v63  ;;  %1056 = vmatpush.msra.mxu0 %v495_v37 }
  0xb6   :  { %v619_v39 = vpop.f32.mrf.mxu1 }
  0xb7   :  { %v554_v17 = vpop.f32.mrf.mxu3  ;;  %943 = vmatmul.f32.gmra.mxu2 %v3513_v5  ;;  %990 = vmatpush.msra.mxu3 %v465_v56  ;;  %v294_v56 = vld [vmem:[#allocation6 + $0x1f8] sm:$0xff] }
  0xb8   :  { %v555_v22 = vadd.f32 %v554_v17, %v3777_v33  ;;  %1175 = vmatpush.msra.mxu2 %v294_v56  ;;  %1057 = vmatpush.msra.mxu0 %v493_v51  ;;  %v234_v56 = vld [vmem:[#allocation6 + $0x18] sm:$0xff]  ;;  %v276_v51 = vld [vmem:[#allocation6 + $0x168] sm:$0xff] }
  0xb9   :  { %v3783_v26 = vpop.f32.mrf.mxu0  ;;  %878 = vmatmul.f32.gmra.mxu1 %v3494_v60  ;;  %991 = vmatpush.msra.mxu3 %v463_v19 }
  0xba   :  { %v620_v50 = vadd.f32 %v619_v39, %v555_v22  ;;  %v684_v57 = vpop.f32.mrf.mxu2 }
  0xbb   :  { %992 = vmatpush.msra.mxu3 %v461_v31  ;;  %v282_v31 = vld [vmem:[#allocation6 + $0x198] sm:$0xff] }
  0xbc   :  { %v3786_v29 = vadd.f32 %v684_v57, %v620_v50  ;;  %751 = vmatmul.f32.gmra.mxu3 %v3513_v5  ;;  %816 = vmatmul.f32.gmra.mxu0 %v3528_v14  ;;  %v2966_v14 = vld [vmem:[%s5360_s1 + $0x80] sm:$0xff] }
  0xbd   :  { %993 = vmatpush.msra.mxu3 %v459_v49 }
  0xbe   :  { %v622_v38 = vpop.f32.mrf.mxu1 }
  0xbf   :  { %v557_v41 = vpop.f32.mrf.mxu3  ;;  %946 = vmatmul.f32.gmra.mxu2 %v3541_v20 }
  0xc0   :  { %v558_v60 = vadd.f32 %v557_v41, %v3777_v33 }
  0xc1   :  { %v3792_v6 = vpop.f32.mrf.mxu0  ;;  %881 = vmatmul.f32.gmra.mxu1 %v3522_v10 }
  0xc2   :  { %v623_v44 = vadd.f32 %v622_v38, %v558_v60  ;;  %v687_v5 = vpop.f32.mrf.mxu2  ;;  %v240_v38 = vld [vmem:[#allocation6 + $0x48] sm:$0xff] }
  0xc3   :  { %1121 = vmatpush.msra.mxu1 %v240_v38 }
  0xc4   :  { %v3798_v45 = vadd.f32 %v687_v5, %v623_v44  ;;  %754 = vmatmul.f32.gmra.mxu3 %v3541_v20  ;;  %819 = vmatmul.f32.gmra.mxu0 %v3556_v28  ;;  %v3809_v20 = vld [vmem:[%s5360_s1 + $0x81] sm:$0xff] }
  0xc6   :  { %v625_v35 = vpop.f32.mrf.mxu1 }
  0xc7   :  { %v560_v10 = vpop.f32.mrf.mxu3  ;;  %949 = vmatmul.f32.gmra.mxu2 %v2966_v14 }
  0xc8   :  { %v561_v15 = vadd.f32 %v560_v10, %v3777_v33  ;;  %v238_v10 = vld [vmem:[#allocation6 + $0x38] sm:$0xff] }
  0xc9   :  { %v3803_v21 = vpop.f32.mrf.mxu0  ;;  %884 = vmatmul.f32.gmra.mxu1 %v3550_v25 }
  0xca   :  { %v626_v28 = vadd.f32 %v625_v35, %v561_v15  ;;  %v690_v4 = vpop.f32.mrf.mxu2  ;;  %v292_v35 = vld [vmem:[#allocation6 + $0x1e8] sm:$0xff]  ;;  %1122 = vmatpush.msra.mxu1 %v238_v10 }
  0xcb   :  { %1176 = vmatpush.msra.mxu2 %v292_v35 }
  0xcc   :  { %v3814_v62 = vadd.f32 %v690_v4, %v626_v28  ;;  %757 = vmatmul.f32.gmra.mxu3 %v2966_v14  ;;  %822 = vmatmul.f32.gmra.mxu0 %v3809_v20 }
  0xce   :  { %v628_v25 = vpop.f32.mrf.mxu1 }
  0xcf   :  { %v563_v39 = vpop.f32.mrf.mxu3  ;;  %952 = vmatmul.f32.gmra.mxu2 %v2967_v27  ;;  %v288_v27 = vld [vmem:[#allocation6 + $0x1c8] sm:$0xff] }
  0xd0   :  { %v564_v17 = vadd.f32 %v563_v39, %v3777_v33  ;;  %v491_v39 = vld [vmem:[#allocation6 + $0x820] sm:$0xff] }
  0xd1   :  { %v3823_v22 = vpop.f32.mrf.mxu0  ;;  %887 = vmatmul.f32.gmra.mxu1 %v3820_v8  ;;  %1058 = vmatpush.msra.mxu0 %v491_v39 }
  0xd2   :  { %v629_v50 = vadd.f32 %v628_v25, %v564_v17  ;;  %v693_v57 = vpop.f32.mrf.mxu2  ;;  %v457_v25 = vld [vmem:[#allocation6 + $0x710] sm:$0xff]  ;;  %v284_v17 = vld [vmem:[#allocation6 + $0x1a8] sm:$0xff] }
  0xd3   :  { %994 = vmatpush.msra.mxu3 %v457_v25 }
  0xd4   :  { %v3826_v63 = vadd.f32 %v693_v57, %v629_v50  ;;  %760 = vmatmul.f32.gmra.mxu3 %v3584_v43  ;;  %825 = vmatmul.f32.gmra.mxu0 %v3603_v47  ;;  %v236_v50 = vld [vmem:[#allocation6 + $0x28] sm:$0xff] }
  0xd5   :  { %1123 = vmatpush.msra.mxu1 %v236_v50 }
  0xd6   :  { %v631_v41 = vpop.f32.mrf.mxu1 }
  0xd7   :  { %v566_v60 = vpop.f32.mrf.mxu3  ;;  %955 = vmatmul.f32.gmra.mxu2 %v3611_v12  ;;  %1124 = vmatpush.msra.mxu1 %v234_v56  ;;  %v322_v56 = vld [vmem:[#allocation6 + $0x2d8] sm:$0xff] }
  0xd8   :  { %v567_v44 = vadd.f32 %v566_v60, %v3777_v33 }
  0xd9   :  { %v3832_v5 = vpop.f32.mrf.mxu0  ;;  %890 = vmatmul.f32.gmra.mxu1 %v3597_v3  ;;  %v290_v3 = vld [vmem:[#allocation6 + $0x1d8] sm:$0xff] }
  0xda   :  { %v632_v14 = vadd.f32 %v631_v41, %v567_v44  ;;  %v696_v43 = vpop.f32.mrf.mxu2  ;;  %1177 = vmatpush.msra.mxu2 %v290_v3  ;;  %v280_v41 = vld [vmem:[#allocation6 + $0x188] sm:$0xff]  ;;  %v455_v44 = vld [vmem:[#allocation6 + $0x700] sm:$0xff] }
  0xdb   :  { %995 = vmatpush.msra.mxu3 %v455_v44 }
  0xdc   :  { %v3835_v47 = vadd.f32 %v696_v43, %v632_v14  ;;  %763 = vmatmul.f32.gmra.mxu3 %v3611_v12  ;;  %828 = vmatmul.f32.gmra.mxu0 %v3631_v58  ;;  %v489_v14 = vld [vmem:[#allocation6 + $0x810] sm:$0xff]  ;;  %v278_v43 = vld [vmem:[#allocation6 + $0x178] sm:$0xff] }
  0xdd   :  { %1178 = vmatpush.msra.mxu2 %v288_v27  ;;  %1059 = vmatpush.msra.mxu0 %v489_v14  ;;  %v272_v27 = vld [vmem:[#allocation6 + $0x148] sm:$0xff] }
  0xde   :  { %v634_v15 = vpop.f32.mrf.mxu1 }
  0xdf   :  { %v569_v28 = vpop.f32.mrf.mxu3  ;;  %958 = vmatmul.f32.gmra.mxu2 %v3639_v24 }
  0xe0   :  { %v570_v4 = vadd.f32 %v569_v28, %v3777_v33  ;;  %1179 = vmatpush.msra.mxu2 %v286_v46  ;;  %v487_v28 = vld [vmem:[#allocation6 + $0x800] sm:$0xff]  ;;  %v270_v46 = vld [vmem:[#allocation6 + $0x138] sm:$0xff] }
  0xe1   :  { %v3841_v12 = vpop.f32.mrf.mxu0  ;;  %893 = vmatmul.f32.gmra.mxu1 %v3625_v18  ;;  %1060 = vmatpush.msra.mxu0 %v487_v28  ;;  %v2975_v28 = vld [vmem:[%s5360_s1 + $0x130] sm:$0xff] }
  0xe2   :  { %v635_v58 = vadd.f32 %v634_v15, %v570_v4  ;;  %v699_v19 = vpop.f32.mrf.mxu2  ;;  %1180 = vmatpush.msra.mxu2 %v284_v17  ;;  %v274_v15 = vld [vmem:[#allocation6 + $0x158] sm:$0xff]  ;;  %v268_v17 = vld [vmem:[#allocation6 + $0x128] sm:$0xff] }
  0xe3   :  { %v326_v4 = vld [vmem:[#allocation6 + $0x2f8] sm:$0xff] }
  0xe4   :  { %v3844_v53 = vadd.f32 %v699_v19, %v635_v58  ;;  %766 = vmatmul.f32.gmra.mxu3 %v3639_v24  ;;  %831 = vmatmul.f32.gmra.mxu0 %v3659_v7  ;;  %v232_v58 = vld [vmem:[#allocation6 + $0x8] sm:$0xff] }
  0xe5   :  { %1181 = vmatpush.msra.mxu2 %v282_v31  ;;  %1240 = vmatpush.msrb.mxu3 %v326_v4  ;;  %v266_v31 = vld [vmem:[#allocation6 + $0x118] sm:$0xff]  ;;  %v320_v4 = vld [vmem:[#allocation6 + $0x2c8] sm:$0xff] }
  0xe6   :  { %v637_v57 = vpop.f32.mrf.mxu1  ;;  %1125 = vmatpush.msra.mxu1 %v232_v58  ;;  %v3905_v58 = vld [vmem:[%s5360_s1 + $0x122] sm:$0xff] }
  0xe7   :  { %v572_v18 = vpop.f32.mrf.mxu3  ;;  %961 = vmatmul.f32.gmra.mxu2 %v3667_v36 }
  0xe8   :  { %v573_v37 = vadd.f32 %v572_v18, %v3777_v33  ;;  %1182 = vmatpush.msra.mxu2 %v280_v41  ;;  %v358_v18 = vld [vmem:[#allocation6 + $0x3f8] sm:$0xff] }
  0xe9   :  { %v3850_v38 = vpop.f32.mrf.mxu0  ;;  %896 = vmatmul.f32.gmra.mxu1 %v3653_v30  ;;  %1305 = vmatpush.msrb.mxu0 %v358_v18 }
  0xea   :  { %v638_v24 = vadd.f32 %v637_v57, %v573_v37  ;;  %v702_v7 = vpop.f32.mrf.mxu2  ;;  %1183 = vmatpush.msra.mxu2 %v278_v43  ;;  %v324_v57 = vld [vmem:[#allocation6 + $0x2e8] sm:$0xff]  ;;  %v2974_v43 = vld [vmem:[%s5360_s1 + $0x120] sm:$0xff] }
  0xeb   :  { %1241 = vmatpush.msrb.mxu3 %v324_v57 }
  0xec   :  { %v3853_v60 = vadd.f32 %v702_v7, %v638_v24  ;;  %769 = vmatmul.f32.gmra.mxu3 %v3667_v36  ;;  %834 = vmatmul.f32.gmra.mxu0 %v3683_v23  ;;  %v390_v24 = vld [vmem:[#allocation6 + $0x4f8] sm:$0xff] }
  0xed   :  { %1184 = vmatpush.msra.mxu2 %v276_v51  ;;  %1370 = vmatpush.msrb.mxu1 %v390_v24  ;;  %v388_v51 = vld [vmem:[#allocation6 + $0x4e8] sm:$0xff] }
  0xee   :  { %v640_v49 = vpop.f32.mrf.mxu1  ;;  %1242 = vmatpush.msrb.mxu3 %v322_v56 }
  0xef   :  { %v575_v30 = vpop.f32.mrf.mxu3  ;;  %964 = vmatmul.f32.gmra.mxu2 %v3689_v34  ;;  %1371 = vmatpush.msrb.mxu1 %v388_v51 }
  0xf0   :  { %v576_v35 = vadd.f32 %v575_v30, %v3777_v33  ;;  %1185 = vmatpush.msra.mxu2 %v274_v15  ;;  %1243 = vmatpush.msrb.mxu3 %v320_v4 }
  0xf1   :  { %v3859_v10 = vpop.f32.mrf.mxu0  ;;  %899 = vmatmul.f32.gmra.mxu1 %v3678_v42 }
  0xf2   :  { %v641_v36 = vadd.f32 %v640_v49, %v576_v35  ;;  %v705_v23 = vpop.f32.mrf.mxu2  ;;  %1186 = vmatpush.msra.mxu2 %v272_v27  ;;  %v356_v49 = vld [vmem:[#allocation6 + $0x3e8] sm:$0xff]  ;;  %v354_v27 = vld [vmem:[#allocation6 + $0x3d8] sm:$0xff] }
  0xf3   :  { %1306 = vmatpush.msrb.mxu0 %v356_v49  ;;  %v350_v49 = vld [vmem:[#allocation6 + $0x3b8] sm:$0xff] }
  0xf4   :  { %v3862_v3 = vadd.f32 %v705_v23, %v641_v36  ;;  %772 = vmatmul.f32.gmra.mxu3 %v3689_v34  ;;  %837 = vmatmul.f32.gmra.mxu0 %v3707_v9 }
  0xf5   :  { %1187 = vmatpush.msra.mxu2 %v270_v46  ;;  %1307 = vmatpush.msrb.mxu0 %v354_v27 }
  0xf6   :  { %v643_v19 = vpop.f32.mrf.mxu1 }
  0xf7   :  { %v578_v42 = vpop.f32.mrf.mxu3  ;;  %967 = vmatmul.f32.gmra.mxu2 %v3713_v54 }
  0xf8   :  { %v579_v25 = vadd.f32 %v578_v42, %v3777_v33  ;;  %1188 = vmatpush.msra.mxu2 %v268_v17 }
  0xf9   :  { %v3868_v39 = vpop.f32.mrf.mxu0  ;;  %902 = vmatmul.f32.gmra.mxu1 %v3700_v40  ;;  %v264_v40 = vld [vmem:[#allocation6 + $0x108] sm:$0xff] }
  0xfa   :  { %v644_v34 = vadd.f32 %v643_v19, %v579_v25  ;;  %v708_v9 = vpop.f32.mrf.mxu2  ;;  %1189 = vmatpush.msra.mxu2 %v266_v31  ;;  %v386_v19 = vld [vmem:[#allocation6 + $0x4d8] sm:$0xff] }
  0xfb   :  { %1372 = vmatpush.msrb.mxu1 %v386_v19  ;;  %v318_v31 = vld [vmem:[#allocation6 + $0x2b8] sm:$0xff] }
  0xfc   :  { %v3871_v50 = vadd.f32 %v708_v9, %v644_v34  ;;  %775 = vmatmul.f32.gmra.mxu3 %v3713_v54  ;;  %840 = vmatmul.f32.gmra.mxu0 %v3731_v1  ;;  %v543_v34 = vadd.f32 %v3774_v0, %v3777_v33  ;;  %v314_v19 = vld [vmem:[#allocation6 + $0x298] sm:$0xff] }
  0xfd   :  { %1190 = vmatpush.msra.mxu2 %v264_v40  ;;  %1244 = vmatpush.msrb.mxu3 %v318_v31  ;;  %v384_v40 = vld [vmem:[#allocation6 + $0x4c8] sm:$0xff]  ;;  %v2995_v31 = vld [vmem:[%s5360_s1 + $0x52] sm:$0xff] }
  0xfe   :  { %v646_v37 = vpop.f32.mrf.mxu1  ;;  %v608_v57 = vadd.f32 %v3823_v22, %v543_v34  ;;  %1373 = vmatpush.msrb.mxu1 %v384_v40  ;;  %v3074_v22 = vld [vmem:[%s5360_s1] sm:$0xff] }
  0xff   :  { %v581_v7 = vpop.f32.mrf.mxu3  ;;  %970 = vmatmul.f32.gmra.mxu2 %v3737_v11 }
 0x100   :  { %v582_v41 = vadd.f32 %v581_v7, %v3777_v33  ;;  %v673_v24 = vadd.f32 %v3859_v10, %v608_v57  ;;  %v3955_v57 = vld [vmem:[%s5360_s1 + $0x20] sm:$0xff] }
 0x101   :  { %v3877_v44 = vpop.f32.mrf.mxu0  ;;  %905 = vmatmul.f32.gmra.mxu1 %v3724_v59 }
 0x102   :  { %v647_v54 = vadd.f32 %v646_v37, %v582_v41  ;;  %v711_v1 = vpop.f32.mrf.mxu2  ;;  %v352_v37 = vld [vmem:[#allocation6 + $0x3c8] sm:$0xff] }
 0x103   :  { %1308 = vmatpush.msrb.mxu0 %v352_v37  ;;  %v3961_v37 = vld [vmem:[#allocation3] sm:$0xff] }
 0x104   :  { %v3880_v14 = vadd.f32 %v711_v1, %v647_v54  ;;  %778 = vmatmul.f32.gmra.mxu3 %v3737_v11  ;;  %843 = vmatmul.f32.gmra.mxu0 %v3755_v48  ;;  %v3894_v11 = vld [vmem:[%s5360_s1 + $0x121] sm:$0xff] }
 0x105   :  { %1309 = vmatpush.msrb.mxu0 %v350_v49 }
 0x106   :  { %v649_v30 = vpop.f32.mrf.mxu1 }
 0x107   :  { %v584_v59 = vpop.f32.mrf.mxu3  ;;  %973 = vmatmul.f32.gmra.mxu2 %v2974_v43 }
 0x108   :  { %v585_v35 = vadd.f32 %v584_v59, %v3777_v33 }
 0x109   :  { %v3888_v36 = vpop.f32.mrf.mxu0  ;;  %908 = vmatmul.f32.gmra.mxu1 %v3748_v16 }
 0x10a   :  { %v650_v48 = vadd.f32 %v649_v30, %v585_v35  ;;  %v714_v23 = vpop.f32.mrf.mxu2  ;;  %v382_v35 = vld [vmem:[#allocation6 + $0x4b8] sm:$0xff] }
 0x10b   :  { %1374 = vmatpush.msrb.mxu1 %v382_v35 }
 0x10c   :  { %v3896_v15 = vadd.f32 %v714_v23, %v650_v48  ;;  %781 = vmatmul.f32.gmra.mxu3 %v2974_v43  ;;  %846 = vmatmul.f32.gmra.mxu0 %v3894_v11  ;;  %v2978_v48 = vld [vmem:[%s5360_s1 + $0x41] sm:$0xff] }
 0x10d   :  { %v2994_v23 = vld [vmem:[%s5360_s1 + $0x42] sm:$0xff] }
 0x10e   :  { %v652_v16 = vpop.f32.mrf.mxu1 }
 0x10f   :  { %v587_v42 = vpop.f32.mrf.mxu3  ;;  %976 = vmatmul.f32.gmra.mxu2 %v2975_v28 }
 0x110   :  { %v588_v46 = vadd.f32 %v587_v42, %v3777_v33  ;;  %v348_v42 = vld [vmem:[#allocation6 + $0x3a8] sm:$0xff] }
 0x111   :  { %911 = vmatmul.f32.gmra.mxu1 %v3905_v58  ;;  %v802_v25 = vpop.f32.mrf.mxu0  ;;  %1310 = vmatpush.msrb.mxu0 %v348_v42  ;;  %v3302_v42 = vmov 64.0  }
 0x112   :  { %v653_v9 = vadd.f32 %v652_v16, %v588_v46  ;;  %v717_v17 = vpop.f32.mrf.mxu2  ;;  %3068 = vrcp.f32 %v3302_v42 }
 0x114   :  { %v3912_v18 = vadd.f32 %v717_v17, %v653_v9  ;;  %996 = vmatmul.f32.vlgmr.msra.gmra.mxu3 %v3616_v52  ;;  %1061 = vmatmul.f32.vlgmr.msra.gmra.mxu0 %v3719_v55  ;;  %v546_v55 = vadd.f32 %v3783_v26, %v3777_v33  ;;  %v380_v9 = vld [vmem:[#allocation6 + $0x4a8] sm:$0xff] }
 0x115   :  { %1375 = vmatpush.msrb.mxu1 %v380_v9 }
 0x116   :  { %v867_v7 = vpop.f32.mrf.mxu1  ;;  %v611_v10 = vadd.f32 %v3832_v5, %v546_v55  ;;  %v312_v55 = vld [vmem:[#allocation6 + $0x288] sm:$0xff] }
 0x117   :  { %v737_v41 = vpop.f32.mrf.mxu3  ;;  %1191 = vmatmul.f32.vlgmr.msra.gmra.mxu2 %v3567_v32  ;;  %v316_v32 = vld [vmem:[#allocation6 + $0x2a8] sm:$0xff] }
 0x118   :  { %v738_v0 = vadd.f32 %v737_v41, %v673_v24  ;;  %1245 = vmatpush.msrb.mxu3 %v316_v32  ;;  %v676_v30 = vadd.f32 %v3868_v39, %v611_v10  ;;  %v552_v24 = vadd.f32 %v3803_v21, %v3777_v33  ;;  %v3973_v10 = vld [vmem:[#allocation3 + $0x18] sm:$0xff] }
 0x119   :  { %1126 = vmatmul.f32.vlgmr.msra.gmra.mxu1 %v3074_v22  ;;  %v805_v54 = vpop.f32.mrf.mxu0  ;;  %v378_v32 = vld [vmem:[#allocation6 + $0x498] sm:$0xff] }
 0x11a   :  { %v803_v1 = vadd.f32 %v802_v25, %v738_v0  ;;  %v932_v43 = vpop.f32.mrf.mxu2  ;;  %1246 = vmatpush.msrb.mxu3 %v314_v19  ;;  %v3969_v0 = vld [vmem:[#allocation3 + $0x10] sm:$0xff]  ;;  %v617_v22 = vadd.f32 %v3850_v38, %v552_v24  ;;  %1376 = vmatpush.msrb.mxu1 %v378_v32  ;;  %v342_v32 = vld [vmem:[#allocation6 + $0x378] sm:$0xff] }
 0x11c   :  { %v868_v56 = vadd.f32 %v867_v7, %v803_v1  ;;  %999 = vmatmul.f32.gmra.mxu3 %v3644_v61  ;;  %1064 = vmatmul.f32.gmra.mxu0 %v3743_v13  ;;  %v3936_v13 = vld [vmem:[%s5360_s1 + $0x10] sm:$0xff]  ;;  %v346_v1 = vld [vmem:[#allocation6 + $0x398] sm:$0xff] }
 0x11d   :  { %1247 = vmatpush.msrb.mxu3 %v312_v55  ;;  %1311 = vmatpush.msrb.mxu0 %v346_v1 }
 0x11e   :  { %v3927_v51 = vadd.f32 %v932_v43, %v868_v56  ;;  %v870_v59 = vpop.f32.mrf.mxu1 }
 0x11f   :  { %v740_v26 = vpop.f32.mrf.mxu3  ;;  %1194 = vmatmul.f32.gmra.mxu2 %v3589_v2  ;;  %v549_v2 = vadd.f32 %v3792_v6, %v3777_v33  ;;  %v682_v33 = vadd.f32 %v3888_v36, %v617_v22  ;;  %v3989_v36 = vld [vmem:[%s5360_s1 + $0x30] sm:$0xff] }
 0x120   :  { %v741_v5 = vadd.f32 %v740_v26, %v676_v30  ;;  %v3980_v30 = vld [vmem:[#allocation3 + $0x20] sm:$0xff]  ;;  %v2997_v22 = vld [vmem:[%s5360_s1 + $0x72] sm:$0xff] }
 0x121   :  { %1129 = vmatmul.f32.gmra.mxu1 %v3936_v13  ;;  %v808_v39 = vpop.f32.mrf.mxu0  ;;  %v614_v27 = vadd.f32 %v3841_v12, %v549_v2  ;;  %v2979_v12 = vld [vmem:[%s5360_s1 + $0x51] sm:$0xff]  ;;  %v2980_v26 = vld [vmem:[%s5360_s1 + $0x61] sm:$0xff] }
 0x122   :  { %v806_v28 = vadd.f32 %v805_v54, %v741_v5  ;;  %v935_v4 = vpop.f32.mrf.mxu2 }
 0x123   :  { %v679_v46 = vadd.f32 %v3877_v44, %v614_v27  ;;  %v310_v27 = vld [vmem:[#allocation6 + $0x278] sm:$0xff] }
 0x124   :  { %v871_v16 = vadd.f32 %v870_v59, %v806_v28  ;;  %1002 = vmatmul.f32.gmra.mxu3 %v2978_v48  ;;  %1067 = vmatmul.f32.gmra.mxu0 %v2994_v23  ;;  %v3995_v48 = vld [vmem:[#allocation3 + $0x28] sm:$0xff]  ;;  %v3998_v28 = vld [vmem:[#allocation3 + $0x30] sm:$0xff] }
 0x125   :  { %1248 = vmatpush.msrb.mxu3 %v310_v27  ;;  %v4037_v27 = vld [vmem:[%s5360_s1 + $0x50] sm:$0xff] }
 0x126   :  { %v3946_v25 = vadd.f32 %v935_v4, %v871_v16  ;;  %v873_v34 = vpop.f32.mrf.mxu1  ;;  %v344_v16 = vld [vmem:[#allocation6 + $0x388] sm:$0xff] }
 0x127   :  { %v743_v17 = vpop.f32.mrf.mxu3  ;;  %1197 = vmatmul.f32.gmra.mxu2 %v3616_v52  ;;  %v3963_v52 = vld [vmem:[#allocation3 + $0x8] sm:$0xff]  ;;  %1312 = vmatpush.msrb.mxu0 %v344_v16 }
 0x128   :  { %v744_v6 = vadd.f32 %v743_v17, %v679_v46  ;;  %v1711_v41 = vadd.f32 %v3963_v52, %v3961_v37  ;;  %v4001_v46 = vld [vmem:[#allocation3 + $0x38] sm:$0xff]  ;;  %v376_v17 = vld [vmem:[#allocation6 + $0x488] sm:$0xff] }
 0x129   :  { %1132 = vmatmul.f32.gmra.mxu1 %v3955_v57  ;;  %v811_v44 = vpop.f32.mrf.mxu0  ;;  %1313 = vmatpush.msrb.mxu0 %v342_v32 }
 0x12a   :  { %v809_v7 = vadd.f32 %v808_v39, %v744_v6  ;;  %v938_v40 = vpop.f32.mrf.mxu2  ;;  %v1712_v43 = vadd.f32 %v1711_v41, %v3969_v0  ;;  %1377 = vmatpush.msrb.mxu1 %v376_v17 }
 0x12c   :  { %v874_v54 = vadd.f32 %v873_v34, %v809_v7  ;;  %1005 = vmatmul.f32.gmra.mxu3 %v2979_v12  ;;  %1070 = vmatmul.f32.gmra.mxu0 %v2995_v31  ;;  %v1713_v49 = vadd.f32 %v1712_v43, %v3973_v10  ;;  %v2981_v7 = vld [vmem:[%s5360_s1 + $0x71] sm:$0xff] }
 0x12e   :  { %v3976_v21 = vadd.f32 %v938_v40, %v874_v54  ;;  %v876_v56 = vpop.f32.mrf.mxu1  ;;  %v1714_v35 = vadd.f32 %v1713_v49, %v3980_v30  ;;  %v4019_v40 = vld [vmem:[%s5360_s1 + $0x40] sm:$0xff]  ;;  %v3069_v54 = vpop.eup %3068 }
 0x12f   :  { %v746_v38 = vpop.f32.mrf.mxu3  ;;  %1200 = vmatmul.f32.gmra.mxu2 %v3644_v61  ;;  %v2996_v61 = vld [vmem:[%s5360_s1 + $0x62] sm:$0xff]  ;;  %v1738_v43 = vmul.f32 64.0, %v3069_v54  ;;  %vm1742_vm0 = vweird.f32 %v3069_v54 }
 0x130   :  { %v747_v59 = vadd.f32 %v746_v38, %v682_v33  ;;  %v1715_v2 = vadd.f32 %v1714_v35, %v3995_v48 }
 0x131   :  { %1135 = vmatmul.f32.gmra.mxu1 %v3989_v36  ;;  %v814_v5 = vpop.f32.mrf.mxu0  ;;  %v1739_v38 = vsub.f32 1.0, %v1738_v43  ;;  %v2999_v43 = vld [vmem:[%s5360_s1 + $0x92] sm:$0xff] }
 0x132   :  { %v812_v39 = vadd.f32 %v811_v44, %v747_v59  ;;  %v941_v23 = vpop.f32.mrf.mxu2  ;;  %v1716_v19 = vadd.f32 %v1715_v2, %v3998_v28  ;;  %v4009_v44 = vld [vmem:[%s5360_s1 + $0x41] sm:$0xff] }
 0x134   :  { %v877_v4 = vadd.f32 %v876_v56, %v812_v39  ;;  %1008 = vmatmul.f32.gmra.mxu3 %v2980_v26  ;;  %1073 = vmatmul.f32.gmra.mxu0 %v2996_v61  ;;  %v1717_v6 = vadd.f32 %v1716_v19, %v4001_v46  ;;  %v308_v56 = vld [vmem:[#allocation6 + $0x268] sm:$0xff]  ;;  %v374_v26 = vld [vmem:[#allocation6 + $0x478] sm:$0xff] }
 0x135   :  { %1249 = vmatpush.msrb.mxu3 %v308_v56  ;;  %1378 = vmatpush.msrb.mxu1 %v374_v26  ;;  %v338_v26 = vld [vmem:[#allocation6 + $0x358] sm:$0xff] }
 0x136   :  { %v4003_v34 = vadd.f32 %v941_v23, %v877_v4  ;;  %v879_v9 = vpop.f32.mrf.mxu1  ;;  %v1718_v24 = vrot.slane %v1717_v6, 4  ;;  %v1740_v23 = vmul.f32 %v3069_v54, %v1739_v38 }
 0x137   :  { %v749_v12 = vpop.f32.mrf.mxu3  ;;  %1203 = vmatmul.f32.gmra.mxu2 %v4009_v44 }
 0x138   :  { %v750_v31 = vadd.f32 %v749_v12, %v3786_v29  ;;  %v1719_v1 = vadd.f32 %v1718_v24, %v1717_v6  ;;  %v1741_v19 = vadd.f32 %v3069_v54, %v1740_v23 }
 0x139   :  { %1138 = vmatmul.f32.gmra.mxu1 %v4019_v40  ;;  %v817_v41 = vpop.f32.mrf.mxu0 }
 0x13a   :  { %v815_v55 = vadd.f32 %v814_v5, %v750_v31  ;;  %v944_v29 = vpop.f32.mrf.mxu2  ;;  %v1720_v49 = vrot.slane %v1719_v1, 2  ;;  %v4030_v5 = vld [vmem:[%s5360_s1 + $0x51] sm:$0xff]  ;;  %v4040_v6 = vsel %vm1742_vm0, %v3069_v54, %v1741_v19  ;;  %v340_v31 = vld [vmem:[#allocation6 + $0x368] sm:$0xff] }
 0x13b   :  { %1314 = vmatpush.msrb.mxu0 %v340_v31  ;;  %v4095_v19 = vld [vmem:[%s5360_s1 + $0x71] sm:$0xff] }
 0x13c   :  { %v880_v33 = vadd.f32 %v879_v9, %v815_v55  ;;  %1011 = vmatmul.f32.gmra.mxu3 %v2981_v7  ;;  %1076 = vmatmul.f32.gmra.mxu0 %v2997_v22  ;;  %v1721_v61 = vadd.f32 %v1720_v49, %v1719_v1  ;;  %v372_v22 = vld [vmem:[#allocation6 + $0x468] sm:$0xff] }
 0x13d   :  { %v4060_v55 = vld [vmem:[%s5360_s1 + $0x61] sm:$0xff]  ;;  %1379 = vmatpush.msrb.mxu1 %v372_v22  ;;  %1315 = vmatpush.msrb.mxu0 %v338_v26 }
 0x13e   :  { %v4025_v59 = vadd.f32 %v944_v29, %v880_v33  ;;  %v882_v35 = vpop.f32.mrf.mxu1  ;;  %v1722_v4 = vrot.slane %v1721_v61, 1  ;;  %v3087_v26 = vld [vmem:[%s5360_s1 + $0xa0] sm:$0xff] }
 0x13f   :  { %v752_v39 = vpop.f32.mrf.mxu3  ;;  %1206 = vmatmul.f32.gmra.mxu2 %v4030_v5 }
 0x140   :  { %v753_v2 = vadd.f32 %v752_v39, %v3798_v45  ;;  %v1723_v17 = vadd.f32 %v1722_v4, %v1721_v61  ;;  %v306_v45 = vld [vmem:[#allocation6 + $0x258] sm:$0xff] }
 0x141   :  { %1141 = vmatmul.f32.gmra.mxu1 %v4037_v27  ;;  %v820_v16 = vpop.f32.mrf.mxu0  ;;  %1250 = vmatpush.msrb.mxu3 %v306_v45  ;;  %v370_v4 = vld [vmem:[#allocation6 + $0x458] sm:$0xff] }
 0x142   :  { %v818_v42 = vadd.f32 %v817_v41, %v753_v2  ;;  %v947_v9 = vpop.f32.mrf.mxu2  ;;  %v4045_v24 = vmul.f32 %v4040_v6, %v1723_v17  ;;  %1380 = vmatpush.msrb.mxu1 %v370_v4 }
 0x144   :  { %v883_v12 = vadd.f32 %v882_v35, %v818_v42  ;;  %1014 = vmatmul.f32.gmra.mxu3 %v3809_v20  ;;  %1079 = vmatmul.f32.gmra.mxu0 %v3820_v8  ;;  %v4051_v54 = vsub.f32 %v3961_v37, %v4045_v24  ;;  %v4055_v20 = vsub.f32 %v3963_v52, %v4045_v24  ;;  %v2983_v37 = vld [vmem:[%s5360_s1 + $0x91] sm:$0xff]  ;;  %v4070_v52 = vld [vmem:[%s5360_s1 + $0x60] sm:$0xff]  ;;  %v304_v35 = vld [vmem:[#allocation6 + $0x248] sm:$0xff] }
 0x145   :  { %v4078_v33 = vsub.f32 %v3969_v0, %v4045_v24  ;;  %1251 = vmatpush.msrb.mxu3 %v304_v35  ;;  %v4086_v61 = vsub.f32 %v3973_v10, %v4045_v24  ;;  %v2984_v42 = vld [vmem:[%s5360_s1 + $0xc1] sm:$0xff]  ;;  %v4113_v45 = vsub.f32 %v3980_v30, %v4045_v24 }
 0x146   :  { %v4047_v7 = vadd.f32 %v947_v9, %v883_v12  ;;  %v885_v41 = vpop.f32.mrf.mxu1  ;;  %5385 = vst [vmem:[#allocation16_spill] sm:$0xff] %v4051_v54  ;;  %v1763_v56 = vmul.f32 %v4055_v20, %v4055_v20  ;;  %v4105_v9 = vld [vmem:[%s5360_s1 + $0x70] sm:$0xff]  ;;  %v3000_v12 = vld [vmem:[%s5360_s1 + $0xc2] sm:$0xff] }
 0x147   :  { %5386 = vst [vmem:[#allocation17_spill] sm:$0xff] %v4055_v20  ;;  %v755_v8 = vpop.f32.mrf.mxu3  ;;  %1209 = vmatmul.f32.gmra.mxu2 %v4060_v55  ;;  %v1764_v0 = vmul.f32 %v4078_v33, %v4078_v33  ;;  %v1766_v30 = vmul.f32 %v4113_v45, %v4113_v45 }
 0x148   :  { %v756_v29 = vadd.f32 %v755_v8, %v3814_v62  ;;  %v1762_v62 = vmul.f32 %v4051_v54, %v4051_v54  ;;  %5387 = vst [vmem:[#allocation18_spill] sm:$0xff] %v4086_v61  ;;  %v4236_v54 = vld [vmem:[#allocation3 + $0x78] sm:$0xff] }
 0x149   :  { %1144 = vmatmul.f32.gmra.mxu1 %v4070_v52  ;;  %v823_v1 = vpop.f32.mrf.mxu0  ;;  %5388 = vst [vmem:[#allocation19_spill] sm:$0xff] %v4113_v45 }
 0x14a   :  { %v821_v32 = vadd.f32 %v820_v16, %v756_v29  ;;  %v950_v49 = vpop.f32.mrf.mxu2  ;;  %v1778_v39 = vadd.f32 %v1763_v56, %v1762_v62  ;;  %v302_v29 = vld [vmem:[#allocation6 + $0x238] sm:$0xff] }
 0x14b   :  { %1252 = vmatpush.msrb.mxu3 %v302_v29 }
 0x14c   :  { %v886_v38 = vadd.f32 %v885_v41, %v821_v32  ;;  %1017 = vmatmul.f32.gmra.mxu3 %v2983_v37  ;;  %1082 = vmatmul.f32.gmra.mxu0 %v2999_v43  ;;  %v1779_v31 = vadd.f32 %v1778_v39, %v1764_v0  ;;  %v336_v37 = vld [vmem:[#allocation6 + $0x348] sm:$0xff]  ;;  %v4119_v43 = vsub.f32 %v3995_v48, %v4045_v24  ;;  %v2985_v48 = vld [vmem:[%s5360_s1 + $0xd1] sm:$0xff] }
 0x14d   :  { %1316 = vmatpush.msrb.mxu0 %v336_v37  ;;  %v3001_v39 = vld [vmem:[%s5360_s1 + $0xd2] sm:$0xff] }
 0x14e   :  { %v4090_v23 = vadd.f32 %v950_v49, %v886_v38  ;;  %v888_v2 = vpop.f32.mrf.mxu1  ;;  %5389 = vst [vmem:[#allocation20_spill] sm:$0xff] %v4119_v43  ;;  %v3086_v38 = vld [vmem:[%s5360_s1 + $0xa1] sm:$0xff]  ;;  %v366_v37 = vld [vmem:[#allocation6 + $0x438] sm:$0xff] }
 0x14f   :  { %v758_v16 = vpop.f32.mrf.mxu3  ;;  %1212 = vmatmul.f32.gmra.mxu2 %v4095_v19 }
 0x150   :  { %v759_v10 = vadd.f32 %v758_v16, %v3826_v63  ;;  %v1765_v63 = vmul.f32 %v4086_v61, %v4086_v61  ;;  %v400_v61 = vld [vmem:[#allocation6 + $0x548] sm:$0xff] }
 0x151   :  { %1147 = vmatmul.f32.gmra.mxu1 %v4105_v9  ;;  %v826_v17 = vpop.f32.mrf.mxu0 }
 0x152   :  { %v824_v41 = vadd.f32 %v823_v1, %v759_v10  ;;  %v953_v22 = vpop.f32.mrf.mxu2  ;;  %v1780_v62 = vadd.f32 %v1779_v31, %v1765_v63  ;;  %v368_v1 = vld [vmem:[#allocation6 + $0x448] sm:$0xff]  ;;  %v334_v31 = vld [vmem:[#allocation6 + $0x338] sm:$0xff] }
 0x153   :  { %1381 = vmatpush.msrb.mxu1 %v368_v1  ;;  %v300_v63 = vld [vmem:[#allocation6 + $0x228] sm:$0xff]  ;;  %1317 = vmatpush.msrb.mxu0 %v334_v31 }
 0x154   :  { %v889_v8 = vadd.f32 %v888_v2, %v824_v41  ;;  %1020 = vmatmul.f32.gmra.mxu3 %v2984_v42  ;;  %1085 = vmatmul.f32.gmra.mxu0 %v3000_v12  ;;  %v4140_v2 = vsub.f32 %v3998_v28, %v4045_v24  ;;  %v1781_v4 = vadd.f32 %v1780_v62, %v1766_v30  ;;  %v422_v42 = vld [vmem:[#allocation6 + $0x5f8] sm:$0xff]  ;;  %v420_v41 = vld [vmem:[#allocation6 + $0x5e8] sm:$0xff] }
 0x155   :  { %1435 = vmatpush.msrb.mxu2 %v422_v42  ;;  %1253 = vmatpush.msrb.mxu3 %v300_v63  ;;  %v4146_v28 = vsub.f32 %v4001_v46, %v4045_v24  ;;  %v418_v30 = vld [vmem:[#allocation6 + $0x5d8] sm:$0xff]  ;;  %v416_v24 = vld [vmem:[#allocation6 + $0x5c8] sm:$0xff] }
 0x156   :  { %v4123_v56 = vadd.f32 %v953_v22, %v889_v8  ;;  %v891_v32 = vpop.f32.mrf.mxu1  ;;  %5390 = vst [vmem:[#allocation21_spill] sm:$0xff] %v4140_v2  ;;  %v1768_v22 = vmul.f32 %v4140_v2, %v4140_v2  ;;  %1382 = vmatpush.msrb.mxu1 %v366_v37  ;;  %v2986_v1 = vld [vmem:[%s5360_s1 + $0xe1] sm:$0xff] }
 0x157   :  { %v761_v49 = vpop.f32.mrf.mxu3  ;;  %1215 = vmatmul.f32.gmra.mxu2 %v3086_v38  ;;  %5391 = vst [vmem:[#allocation22_spill] sm:$0xff] %v4146_v28  ;;  %v412_v42 = vld [vmem:[#allocation6 + $0x5a8] sm:$0xff] }
 0x158   :  { %v762_v35 = vadd.f32 %v761_v49, %v3835_v47  ;;  %v1767_v47 = vmul.f32 %v4119_v43, %v4119_v43  ;;  %1436 = vmatpush.msrb.mxu2 %v420_v41  ;;  %v4165_v49 = vld [vmem:[%s5360_s1 + $0xb0] sm:$0xff]  ;;  %v364_v41 = vld [vmem:[#allocation6 + $0x428] sm:$0xff]  ;;  %v454_v43 = vld [vmem:[#allocation6 + $0x6f8] sm:$0xff] }
 0x159   :  { %1150 = vmatmul.f32.gmra.mxu1 %v3087_v26  ;;  %v829_v0 = vpop.f32.mrf.mxu0  ;;  %v328_v2 = vld [vmem:[#allocation6 + $0x308] sm:$0xff] }
 0x15a   :  { %v827_v16 = vadd.f32 %v826_v17, %v762_v35  ;;  %v956_v10 = vpop.f32.mrf.mxu2  ;;  %v1782_v8 = vadd.f32 %v1781_v4, %v1767_v47  ;;  %1437 = vmatpush.msrb.mxu2 %v418_v30  ;;  %v3002_v35 = vld [vmem:[%s5360_s1 + $0xe2] sm:$0xff]  ;;  %v414_v47 = vld [vmem:[#allocation6 + $0x5b8] sm:$0xff]  ;;  %1383 = vmatpush.msrb.mxu1 %v364_v41 }
 0x15b   :  { %v4188_v30 = vld [vmem:[%s5360_s1 + $0xc0] sm:$0xff] }
 0x15c   :  { %v892_v12 = vadd.f32 %v891_v32, %v827_v16  ;;  %1023 = vmatmul.f32.gmra.mxu3 %v2985_v48  ;;  %1088 = vmatmul.f32.gmra.mxu0 %v3001_v39  ;;  %v4155_v32 = vld [vmem:[%s5360_s1 + $0xb1] sm:$0xff]  ;;  %v1783_v48 = vadd.f32 %v1782_v8, %v1768_v22 }
 0x15d   :  { %1438 = vmatpush.msrb.mxu2 %v416_v24  ;;  %v298_v16 = vld [vmem:[#allocation6 + $0x218] sm:$0xff] }
 0x15e   :  { %v4150_v17 = vadd.f32 %v956_v10, %v892_v12  ;;  %v894_v29 = vpop.f32.mrf.mxu1  ;;  %v332_v10 = vld [vmem:[#allocation6 + $0x328] sm:$0xff]  ;;  %1254 = vmatpush.msrb.mxu3 %v298_v16  ;;  %v410_v22 = vld [vmem:[#allocation6 + $0x598] sm:$0xff] }
 0x15f   :  { %v764_v62 = vpop.f32.mrf.mxu3  ;;  %1218 = vmatmul.f32.gmra.mxu2 %v4155_v32  ;;  %1318 = vmatpush.msrb.mxu0 %v332_v10  ;;  %v330_v16 = vld [vmem:[#allocation6 + $0x318] sm:$0xff] }
 0x160   :  { %v765_v46 = vadd.f32 %v764_v62, %v3844_v53  ;;  %v1769_v53 = vmul.f32 %v4146_v28, %v4146_v28  ;;  %1439 = vmatpush.msrb.mxu2 %v414_v47 }
 0x161   :  { %1153 = vmatmul.f32.gmra.mxu1 %v4165_v49  ;;  %v832_v38 = vpop.f32.mrf.mxu0  ;;  %1319 = vmatpush.msrb.mxu0 %v330_v16 }
 0x162   :  { %v830_v26 = vadd.f32 %v829_v0, %v765_v46  ;;  %v959_v39 = vpop.f32.mrf.mxu2  ;;  %v1784_v12 = vadd.f32 %v1783_v48, %v1769_v53  ;;  %v4178_v0 = vld [vmem:[%s5360_s1 + $0xc1] sm:$0xff]  ;;  %1440 = vmatpush.msrb.mxu2 %v412_v42  ;;  %v3003_v46 = vld [vmem:[%s5360_s1 + $0xf2] sm:$0xff] }
 0x163   :  { %v408_v48 = vld [vmem:[#allocation6 + $0x588] sm:$0xff]  ;;  %v406_v42 = vld [vmem:[#allocation6 + $0x578] sm:$0xff]  ;;  %1320 = vmatpush.msrb.mxu0 %v328_v2 }
 0x164   :  { %v895_v4 = vadd.f32 %v894_v29, %v830_v26  ;;  %1026 = vmatmul.f32.gmra.mxu3 %v2986_v1  ;;  %1091 = vmatmul.f32.gmra.mxu0 %v3002_v35  ;;  %v2987_v29 = vld [vmem:[%s5360_s1 + $0xf1] sm:$0xff]  ;;  %v1785_v24 = vrot.slane %v1784_v12, 4  ;;  %v4194_v1 = vld [vmem:[#allocation3 + $0x40] sm:$0xff] }
 0x165   :  { %1441 = vmatpush.msrb.mxu2 %v410_v22 }
 0x166   :  { %v4173_v63 = vadd.f32 %v959_v39, %v895_v4  ;;  %v897_v31 = vpop.f32.mrf.mxu1  ;;  %v4200_v39 = vld [vmem:[#allocation3 + $0x50] sm:$0xff]  ;;  %v296_v4 = vld [vmem:[#allocation6 + $0x208] sm:$0xff]  ;;  %v1786_v41 = vadd.f32 %v1785_v24, %v1784_v12  ;;  %v4214_v12 = vld [vmem:[#allocation3 + $0x60] sm:$0xff] }
 0x167   :  { %v767_v37 = vpop.f32.mrf.mxu3  ;;  %1221 = vmatmul.f32.gmra.mxu2 %v4178_v0  ;;  %1255 = vmatpush.msrb.mxu3 %v296_v4  ;;  %v4230_v4 = vld [vmem:[#allocation3 + $0x68] sm:$0xff] }
 0x168   :  { %v768_v8 = vadd.f32 %v767_v37, %v3853_v60  ;;  %v4196_v60 = vld [vmem:[#allocation3 + $0x48] sm:$0xff]  ;;  %1442 = vmatpush.msrb.mxu2 %v408_v48  ;;  %v4224_v48 = vld [vmem:[%s5360_s1 + $0xd0] sm:$0xff] }
 0x169   :  { %1156 = vmatmul.f32.gmra.mxu1 %v4188_v30  ;;  %v835_v62 = vpop.f32.mrf.mxu0  ;;  %v1724_v26 = vadd.f32 %v4196_v60, %v4194_v1  ;;  %5394 = vst [vmem:[#allocation25_spill] sm:$0xff] %v4224_v48  ;;  %1500 = vmatpush.msra.mxu3 %v454_v43  ;;  %v2989_v43 = vld [vmem:[%s5360_s1 + $0x111] sm:$0xff] }
 0x16a   :  { %v833_v35 = vadd.f32 %v832_v38, %v768_v8  ;;  %v962_v53 = vpop.f32.mrf.mxu2  ;;  %v4203_v38 = vld [vmem:[#allocation3 + $0x58] sm:$0xff]  ;;  %1443 = vmatpush.msrb.mxu2 %v406_v42 }
 0x16b   :  { %v1725_v10 = vadd.f32 %v1724_v26, %v4200_v39  ;;  %v362_v8 = vld [vmem:[#allocation6 + $0x418] sm:$0xff] }
 0x16c   :  { %v898_v47 = vadd.f32 %v897_v31, %v833_v35  ;;  %1029 = vmatmul.f32.gmra.mxu3 %v2987_v29  ;;  %1094 = vmatmul.f32.gmra.mxu0 %v3003_v46  ;;  %v4211_v29 = vld [vmem:[%s5360_s1 + $0xd1] sm:$0xff]  ;;  %v404_v46 = vld [vmem:[#allocation6 + $0x568] sm:$0xff] }
 0x16d   :  { %v1726_v28 = vadd.f32 %v1725_v10, %v4203_v38  ;;  %5393 = vst [vmem:[#allocation24_spill] sm:$0xff] %v4211_v29  ;;  %1384 = vmatpush.msrb.mxu1 %v362_v8  ;;  %1444 = vmatpush.msrb.mxu2 %v404_v46  ;;  %v402_v10 = vld [vmem:[#allocation6 + $0x558] sm:$0xff]  ;;  %v4233_v8 = vld [vmem:[#allocation3 + $0x70] sm:$0xff] }
 0x16e   :  { %v4205_v37 = vadd.f32 %v962_v53, %v898_v47  ;;  %v900_v22 = vpop.f32.mrf.mxu1  ;;  %v2988_v53 = vld [vmem:[%s5360_s1 + $0x101] sm:$0xff] }
 0x16f   :  { %v770_v31 = vpop.f32.mrf.mxu3  ;;  %1224 = vmatmul.f32.gmra.mxu2 %v4211_v29  ;;  %v1727_v35 = vadd.f32 %v1726_v28, %v4214_v12  ;;  %v3004_v47 = vld [vmem:[%s5360_s1 + $0x102] sm:$0xff] }
 0x170   :  { %5392 = vst [vmem:[#allocation23_spill] sm:$0xff] %v4205_v37  ;;  %v771_v24 = vadd.f32 %v770_v31, %v3862_v3  ;;  %v1787_v3 = vrot.slane %v1786_v41, 2  ;;  %1445 = vmatpush.msrb.mxu2 %v402_v10  ;;  %v396_v10 = vld [vmem:[#allocation6 + $0x528] sm:$0xff] }
 0x171   :  { %1159 = vmatmul.f32.gmra.mxu1 %v4224_v48  ;;  %v838_v26 = vpop.f32.mrf.mxu0  ;;  %v1728_v42 = vadd.f32 %v1727_v35, %v4230_v4 }
 0x172   :  { %v836_v28 = vadd.f32 %v835_v62, %v771_v24  ;;  %v965_v16 = vpop.f32.mrf.mxu2  ;;  %v1788_v20 = vadd.f32 %v1787_v3, %v1786_v41  ;;  %v360_v24 = vld [vmem:[#allocation6 + $0x408] sm:$0xff]  ;;  %1446 = vmatpush.msrb.mxu2 %v400_v61 }
 0x173   :  { %v1729_v45 = vadd.f32 %v1728_v42, %v4233_v8  ;;  %1385 = vmatpush.msrb.mxu1 %v360_v24  ;;  %v452_v24 = vld [vmem:[#allocation6 + $0x6e8] sm:$0xff] }
 0x174   :  { %v901_v31 = vadd.f32 %v900_v22, %v836_v28  ;;  %1032 = vmatmul.f32.gmra.mxu3 %v2988_v53  ;;  %1097 = vmatmul.f32.gmra.mxu0 %v3004_v47  ;;  %v4244_v53 = vld [vmem:[%s5360_s1 + $0xe1] sm:$0xff]  ;;  %v398_v47 = vld [vmem:[#allocation6 + $0x538] sm:$0xff] }
 0x175   :  { %v1730_v35 = vadd.f32 %v1729_v45, %v4236_v54  ;;  %5396 = vst [vmem:[#allocation27_spill] sm:$0xff] %v4244_v53  ;;  %v4254_v45 = vld [vmem:[%s5360_s1 + $0xe0] sm:$0xff]  ;;  %v3005_v28 = vld [vmem:[%s5360_s1 + $0x112] sm:$0xff]  ;;  %1447 = vmatpush.msrb.mxu2 %v398_v47  ;;  %1501 = vmatpush.msra.mxu3 %v452_v24 }
 0x176   :  { %v4238_v62 = vadd.f32 %v965_v16, %v901_v31  ;;  %v903_v46 = vpop.f32.mrf.mxu1  ;;  %5397 = vst [vmem:[#allocation28_spill] sm:$0xff] %v4254_v45  ;;  %v1789_v16 = vrot.slane %v1788_v20, 1 }
 0x177   :  { %v773_v22 = vpop.f32.mrf.mxu3  ;;  %1227 = vmatmul.f32.gmra.mxu2 %v4244_v53  ;;  %v1731_v41 = vrot.slane %v1730_v35, 4  ;;  %v518_v53 = vld [vmem:[#allocation6 + $0x8f8] sm:$0xff] }
 0x178   :  { %5395 = vst [vmem:[#allocation26_spill] sm:$0xff] %v4238_v62  ;;  %v774_v2 = vadd.f32 %v773_v22, %v3871_v50  ;;  %v486_v22 = vld [vmem:[#allocation6 + $0x7f8] sm:$0xff]  ;;  %1448 = vmatpush.msrb.mxu2 %v396_v10  ;;  %v1790_v29 = vadd.f32 %v1789_v16, %v1788_v20  ;;  %1630 = vmatpush.msra.mxu1 %v518_v53 }
 0x179   :  { %1162 = vmatmul.f32.gmra.mxu1 %v4254_v45  ;;  %v841_v3 = vpop.f32.mrf.mxu0  ;;  %v1732_v42 = vadd.f32 %v1731_v41, %v1730_v35  ;;  %v394_v45 = vld [vmem:[#allocation6 + $0x518] sm:$0xff]  ;;  %1565 = vmatpush.msra.mxu0 %v486_v22  ;;  %v392_v35 = vld [vmem:[#allocation6 + $0x508] sm:$0xff]  ;;  %v4272_v41 = vld [vmem:[%s5360_s1 + $0xf0] sm:$0xff] }
 0x17a   :  { %v839_v50 = vadd.f32 %v838_v26, %v774_v2  ;;  %v968_v61 = vpop.f32.mrf.mxu2  ;;  %1449 = vmatpush.msrb.mxu2 %v394_v45  ;;  %v1804_v53 = vmul.f32 %v1790_v29, %v4040_v6  ;;  %v484_v45 = vld [vmem:[#allocation6 + $0x7e8] sm:$0xff]  ;;  %v2991_v22 = vld [vmem:[%s5360_s1 + $0x131] sm:$0xff] }
 0x17b   :  { %v1733_v62 = vrot.slane %v1732_v42, 2  ;;  %1566 = vmatpush.msra.mxu0 %v484_v45 }
 0x17c   :  { %v904_v31 = vadd.f32 %v903_v46, %v839_v50  ;;  %1035 = vmatmul.f32.gmra.mxu3 %v2989_v43  ;;  %1100 = vmatmul.f32.gmra.mxu0 %v3005_v28  ;;  %v4265_v46 = vld [vmem:[%s5360_s1 + $0xf1] sm:$0xff] }
 0x17d   :  { %v1734_v26 = vadd.f32 %v1733_v62, %v1732_v42  ;;  %1450 = vmatpush.msrb.mxu2 %v392_v35  ;;  %v4281_v42 = vadd.f32 1e-05, %v1804_v53 }
 0x17e   :  { %v4260_v37 = vadd.f32 %v968_v61, %v904_v31  ;;  %v906_v48 = vpop.f32.mrf.mxu1  ;;  %v516_v61 = vld [vmem:[#allocation6 + $0x8e8] sm:$0xff] }
 0x17f   :  { %v776_v47 = vpop.f32.mrf.mxu3  ;;  %1230 = vmatmul.f32.gmra.mxu2 %v4265_v46  ;;  %v1735_v20 = vrot.slane %v1734_v26, 1  ;;  %1631 = vmatpush.msra.mxu1 %v516_v61  ;;  %v4296_v31 = vld [vmem:[%s5360_s1 + $0x101] sm:$0xff]  ;;  %3070 = vrsqrt.f32 %v4281_v42  ;;  %vm1814_vm1 = vweird.f32 %v4281_v42 }
 0x180   :  { %v777_v2 = vadd.f32 %v776_v47, %v3880_v14  ;;  %v450_v14 = vld [vmem:[#allocation6 + $0x6d8] sm:$0xff] }
 0x181   :  { %1165 = vmatmul.f32.gmra.mxu1 %v4272_v41  ;;  %v844_v62 = vpop.f32.mrf.mxu0  ;;  %v1736_v16 = vadd.f32 %v1735_v20, %v1734_v26  ;;  %1502 = vmatpush.msra.mxu3 %v450_v14  ;;  %v3007_v26 = vld [vmem:[%s5360_s1 + $0x132] sm:$0xff] }
 0x182   :  { %v842_v43 = vadd.f32 %v841_v3, %v777_v2  ;;  %v971_v28 = vpop.f32.mrf.mxu2 }
 0x183   :  { %v4279_v10 = vmul.f32 %v4040_v6, %v1736_v16  ;;  %v514_v16 = vld [vmem:[#allocation6 + $0x8d8] sm:$0xff] }
 0x184   :  { %v907_v50 = vadd.f32 %v906_v48, %v842_v43  ;;  %1038 = vmatmul.f32.gmra.mxu3 %v3894_v11  ;;  %1103 = vmatmul.f32.gmra.mxu0 %v3905_v58  ;;  %v448_v43 = vld [vmem:[#allocation6 + $0x6c8] sm:$0xff] }
 0x185   :  { %v4287_v48 = vsub.f32 %v4194_v1, %v4279_v10  ;;  %v4291_v11 = vsub.f32 %v4196_v60, %v4279_v10  ;;  %v4306_v1 = vld [vmem:[%s5360_s1 + $0x100] sm:$0xff]  ;;  %v4315_v35 = vsub.f32 %v4200_v39, %v4279_v10  ;;  %1503 = vmatpush.msra.mxu3 %v448_v43  ;;  %1632 = vmatpush.msra.mxu1 %v514_v16  ;;  %v4329_v61 = vpop.eup %3070 }
 0x186   :  { %v4283_v29 = vadd.f32 %v971_v28, %v907_v50  ;;  %v909_v3 = vpop.f32.mrf.mxu1  ;;  %v482_v28 = vld [vmem:[#allocation6 + $0x7d8] sm:$0xff]  ;;  %v4325_v39 = vsub.f32 %v4203_v38, %v4279_v10  ;;  %v4341_v38 = vld [vmem:[%s5360_s1 + $0x110] sm:$0xff]  ;;  %v3102_v43 = vld [vmem:[%s5360_s1 + $0x2] sm:$0xff]  ;;  %vm1815_vm2 = vweird.f32 %v4329_v61 }
 0x187   :  { %v779_v58 = vpop.f32.mrf.mxu3  ;;  %1233 = vmatmul.f32.gmra.mxu2 %v4296_v31  ;;  %v1770_v2 = vmul.f32 %v4287_v48, %v4287_v48  ;;  %v1771_v20 = vmul.f32 %v4291_v11, %v4291_v11  ;;  %1567 = vmatpush.msra.mxu0 %v482_v28  ;;  %v1772_v14 = vmul.f32 %v4315_v35, %v4315_v35  ;;  %v480_v28 = vld [vmem:[#allocation6 + $0x7c8] sm:$0xff]  ;;  %vm1816_vm3 = vmor %vm1814_vm1, %vm1815_vm2 }
 0x188   :  { %v780_v24 = vadd.f32 %v779_v58, %v3896_v15  ;;  %5398 = vst [vmem:[#allocation29_spill] sm:$0xff] %v4325_v39  ;;  %v4334_v58 = vld [vmem:[%s5360_s1 + $0x111] sm:$0xff] }
 0x189   :  { %1168 = vmatmul.f32.gmra.mxu1 %v4306_v1  ;;  %v847_v60 = vpop.f32.mrf.mxu0  ;;  %v1791_v45 = vadd.f32 %v1771_v20, %v1770_v2  ;;  %1568 = vmatpush.msra.mxu0 %v480_v28  ;;  %v478_v28 = vld [vmem:[#allocation6 + $0x7b8] sm:$0xff] }
 0x18a   :  { %v845_v47 = vadd.f32 %v844_v62, %v780_v24  ;;  %v974_v15 = vpop.f32.mrf.mxu2 }
 0x18b   :  { %v1792_v2 = vadd.f32 %v1791_v45, %v1772_v14  ;;  %1569 = vmatpush.msra.mxu0 %v478_v28 }
 0x18c   :  { %v910_v53 = vadd.f32 %v909_v3, %v845_v47  ;;  %1041 = vmatmul.f32.gmra.mxu3 %v2991_v22  ;;  %1106 = vmatmul.f32.gmra.mxu0 %v3007_v26  ;;  %v4346_v47 = vsub.f32 %v4214_v12, %v4279_v10  ;;  %v512_v12 = vld [vmem:[#allocation6 + $0x8c8] sm:$0xff] }
 0x18d   :  { %1633 = vmatpush.msra.mxu1 %v512_v12  ;;  %v510_v12 = vld [vmem:[#allocation6 + $0x8b8] sm:$0xff] }
 0x18e   :  { %v4321_v62 = vadd.f32 %v974_v15, %v910_v53  ;;  %v912_v50 = vpop.f32.mrf.mxu1  ;;  %5399 = vst [vmem:[#allocation30_spill] sm:$0xff] %v4346_v47  ;;  %v1773_v15 = vmul.f32 %v4325_v39, %v4325_v39  ;;  %v1774_v45 = vmul.f32 %v4346_v47, %v4346_v47  ;;  %v2090_v47 = vld [vmem:[#allocation9 + $0x60] sm:$0xff] }
 0x18f   :  { %v782_v3 = vpop.f32.mrf.mxu3  ;;  %1236 = vmatmul.f32.gmra.mxu2 %v4334_v58  ;;  %1634 = vmatpush.msra.mxu1 %v510_v12 }
 0x190   :  { %v783_v24 = vadd.f32 %v782_v3, %v3912_v18  ;;  %v1809_v18 = vmul.f32 %v4329_v61, %v4281_v42  ;;  %v1793_v3 = vadd.f32 %v1792_v2, %v1773_v15  ;;  %v4378_v15 = vsub.f32 %v4233_v8, %v4279_v10 }
 0x191   :  { %1171 = vmatmul.f32.gmra.mxu1 %v4341_v38  ;;  %v1062_v22 = vpop.f32.mrf.mxu0  ;;  %v4387_v8 = vsub.f32 %v4236_v54, %v4279_v10 }
 0x192   :  { %v848_v26 = vadd.f32 %v847_v60, %v783_v24  ;;  %v977_v20 = vpop.f32.mrf.mxu2  ;;  %v446_v60 = vld [vmem:[#allocation6 + $0x6b8] sm:$0xff]  ;;  %5401 = vst [vmem:[#allocation32_spill] sm:$0xff] %v4378_v15 }
 0x193   :  { %1504 = vmatpush.msra.mxu3 %v446_v60  ;;  %5402 = vst [vmem:[#allocation33_spill] sm:$0xff] %v4387_v8 }
 0x194   :  { %v913_v53 = vadd.f32 %v912_v50, %v848_v26  ;;  %1256 = vmatmul.f32.vlgmr.msrb.gmra.mxu3 %v3102_v43  ;;  %1321 = vmatmul.f32.vlgmr.msrb.gmra.mxu0 %v3936_v13  ;;  %v4362_v50 = vsub.f32 %v4230_v4, %v4279_v10  ;;  %v1810_v13 = vmul.f32 %v4329_v61, %v1809_v18  ;;  %v3103_v26 = vld [vmem:[%s5360_s1 + $0x12] sm:$0xff]  ;;  %v4403_v10 = vld [vmem:[%s5360_s1 + $0x21] sm:$0xff] }
 0x195   :  { %v1794_v18 = vadd.f32 %v1793_v3, %v1774_v45 }
 0x196   :  { %v4356_v16 = vadd.f32 %v977_v20, %v913_v53  ;;  %v4358_v14 = vpop.f32.mrf.mxu1  ;;  %5400 = vst [vmem:[#allocation31_spill] sm:$0xff] %v4362_v50  ;;  %v3104_v53 = vld [vmem:[%s5360_s1 + $0x11] sm:$0xff]  ;;  %v1775_v2 = vmul.f32 %v4362_v50, %v4362_v50  ;;  %v1811_v60 = vmul.f32 0.5, %v1810_v13 }
 0x197   :  { %v997_v24 = vpop.f32.mrf.mxu3  ;;  %1451 = vmatmul.f32.vlgmr.msrb.gmra.mxu2 %v3103_v26 }
 0x198   :  { %v998_v20 = vadd.f32 %v997_v24, %v3927_v51  ;;  %v444_v51 = vld [vmem:[#allocation6 + $0x6a8] sm:$0xff]  ;;  %v1795_v45 = vadd.f32 %v1794_v18, %v1775_v2  ;;  %v1812_v3 = vsub.f32 1.5, %v1811_v60 }
 0x199   :  { %1386 = vmatmul.f32.vlgmr.msrb.gmra.mxu1 %v3104_v53  ;;  %v1065_v4 = vpop.f32.mrf.mxu0  ;;  %1505 = vmatpush.msra.mxu3 %v444_v51  ;;  %v1777_v53 = vmul.f32 %v4387_v8, %v4387_v8  ;;  %v476_v18 = vld [vmem:[#allocation6 + $0x7a8] sm:$0xff] }
 0x19a   :  { %v4374_v43 = vadd.f32 %v1062_v22, %v998_v20  ;;  %v1776_v22 = vmul.f32 %v4378_v15, %v4378_v15  ;;  %v1813_v42 = vmul.f32 %v4329_v61, %v1812_v3  ;;  %v508_v60 = vld [vmem:[#allocation6 + $0x8a8] sm:$0xff]  ;;  %1570 = vmatpush.msra.mxu0 %v476_v18  ;;  %v4430_v3 = vld [vmem:[%s5360_s1 + $0x31] sm:$0xff] }
 0x19b   :  { %1635 = vmatpush.msra.mxu1 %v508_v60  ;;  %v490_v15 = vld [vmem:[#allocation6 + $0x818] sm:$0xff] }
 0x19c   :  { %1259 = vmatmul.f32.gmra.mxu3 %v3103_v26  ;;  %1324 = vmatmul.f32.gmra.mxu0 %v3955_v57  ;;  %v4394_v57 = vld [vmem:[%s5360_s1 + $0x22] sm:$0xff]  ;;  %v1796_v2 = vadd.f32 %v1795_v45, %v1776_v22  ;;  %v4416_v28 = vsel %vm1816_vm3, %v4329_v61, %v1813_v42  ;;  %v4421_v22 = vld [vmem:[%s5360_s1 + $0x32] sm:$0xff] }
 0x19d   :  { %v1830_v45 = vmul.f32 %v4416_v28, %v4078_v33  ;;  %v506_v42 = vld [vmem:[#allocation6 + $0x898] sm:$0xff] }
 0x19e   :  { %v4383_v24 = vpop.f32.mrf.mxu1  ;;  %1636 = vmatpush.msra.mxu1 %v506_v42 }
 0x19f   :  { %v1000_v13 = vpop.f32.mrf.mxu3  ;;  %1454 = vmatmul.f32.gmra.mxu2 %v4394_v57 }
 0x1a0   :  { %v1001_v54 = vadd.f32 %v1000_v13, %v3946_v25  ;;  %v442_v25 = vld [vmem:[#allocation6 + $0x698] sm:$0xff] }
 0x1a1   :  { %1389 = vmatmul.f32.gmra.mxu1 %v4403_v10  ;;  %v1068_v26 = vpop.f32.mrf.mxu0  ;;  %1506 = vmatpush.msra.mxu3 %v442_v25 }
 0x1a2   :  { %v4406_v20 = vadd.f32 %v1065_v4, %v1001_v54  ;;  %v1797_v4 = vadd.f32 %v1796_v2, %v1777_v53  ;;  %v474_v2 = vld [vmem:[#allocation6 + $0x798] sm:$0xff] }
 0x1a3   :  { %1571 = vmatpush.msra.mxu0 %v474_v2 }
 0x1a4   :  { %1262 = vmatmul.f32.gmra.mxu3 %v4394_v57  ;;  %1327 = vmatmul.f32.gmra.mxu0 %v3989_v36  ;;  %v1798_v54 = vrot.slane %v1797_v4, 4 }
 0x1a6   :  { %v4413_v51 = vpop.f32.mrf.mxu1  ;;  %v1799_v25 = vadd.f32 %v1798_v54, %v1797_v4  ;;  %v504_v4 = vld [vmem:[#allocation6 + $0x888] sm:$0xff] }
 0x1a7   :  { %v1003_v12 = vpop.f32.mrf.mxu3  ;;  %1457 = vmatmul.f32.gmra.mxu2 %v4421_v22  ;;  %1637 = vmatpush.msra.mxu1 %v504_v4  ;;  %v434_v4 = vld [vmem:[#allocation6 + $0x658] sm:$0xff] }
 0x1a8   :  { %v1004_v36 = vadd.f32 %v1003_v12, %v3976_v21  ;;  %v440_v21 = vld [vmem:[#allocation6 + $0x688] sm:$0xff] }
 0x1a9   :  { %1392 = vmatmul.f32.gmra.mxu1 %v4430_v3  ;;  %v1071_v61 = vpop.f32.mrf.mxu0  ;;  %1507 = vmatpush.msra.mxu3 %v440_v21 }
 0x1aa   :  { %v1069_v13 = vadd.f32 %v1068_v26, %v1004_v36  ;;  %v3109_v26 = vld [vmem:[%s5360_s1 + $0x42] sm:$0xff]  ;;  %v1800_v36 = vrot.slane %v1799_v25, 2 }
 0x1ac   :  { %v4433_v53 = vmul.f32 %v1830_v45, %v1069_v13  ;;  %1265 = vmatmul.f32.gmra.mxu3 %v4421_v22  ;;  %1330 = vmatmul.f32.gmra.mxu0 %v4019_v40  ;;  %v438_v45 = vld [vmem:[#allocation6 + $0x678] sm:$0xff]  ;;  %v472_v13 = vld [vmem:[#allocation6 + $0x788] sm:$0xff]  ;;  %v1801_v21 = vadd.f32 %v1800_v36, %v1799_v25 }
 0x1ad   :  { %1508 = vmatpush.msra.mxu3 %v438_v45  ;;  %1572 = vmatpush.msra.mxu0 %v472_v13  ;;  %v502_v25 = vld [vmem:[#allocation6 + $0x878] sm:$0xff] }
 0x1ae   :  { %v4437_v33 = vpop.f32.mrf.mxu1  ;;  %v1802_v42 = vrot.slane %v1801_v21, 1  ;;  %1638 = vmatpush.msra.mxu1 %v502_v25  ;;  %v466_v25 = vld [vmem:[#allocation6 + $0x758] sm:$0xff] }
 0x1af   :  { %v1006_v18 = vpop.f32.mrf.mxu3  ;;  %1460 = vmatmul.f32.gmra.mxu2 %v3109_v26 }
 0x1b0   :  { %v1007_v60 = vadd.f32 %v1006_v18, %v4003_v34  ;;  %v3110_v34 = vld [vmem:[%s5360_s1 + $0x52] sm:$0xff]  ;;  %v436_v18 = vld [vmem:[#allocation6 + $0x668] sm:$0xff]  ;;  %v1803_v36 = vadd.f32 %v1802_v42, %v1801_v21 }
 0x1b1   :  { %1395 = vmatmul.f32.gmra.mxu1 %v4009_v44  ;;  %v1074_v40 = vpop.f32.mrf.mxu0  ;;  %1509 = vmatpush.msra.mxu3 %v436_v18  ;;  %v468_v21 = vld [vmem:[#allocation6 + $0x768] sm:$0xff]  ;;  %v4485_v18 = vld [vmem:[%s5360_s1 + $0x80] sm:$0xff] }
 0x1b2   :  { %v4444_v12 = vadd.f32 %v1071_v61, %v1007_v60  ;;  %v1805_v13 = vmul.f32 %v1803_v36, %v4040_v6 }
 0x1b3   :  { %1510 = vmatpush.msra.mxu3 %v434_v4 }
 0x1b4   :  { %1268 = vmatmul.f32.gmra.mxu3 %v3109_v26  ;;  %1333 = vmatmul.f32.gmra.mxu0 %v4037_v27  ;;  %v470_v26 = vld [vmem:[#allocation6 + $0x778] sm:$0xff] }
 0x1b5   :  { %1573 = vmatpush.msra.mxu0 %v470_v26  ;;  %v432_v26 = vld [vmem:[#allocation6 + $0x648] sm:$0xff] }
 0x1b6   :  { %v4447_v54 = vpop.f32.mrf.mxu1  ;;  %1511 = vmatpush.msra.mxu3 %v432_v26 }
 0x1b7   :  { %v1009_v2 = vpop.f32.mrf.mxu3  ;;  %1463 = vmatmul.f32.gmra.mxu2 %v3110_v34  ;;  %1574 = vmatpush.msra.mxu0 %v468_v21 }
 0x1b8   :  { %v1010_v44 = vadd.f32 %v1009_v2, %v4025_v59  ;;  %v3111_v59 = vld [vmem:[%s5360_s1 + $0x62] sm:$0xff] }
 0x1b9   :  { %1398 = vmatmul.f32.gmra.mxu1 %v4030_v5  ;;  %v1077_v27 = vpop.f32.mrf.mxu0  ;;  %v500_v2 = vld [vmem:[#allocation6 + $0x868] sm:$0xff]  ;;  %1575 = vmatpush.msra.mxu0 %v466_v25 }
 0x1ba   :  { %v4454_v61 = vadd.f32 %v1074_v40, %v1010_v44  ;;  %v4470_v44 = vadd.f32 1e-05, %v1805_v13  ;;  %1639 = vmatpush.msra.mxu1 %v500_v2 }
 0x1bc   :  { %1271 = vmatmul.f32.gmra.mxu3 %v3110_v34  ;;  %1336 = vmatmul.f32.gmra.mxu0 %v4070_v52  ;;  %3072 = vrsqrt.f32 %v4470_v44  ;;  %vm1824_vm4 = vweird.f32 %v4470_v44 }
 0x1be   :  { %v4457_v60 = vpop.f32.mrf.mxu1 }
 0x1bf   :  { %v1012_v45 = vpop.f32.mrf.mxu3  ;;  %1466 = vmatmul.f32.gmra.mxu2 %v3111_v59 }
 0x1c0   :  { %v1013_v5 = vadd.f32 %v1012_v45, %v4047_v7  ;;  %v4493_v45 = vld [vmem:[%s5360_s1 + $0x82] sm:$0xff] }
 0x1c1   :  { %1401 = vmatmul.f32.gmra.mxu1 %v4060_v55  ;;  %v1080_v52 = vpop.f32.mrf.mxu0  ;;  %v3112_v55 = vld [vmem:[%s5360_s1 + $0x72] sm:$0xff] }
 0x1c2   :  { %v4464_v40 = vadd.f32 %v1077_v27, %v1013_v5  ;;  %v4476_v27 = vpop.f32.mrf.mxu2 }
 0x1c4   :  { %1274 = vmatmul.f32.gmra.mxu3 %v3111_v59  ;;  %1339 = vmatmul.f32.gmra.mxu0 %v4105_v9  ;;  %v3073_v59 = vpop.eup %3072 }
 0x1c5   :  { %v1819_v2 = vmul.f32 %v3073_v59, %v4470_v44  ;;  %vm1825_vm5 = vweird.f32 %v3073_v59 }
 0x1c6   :  { %v4468_v34 = vpop.f32.mrf.mxu1  ;;  %vm1826_vm6 = vmor %vm1824_vm4, %vm1825_vm5 }
 0x1c7   :  { %v1015_v7 = vpop.f32.mrf.mxu3  ;;  %1469 = vmatmul.f32.gmra.mxu2 %v3112_v55  ;;  %v1820_v25 = vmul.f32 %v3073_v59, %v1819_v2 }
 0x1c8   :  { %v1016_v6 = vadd.f32 %v1015_v7, %v4090_v23  ;;  %v498_v23 = vld [vmem:[#allocation6 + $0x858] sm:$0xff]  ;;  %v3116_v7 = vld [vmem:[%s5360_s1 + $0xa2] sm:$0xff] }
 0x1c9   :  { %1404 = vmatmul.f32.gmra.mxu1 %v4095_v19  ;;  %v1083_v9 = vpop.f32.mrf.mxu0 }
 0x1ca   :  { %v4479_v42 = vadd.f32 %v1080_v52, %v1016_v6  ;;  %1640 = vmatpush.msra.mxu1 %v498_v23  ;;  %v4500_v52 = vld [vmem:[%s5360_s1 + $0x81] sm:$0xff]  ;;  %v4505_v21 = vpop.f32.mrf.mxu2  ;;  %v3117_v23 = vld [vmem:[%s5360_s1 + $0xb2] sm:$0xff] }
 0x1cb   :  { %v496_v6 = vld [vmem:[#allocation6 + $0x848] sm:$0xff] }
 0x1cc   :  { %1277 = vmatmul.f32.gmra.mxu3 %v3112_v55  ;;  %1342 = vmatmul.f32.gmra.mxu0 %v4485_v18  ;;  %v464_v55 = vld [vmem:[#allocation6 + $0x748] sm:$0xff] }
 0x1cd   :  { %1576 = vmatpush.msra.mxu0 %v464_v55  ;;  %1641 = vmatpush.msra.mxu1 %v496_v6  ;;  %v462_v55 = vld [vmem:[#allocation6 + $0x738] sm:$0xff] }
 0x1ce   :  { %v4488_v36 = vpop.f32.mrf.mxu1  ;;  %v494_v6 = vld [vmem:[#allocation6 + $0x838] sm:$0xff] }
 0x1cf   :  { %v1018_v19 = vpop.f32.mrf.mxu3  ;;  %1472 = vmatmul.f32.gmra.mxu2 %v4493_v45  ;;  %1577 = vmatpush.msra.mxu0 %v462_v55  ;;  %v492_v55 = vld [vmem:[#allocation6 + $0x828] sm:$0xff] }
 0x1d0   :  { %v1019_v5 = vadd.f32 %v1018_v19, %v4123_v56  ;;  %v430_v56 = vld [vmem:[#allocation6 + $0x638] sm:$0xff]  ;;  %1642 = vmatpush.msra.mxu1 %v494_v6 }
 0x1d1   :  { %1407 = vmatmul.f32.gmra.mxu1 %v4500_v52  ;;  %v1086_v13 = vpop.f32.mrf.mxu0  ;;  %1512 = vmatpush.msra.mxu3 %v430_v56  ;;  %v428_v56 = vld [vmem:[#allocation6 + $0x628] sm:$0xff] }
 0x1d2   :  { %v4503_v4 = vadd.f32 %v1083_v9, %v1019_v5  ;;  %v4522_v2 = vpop.f32.mrf.mxu2  ;;  %1643 = vmatpush.msra.mxu1 %v492_v55  ;;  %v458_v55 = vld [vmem:[#allocation6 + $0x718] sm:$0xff] }
 0x1d3   :  { %1513 = vmatpush.msra.mxu3 %v428_v56  ;;  %v460_v56 = vld [vmem:[#allocation6 + $0x728] sm:$0xff] }
 0x1d4   :  { %1280 = vmatmul.f32.gmra.mxu3 %v3116_v7  ;;  %1345 = vmatmul.f32.gmra.mxu0 %v4165_v49  ;;  %v1821_v7 = vmul.f32 0.5, %v1820_v25 }
 0x1d5   :  { %1578 = vmatpush.msra.mxu0 %v460_v56  ;;  %1644 = vmatpush.msra.mxu1 %v490_v15  ;;  %v488_v15 = vld [vmem:[#allocation6 + $0x808] sm:$0xff] }
 0x1d6   :  { %v4512_v26 = vpop.f32.mrf.mxu1 }
 0x1d7   :  { %v1021_v9 = vpop.f32.mrf.mxu3  ;;  %1475 = vmatmul.f32.gmra.mxu2 %v3117_v23  ;;  %1579 = vmatpush.msra.mxu0 %v458_v55  ;;  %v3121_v55 = vld [vmem:[%s5360_s1 + $0xf2] sm:$0xff] }
 0x1d8   :  { %v1022_v19 = vadd.f32 %v1021_v9, %v4150_v17  ;;  %v1822_v17 = vsub.f32 1.5, %v1821_v7  ;;  %v426_v7 = vld [vmem:[#allocation6 + $0x618] sm:$0xff]  ;;  %1645 = vmatpush.msra.mxu1 %v488_v15 }
 0x1d9   :  { %1410 = vmatmul.f32.gmra.mxu1 %v4155_v32  ;;  %v1089_v49 = vpop.f32.mrf.mxu0  ;;  %v3118_v32 = vld [vmem:[%s5360_s1 + $0xc2] sm:$0xff]  ;;  %1514 = vmatpush.msra.mxu3 %v426_v7  ;;  %v2093_v15 = vld [vmem:[#allocation9 + $0x78] sm:$0xff] }
 0x1da   :  { %v4519_v5 = vadd.f32 %v1086_v13, %v1022_v19  ;;  %v5403_v19 = vld [vmem:[#allocation25_spill] sm:$0xff]  ;;  %v4537_v44 = vpop.f32.mrf.mxu2  ;;  %2226 = vmatpush.msra.mxu2 %v2093_v15 }
 0x1dc   :  { %1283 = vmatmul.f32.gmra.mxu3 %v3117_v23  ;;  %1348 = vmatmul.f32.gmra.mxu0 %v4188_v30  ;;  %v1823_v23 = vmul.f32 %v3073_v59, %v1822_v17  ;;  %v5404_v17 = vld [vmem:[#allocation23_spill] sm:$0xff] }
 0x1de   :  { %v4524_v8 = vpop.f32.mrf.mxu1 }
 0x1df   :  { %v1024_v9 = vpop.f32.mrf.mxu3  ;;  %1478 = vmatmul.f32.gmra.mxu2 %v3118_v32 }
 0x1e0   :  { %v1025_v30 = vadd.f32 %v1024_v9, %v4173_v63  ;;  %v4539_v63 = vsel %vm1826_vm6, %v3073_v59, %v1823_v23  ;;  %v5407_v59 = vld [vmem:[#allocation28_spill] sm:$0xff] }
 0x1e1   :  { %1413 = vmatmul.f32.gmra.mxu1 %v4178_v0  ;;  %v1092_v13 = vpop.f32.mrf.mxu0  ;;  %v424_v23 = vld [vmem:[#allocation6 + $0x608] sm:$0xff] }
 0x1e2   :  { %v4532_v25 = vadd.f32 %v1089_v49, %v1025_v30  ;;  %v3119_v49 = vld [vmem:[%s5360_s1 + $0xd2] sm:$0xff]  ;;  %v5405_v30 = vld [vmem:[#allocation24_spill] sm:$0xff]  ;;  %1515 = vmatpush.msra.mxu3 %v424_v23 }
 0x1e4   :  { %1286 = vmatmul.f32.gmra.mxu3 %v3118_v32  ;;  %1351 = vmatmul.f32.gmra.mxu0 %v5403_v19  ;;  %v1838_v32 = vmul.f32 %v4539_v63, %v4315_v35  ;;  %v3120_v35 = vld [vmem:[%s5360_s1 + $0xe2] sm:$0xff] }
 0x1e6   :  { %v4535_v6 = vpop.f32.mrf.mxu1 }
 0x1e7   :  { %v1027_v0 = vpop.f32.mrf.mxu3  ;;  %1481 = vmatmul.f32.gmra.mxu2 %v3119_v49 }
 0x1e8   :  { %v1028_v9 = vadd.f32 %v1027_v0, %v5404_v17 }
 0x1e9   :  { %1416 = vmatmul.f32.gmra.mxu1 %v5405_v30  ;;  %v1095_v19 = vpop.f32.mrf.mxu0 }
 0x1ea   :  { %v1093_v7 = vadd.f32 %v1092_v13, %v1028_v9  ;;  %v5408_v13 = vld [vmem:[#allocation26_spill] sm:$0xff]  ;;  %v4557_v9 = vpop.f32.mrf.mxu2 }
 0x1ec   :  { %v4548_v56 = vmul.f32 %v1838_v32, %v1093_v7  ;;  %1289 = vmatmul.f32.gmra.mxu3 %v3119_v49  ;;  %1354 = vmatmul.f32.gmra.mxu0 %v5407_v59  ;;  %v5409_v49 = vld [vmem:[#allocation27_spill] sm:$0xff]  ;;  %v456_v7 = vld [vmem:[#allocation6 + $0x708] sm:$0xff] }
 0x1ed   :  { %1580 = vmatpush.msra.mxu0 %v456_v7  ;;  %v3122_v7 = vld [vmem:[%s5360_s1 + $0x102] sm:$0xff] }
 0x1ee   :  { %5406 = vst [vmem:[#allocation25_spill] sm:$0xff] %v4548_v56  ;;  %v4551_v50 = vpop.f32.mrf.mxu1 }
 0x1ef   :  { %v1030_v0 = vpop.f32.mrf.mxu3  ;;  %1484 = vmatmul.f32.gmra.mxu2 %v3120_v35 }
 0x1f0   :  { %v1031_v17 = vadd.f32 %v1030_v0, %v5408_v13 }
 0x1f1   :  { %1419 = vmatmul.f32.gmra.mxu1 %v5409_v49  ;;  %v1098_v32 = vpop.f32.mrf.mxu0 }
 0x1f2   :  { %v4560_v30 = vadd.f32 %v1095_v19, %v1031_v17  ;;  %v4572_v13 = vpop.f32.mrf.mxu2 }
 0x1f4   :  { %5410 = vst [vmem:[#allocation23_spill] sm:$0xff] %v4560_v30  ;;  %1292 = vmatmul.f32.gmra.mxu3 %v3120_v35  ;;  %1357 = vmatmul.f32.gmra.mxu0 %v4272_v41 }
 0x1f6   :  { %v4563_v59 = vpop.f32.mrf.mxu1 }
 0x1f7   :  { %v1033_v23 = vpop.f32.mrf.mxu3  ;;  %1487 = vmatmul.f32.gmra.mxu2 %v3121_v55 }
 0x1f8   :  { %v1034_v0 = vadd.f32 %v1033_v23, %v4260_v37 }
 0x1f9   :  { %1422 = vmatmul.f32.gmra.mxu1 %v4265_v46  ;;  %v1101_v19 = vpop.f32.mrf.mxu0 }
 0x1fa   :  { %v4570_v35 = vadd.f32 %v1098_v32, %v1034_v0  ;;  %v3123_v0 = vld [vmem:[%s5360_s1 + $0x112] sm:$0xff] }
 0x1fc   :  { %5411 = vst [vmem:[#allocation24_spill] sm:$0xff] %v4570_v35  ;;  %1295 = vmatmul.f32.gmra.mxu3 %v3121_v55  ;;  %1360 = vmatmul.f32.gmra.mxu0 %v4306_v1  ;;  %v4585_v1 = vpop.f32.mrf.mxu2 }
 0x1fe   :  { %v4575_v17 = vpop.f32.mrf.mxu1 }
 0x1ff   :  { %5412 = vst [vmem:[#allocation28_spill] sm:$0xff] %v4575_v17  ;;  %v1036_v49 = vpop.f32.mrf.mxu3  ;;  %1490 = vmatmul.f32.gmra.mxu2 %v3122_v7 }
 0x200   :  { %v1037_v37 = vadd.f32 %v1036_v49, %v4283_v29 }
 0x201   :  { %1425 = vmatmul.f32.gmra.mxu1 %v4296_v31  ;;  %v1104_v46 = vpop.f32.mrf.mxu0  ;;  %v2092_v31 = vld [vmem:[#allocation9 + $0x70] sm:$0xff] }
 0x202   :  { %v4582_v32 = vadd.f32 %v1101_v19, %v1037_v37  ;;  %2227 = vmatpush.msra.mxu2 %v2092_v31 }
 0x204   :  { %5413 = vst [vmem:[#allocation26_spill] sm:$0xff] %v4582_v32  ;;  %1298 = vmatmul.f32.gmra.mxu3 %v3122_v7  ;;  %1363 = vmatmul.f32.gmra.mxu0 %v4341_v38  ;;  %v4599_v38 = vld [vmem:[%s5360_s1 + $0x120] sm:$0xff] }
 0x205   :  { %v3125_v7 = vld [vmem:[#allocation8] sm:$0x3] }
 0x206   :  { %v4587_v23 = vpop.f32.mrf.mxu1  ;;  %v4602_v37 = vperm.slane %v3125_v7, 1  ;;  %v3128_v32 = vld [vmem:[%s5360_s1 + $0x20] sm:$0xff] }
 0x207   :  { %5414 = vst [vmem:[#allocation27_spill] sm:$0xff] %v4587_v23  ;;  %v1039_v55 = vpop.f32.mrf.mxu3  ;;  %1493 = vmatmul.f32.gmra.mxu2 %v3123_v0  ;;  %v2114_v23 = vld [vmem:[#allocation9 + $0x120] sm:$0xff] }
 0x208   :  { %v1040_v29 = vadd.f32 %v1039_v55, %v4321_v62  ;;  %v4606_v62 = vpop.f32.mrf.mxu2  ;;  %v1128_v7 = vadd.f32 %v4358_v14, %v4602_v37  ;;  %v1131_v14 = vadd.f32 %v4383_v24, %v4602_v37  ;;  %v1134_v24 = vadd.f32 %v4413_v51, %v4602_v37 }
 0x209   :  { %1428 = vmatmul.f32.gmra.mxu1 %v4334_v58  ;;  %v1107_v19 = vpop.f32.mrf.mxu0 }
 0x20a   :  { %v4594_v49 = vadd.f32 %v1104_v46, %v1040_v29  ;;  %v4611_v46 = vld [vmem:[%s5360_s1 + $0x122] sm:$0xff] }
 0x20b   :  { %v4618_v29 = vld [vmem:[%s5360_s1 + $0x121] sm:$0xff] }
 0x20c   :  { %5415 = vst [vmem:[#allocation34_spill] sm:$0xff] %v4594_v49  ;;  %1301 = vmatmul.f32.gmra.mxu3 %v3123_v0  ;;  %1366 = vmatmul.f32.gmra.mxu0 %v4599_v38  ;;  %v2091_v0 = vld [vmem:[#allocation9 + $0x68] sm:$0xff] }
 0x20d   :  { %2228 = vmatpush.msra.mxu2 %v2091_v0 }
 0x20e   :  { %v4604_v15 = vpop.f32.mrf.mxu1 }
 0x20f   :  { %5416 = vst [vmem:[#allocation35_spill] sm:$0xff] %v4604_v15  ;;  %v1042_v58 = vpop.f32.mrf.mxu3  ;;  %1496 = vmatmul.f32.gmra.mxu2 %v4611_v46 }
 0x210   :  { %v1043_v55 = vadd.f32 %v1042_v58, %v4356_v16  ;;  %v1193_v16 = vadd.f32 %v4476_v27, %v1128_v7  ;;  %2229 = vmatpush.msra.mxu2 %v2090_v47  ;;  %v1196_v27 = vadd.f32 %v4505_v21, %v1131_v14  ;;  %v2089_v7 = vld [vmem:[#allocation9 + $0x58] sm:$0xff] }
 0x211   :  { %1431 = vmatmul.f32.gmra.mxu1 %v4618_v29  ;;  %v1322_v31 = vpop.f32.mrf.mxu0  ;;  %v3131_v21 = vld [vmem:[%s5360_s1 + $0x41] sm:$0xff] }
 0x212   :  { %v4623_v49 = vadd.f32 %v1107_v19, %v1043_v55  ;;  %2230 = vmatpush.msra.mxu2 %v2089_v7 }
 0x214   :  { %5417 = vst [vmem:[#allocation36_spill] sm:$0xff] %v4623_v49  ;;  %1516 = vmatmul.f32.vlgmr.msra.gmra.mxu3 %v3128_v32  ;;  %1581 = vmatmul.f32.vlgmr.msra.gmra.mxu0 %v4403_v10  ;;  %v3129_v10 = vld [vmem:[%s5360_s1 + $0x30] sm:$0xff] }
 0x216   :  { %v1387_v58 = vpop.f32.mrf.mxu1 }
 0x217   :  { %v1257_v15 = vpop.f32.mrf.mxu3 }
 0x218   :  { %v1258_v35 = vadd.f32 %v1257_v15, %v1193_v16  ;;  %v4651_v16 = vpop.f32.mrf.mxu2 }
 0x219   :  { %1646 = vmatmul.f32.vlgmr.msra.gmra.mxu1 %v4394_v57  ;;  %v1325_v0 = vpop.f32.mrf.mxu0 }
 0x21a   :  { %v1323_v19 = vadd.f32 %v1322_v31, %v1258_v35 }
 0x21c   :  { %v4633_v55 = vadd.f32 %v1387_v58, %v1323_v19  ;;  %1519 = vmatmul.f32.gmra.mxu3 %v3129_v10  ;;  %1584 = vmatmul.f32.gmra.mxu0 %v4430_v3  ;;  %v3130_v3 = vld [vmem:[%s5360_s1 + $0x40] sm:$0xff] }
 0x21d   :  { %v3132_v19 = vld [vmem:[%s5360_s1 + $0x42] sm:$0xff] }
 0x21e   :  { %v1390_v32 = vpop.f32.mrf.mxu1 }
 0x21f   :  { %v1260_v15 = vpop.f32.mrf.mxu3 }
 0x220   :  { %v1261_v57 = vadd.f32 %v1260_v15, %v1196_v27  ;;  %v1137_v27 = vadd.f32 %v4437_v33, %v4602_v37 }
 0x221   :  { %1649 = vmatmul.f32.gmra.mxu1 %v4421_v22  ;;  %v1328_v47 = vpop.f32.mrf.mxu0  ;;  %v1199_v22 = vadd.f32 %v4522_v2, %v1134_v24  ;;  %v3133_v2 = vld [vmem:[%s5360_s1 + $0x50] sm:$0xff] }
 0x222   :  { %v1326_v35 = vadd.f32 %v1325_v0, %v1261_v57  ;;  %v2088_v0 = vld [vmem:[#allocation9 + $0x50] sm:$0xff]  ;;  %v1202_v7 = vadd.f32 %v4537_v44, %v1137_v27  ;;  %v3136_v44 = vld [vmem:[%s5360_s1 + $0x60] sm:$0xff] }
 0x223   :  { %2231 = vmatpush.msra.mxu2 %v2088_v0  ;;  %v3134_v57 = vld [vmem:[%s5360_s1 + $0x51] sm:$0xff]  ;;  %v3137_v0 = vld [vmem:[%s5360_s1 + $0x61] sm:$0xff] }
 0x224   :  { %v4643_v31 = vadd.f32 %v1390_v32, %v1326_v35  ;;  %1522 = vmatmul.f32.gmra.mxu3 %v3130_v3  ;;  %1587 = vmatmul.f32.gmra.mxu0 %v3131_v21  ;;  %v4668_v35 = vpop.f32.mrf.mxu2  ;;  %v3135_v21 = vld [vmem:[%s5360_s1 + $0x52] sm:$0xff] }
 0x226   :  { %v1393_v58 = vpop.f32.mrf.mxu1 }
 0x227   :  { %v1263_v14 = vpop.f32.mrf.mxu3 }
 0x228   :  { %v1264_v51 = vadd.f32 %v1263_v14, %v1199_v22 }
 0x229   :  { %1652 = vmatmul.f32.gmra.mxu1 %v3132_v19  ;;  %v1331_v10 = vpop.f32.mrf.mxu0 }
 0x22a   :  { %v1329_v32 = vadd.f32 %v1328_v47, %v1264_v51  ;;  %v2087_v47 = vld [vmem:[#allocation9 + $0x48] sm:$0xff] }
 0x22b   :  { %2232 = vmatpush.msra.mxu2 %v2087_v47  ;;  %v3140_v47 = vld [vmem:[%s5360_s1 + $0x71] sm:$0xff] }
 0x22c   :  { %v4659_v15 = vadd.f32 %v1393_v58, %v1329_v32  ;;  %1525 = vmatmul.f32.gmra.mxu3 %v3133_v2  ;;  %1590 = vmatmul.f32.gmra.mxu0 %v3134_v57  ;;  %v1140_v58 = vadd.f32 %v4447_v54, %v4602_v37  ;;  %v2086_v57 = vld [vmem:[#allocation9 + $0x40] sm:$0xff]  ;;  %v4684_v54 = vpop.f32.mrf.mxu2 }
 0x22d   :  { %2233 = vmatpush.msra.mxu2 %v2086_v57 }
 0x22e   :  { %v1396_v24 = vpop.f32.mrf.mxu1  ;;  %v1205_v19 = vadd.f32 %v4557_v9, %v1140_v58  ;;  %v3139_v9 = vld [vmem:[%s5360_s1 + $0x70] sm:$0xff] }
 0x22f   :  { %v1266_v3 = vpop.f32.mrf.mxu3 }
 0x230   :  { %v1267_v33 = vadd.f32 %v1266_v3, %v1202_v7 }
 0x231   :  { %1655 = vmatmul.f32.gmra.mxu1 %v3135_v21  ;;  %v1334_v22 = vpop.f32.mrf.mxu0 }
 0x232   :  { %v1332_v14 = vadd.f32 %v1331_v10, %v1267_v33  ;;  %v3138_v10 = vld [vmem:[%s5360_s1 + $0x62] sm:$0xff] }
 0x234   :  { %v4675_v51 = vadd.f32 %v1396_v24, %v1332_v14  ;;  %1528 = vmatmul.f32.gmra.mxu3 %v3136_v44  ;;  %1593 = vmatmul.f32.gmra.mxu0 %v3137_v0  ;;  %v1143_v24 = vadd.f32 %v4457_v60, %v4602_v37  ;;  %v2085_v0 = vld [vmem:[#allocation9 + $0x38] sm:$0xff]  ;;  %v3141_v60 = vld [vmem:[%s5360_s1 + $0x72] sm:$0xff] }
 0x235   :  { %2234 = vmatpush.msra.mxu2 %v2085_v0 }
 0x236   :  { %v1399_v27 = vpop.f32.mrf.mxu1  ;;  %v1208_v21 = vadd.f32 %v4572_v13, %v1143_v24 }
 0x237   :  { %v1269_v32 = vpop.f32.mrf.mxu3 }
 0x238   :  { %v1270_v2 = vadd.f32 %v1269_v32, %v1205_v19  ;;  %v1146_v19 = vadd.f32 %v4468_v34, %v4602_v37  ;;  %v4705_v32 = vpop.f32.mrf.mxu2  ;;  %v1149_v34 = vadd.f32 %v4488_v36, %v4602_v37 }
 0x239   :  { %1658 = vmatmul.f32.gmra.mxu1 %v3138_v10  ;;  %v1337_v7 = vpop.f32.mrf.mxu0 }
 0x23a   :  { %v1335_v3 = vadd.f32 %v1334_v22, %v1270_v2  ;;  %v1211_v13 = vadd.f32 %v4585_v1, %v1146_v19 }
 0x23c   :  { %v4691_v33 = vadd.f32 %v1399_v27, %v1335_v3  ;;  %1531 = vmatmul.f32.gmra.mxu3 %v3139_v9  ;;  %1596 = vmatmul.f32.gmra.mxu0 %v3140_v47  ;;  %v2084_v3 = vld [vmem:[#allocation9 + $0x30] sm:$0xff] }
 0x23d   :  { %2235 = vmatpush.msra.mxu2 %v2084_v3  ;;  %v2082_v3 = vld [vmem:[#allocation9 + $0x20] sm:$0xff] }
 0x23e   :  { %v1402_v58 = vpop.f32.mrf.mxu1 }
 0x23f   :  { %v1272_v14 = vpop.f32.mrf.mxu3 }
 0x240   :  { %v1273_v44 = vadd.f32 %v1272_v14, %v1208_v21  ;;  %v4723_v1 = vpop.f32.mrf.mxu2  ;;  %v2083_v14 = vld [vmem:[#allocation9 + $0x28] sm:$0xff] }
 0x241   :  { %1661 = vmatmul.f32.gmra.mxu1 %v3141_v60  ;;  %v1340_v22 = vpop.f32.mrf.mxu0  ;;  %2236 = vmatpush.msra.mxu2 %v2083_v14  ;;  %v1152_v60 = vadd.f32 %v4512_v26, %v4602_v37  ;;  %v2106_v14 = vld [vmem:[#allocation9 + $0xe0] sm:$0xff] }
 0x242   :  { %v1338_v27 = vadd.f32 %v1337_v7, %v1273_v44  ;;  %v3144_v44 = vld [vmem:[%s5360_s1 + $0x92] sm:$0xff] }
 0x243   :  { %2237 = vmatpush.msra.mxu2 %v2082_v3  ;;  %v2123_v3 = vld [vmem:[#allocation9 + $0x168] sm:$0xff] }
 0x244   :  { %v4707_v2 = vadd.f32 %v1402_v58, %v1338_v27  ;;  %1534 = vmatmul.f32.gmra.mxu3 %v4485_v18  ;;  %1599 = vmatmul.f32.gmra.mxu0 %v4500_v52  ;;  %v3142_v18 = vld [vmem:[%s5360_s1 + $0x90] sm:$0xff]  ;;  %v3146_v27 = vld [vmem:[%s5360_s1 + $0xc1] sm:$0xff] }
 0x245   :  { %v3143_v52 = vld [vmem:[%s5360_s1 + $0x91] sm:$0xff] }
 0x246   :  { %v1405_v57 = vpop.f32.mrf.mxu1 }
 0x247   :  { %v1275_v10 = vpop.f32.mrf.mxu3 }
 0x248   :  { %v1276_v24 = vadd.f32 %v1275_v10, %v1211_v13  ;;  %v1217_v13 = vadd.f32 %v4651_v16, %v1152_v60  ;;  %v4742_v10 = vpop.f32.mrf.mxu2  ;;  %v2108_v16 = vld [vmem:[#allocation9 + $0xf0] sm:$0xff] }
 0x249   :  { %1664 = vmatmul.f32.gmra.mxu1 %v4493_v45  ;;  %v1343_v9 = vpop.f32.mrf.mxu0  ;;  %v1214_v45 = vadd.f32 %v4606_v62, %v1149_v34  ;;  %v3145_v62 = vld [vmem:[%s5360_s1 + $0xc0] sm:$0xff]  ;;  %5418 = vst [vmem:[#allocation37_spill] sm:$0xff] %v4742_v10 }
 0x24a   :  { %v1341_v7 = vadd.f32 %v1340_v22, %v1276_v24  ;;  %v3147_v34 = vld [vmem:[%s5360_s1 + $0xc2] sm:$0xff] }
 0x24c   :  { %v4715_v47 = vadd.f32 %v1405_v57, %v1341_v7  ;;  %1537 = vmatmul.f32.gmra.mxu3 %v3142_v18  ;;  %1602 = vmatmul.f32.gmra.mxu0 %v3143_v52  ;;  %v3148_v52 = vld [vmem:[%s5360_s1 + $0xd0] sm:$0xff] }
 0x24e   :  { %v1408_v21 = vpop.f32.mrf.mxu1 }
 0x24f   :  { %v1278_v58 = vpop.f32.mrf.mxu3 }
 0x250   :  { %v1279_v36 = vadd.f32 %v1278_v58, %v1214_v45  ;;  %v3149_v45 = vld [vmem:[%s5360_s1 + $0xd1] sm:$0xff]  ;;  %v4761_v60 = vpop.f32.mrf.mxu2 }
 0x251   :  { %1667 = vmatmul.f32.gmra.mxu1 %v3144_v44  ;;  %v1346_v0 = vpop.f32.mrf.mxu0  ;;  %v2081_v44 = vld [vmem:[#allocation9 + $0x18] sm:$0xff]  ;;  %5419 = vst [vmem:[#allocation38_spill] sm:$0xff] %v4761_v60  ;;  %v5382_v60 = vmov 0.0  }
 0x252   :  { %v1344_v22 = vadd.f32 %v1343_v9, %v1279_v36  ;;  %v2109_v9 = vld [vmem:[#allocation9 + $0xf8] sm:$0xff]  ;;  %2238 = vmatpush.msra.mxu2 %v2081_v44  ;;  %1878 = vst [vmem:[#allocation2 + $0x10] sm:$0xff] %v5382_v60 }
 0x253   :  { %2291 = vmatpush.msrb.mxu3 %v2109_v9  ;;  %v2104_v9 = vld [vmem:[#allocation9 + $0xd0] sm:$0xff]  ;;  %v2141_v44 = vld [vmem:[#allocation9 + $0x1f8] sm:$0xff]  ;;  %1879 = vst [vmem:[#allocation2 + $0x18] sm:$0x3] %v5382_v60 }
 0x254   :  { %v4731_v19 = vadd.f32 %v1408_v21, %v1344_v22  ;;  %1540 = vmatmul.f32.gmra.mxu3 %v3145_v62  ;;  %1605 = vmatmul.f32.gmra.mxu0 %v3146_v27  ;;  %v2107_v21 = vld [vmem:[#allocation9 + $0xe8] sm:$0xff]  ;;  %v3150_v22 = vld [vmem:[%s5360_s1 + $0xd2] sm:$0xff]  ;;  %1876 = vst [vmem:[#allocation2] sm:$0xff] %v5382_v60 }
 0x255   :  { %2292 = vmatpush.msrb.mxu3 %v2108_v16  ;;  %v2124_v27 = vld [vmem:[#allocation9 + $0x170] sm:$0xff]  ;;  %v2122_v16 = vld [vmem:[#allocation9 + $0x160] sm:$0xff]  ;;  %2421 = vmatpush.msrb.mxu1 %v2141_v44  ;;  %1877 = vst [vmem:[#allocation2 + $0x8] sm:$0x3] %v5382_v60 }
 0x256   :  { %v4740_v57 = vpop.f32.mrf.mxu1  ;;  %v2118_v44 = vld [vmem:[#allocation9 + $0x140] sm:$0xff]  ;;  %1880 = vst [vmem:[#allocation2 + $0x20] sm:$0xff] %v5382_v60 }
 0x257   :  { %v1281_v26 = vpop.f32.mrf.mxu3  ;;  %2293 = vmatpush.msrb.mxu3 %v2107_v21  ;;  %v2080_v21 = vld [vmem:[#allocation9 + $0x10] sm:$0xff]  ;;  %1881 = vst [vmem:[#allocation2 + $0x28] sm:$0x3] %v5382_v60 }
 0x258   :  { %v1282_v24 = vadd.f32 %v1281_v26, %v1217_v13  ;;  %v2105_v13 = vld [vmem:[#allocation9 + $0xd8] sm:$0xff]  ;;  %2239 = vmatpush.msra.mxu2 %v2080_v21  ;;  %1882 = vst [vmem:[#allocation2 + $0x30] sm:$0xff] %v5382_v60 }
 0x259   :  { %1670 = vmatmul.f32.gmra.mxu1 %v3147_v34  ;;  %v4747_v7 = vpop.f32.mrf.mxu0  ;;  %2294 = vmatpush.msrb.mxu3 %v2106_v14  ;;  %v3151_v26 = vld [vmem:[%s5360_s1 + $0xe0] sm:$0xff]  ;;  %1883 = vst [vmem:[#allocation2 + $0x38] sm:$0x3] %v5382_v60 }
 0x25a   :  { %v4749_v18 = vadd.f32 %v1346_v0, %v1282_v24  ;;  %v2125_v0 = vld [vmem:[#allocation9 + $0x178] sm:$0xff]  ;;  %1884 = vst [vmem:[#allocation2 + $0x40] sm:$0xff] %v5382_v60 }
 0x25b   :  { %2356 = vmatpush.msrb.mxu0 %v2125_v0  ;;  %v3152_v24 = vld [vmem:[%s5360_s1 + $0xe1] sm:$0xff]  ;;  %2295 = vmatpush.msrb.mxu3 %v2105_v13  ;;  %v2140_v13 = vld [vmem:[#allocation9 + $0x1f0] sm:$0xff]  ;;  %1885 = vst [vmem:[#allocation2 + $0x48] sm:$0x3] %v5382_v60 }
 0x25c   :  { %1543 = vmatmul.f32.gmra.mxu3 %v3148_v52  ;;  %1608 = vmatmul.f32.gmra.mxu0 %v3149_v45  ;;  %v2103_v45 = vld [vmem:[#allocation9 + $0xc8] sm:$0xff]  ;;  %v2121_v14 = vld [vmem:[#allocation9 + $0x158] sm:$0xff]  ;;  %v3153_v0 = vld [vmem:[%s5360_s1 + $0xe2] sm:$0xff]  ;;  %1886 = vst [vmem:[#allocation2 + $0x50] sm:$0xff] %v5382_v60 }
 0x25d   :  { %2357 = vmatpush.msrb.mxu0 %v2124_v27  ;;  %2296 = vmatpush.msrb.mxu3 %v2104_v9  ;;  %v2120_v27 = vld [vmem:[#allocation9 + $0x150] sm:$0xff]  ;;  %v2119_v9 = vld [vmem:[#allocation9 + $0x148] sm:$0xff]  ;;  %1887 = vst [vmem:[#allocation2 + $0x58] sm:$0x3] %v5382_v60 }
 0x25e   :  { %v4757_v58 = vpop.f32.mrf.mxu1  ;;  %2422 = vmatpush.msrb.mxu1 %v2140_v13  ;;  %1888 = vst [vmem:[#allocation2 + $0x60] sm:$0xff] %v5382_v60 }
 0x25f   :  { %v4759_v36 = vpop.f32.mrf.mxu3  ;;  %2358 = vmatpush.msrb.mxu0 %v2123_v3  ;;  %2297 = vmatpush.msrb.mxu3 %v2103_v45  ;;  %v3154_v3 = vld [vmem:[%s5360_s1 + $0xf1] sm:$0xff]  ;;  %v2138_v45 = vld [vmem:[#allocation9 + $0x1e0] sm:$0xff]  ;;  %1889 = vst [vmem:[#allocation2 + $0x68] sm:$0x3] %v5382_v60 }
 0x260   :  { %1890 = vst [vmem:[#allocation2 + $0x70] sm:$0xff] %v5382_v60 }
 0x261   :  { %1673 = vmatmul.f32.gmra.mxu1 %v3150_v22  ;;  %v4766_v62 = vpop.f32.mrf.mxu0  ;;  %2359 = vmatpush.msrb.mxu0 %v2122_v16  ;;  %v2101_v16 = vld [vmem:[#allocation9 + $0xb8] sm:$0xff]  ;;  %1891 = vst [vmem:[#allocation2 + $0x78] sm:$0x3] %v5382_v60 }
 0x262   :  { %1892 = vst [vmem:[#allocation2 + $0x80] sm:$0xff] %v5382_v60 }
 0x263   :  { %2360 = vmatpush.msrb.mxu0 %v2121_v14  ;;  %v2100_v14 = vld [vmem:[#allocation9 + $0xb0] sm:$0xff]  ;;  %1893 = vst [vmem:[#allocation2 + $0x88] sm:$0x3] %v5382_v60 }
 0x264   :  { %1546 = vmatmul.f32.gmra.mxu3 %v3151_v26  ;;  %1611 = vmatmul.f32.gmra.mxu0 %v3152_v24  ;;  %v4783_v26 = vpop.f32.mrf.mxu2  ;;  %v2102_v24 = vld [vmem:[#allocation9 + $0xc0] sm:$0xff]  ;;  %1894 = vst [vmem:[#allocation2 + $0x90] sm:$0xff] %v5382_v60 }
 0x265   :  { %5420 = vst [vmem:[#allocation39_spill] sm:$0xff] %v4783_v26  ;;  %2361 = vmatpush.msrb.mxu0 %v2120_v27  ;;  %2298 = vmatpush.msrb.mxu3 %v2102_v24  ;;  %v2117_v26 = vld [vmem:[#allocation9 + $0x138] sm:$0xff]  ;;  %v3155_v27 = vld [vmem:[%s5360_s1 + $0xf2] sm:$0xff] }
 0x266   :  { %v4774_v34 = vpop.f32.mrf.mxu1  ;;  %v2137_v24 = vld [vmem:[#allocation9 + $0x1d8] sm:$0xff]  ;;  %1895 = vst [vmem:[#allocation2 + $0x98] sm:$0x3] %v5382_v60 }
 0x267   :  { %v4776_v52 = vpop.f32.mrf.mxu3  ;;  %2362 = vmatpush.msrb.mxu0 %v2119_v9  ;;  %2299 = vmatpush.msrb.mxu3 %v2101_v16  ;;  %v2116_v9 = vld [vmem:[#allocation9 + $0x130] sm:$0xff]  ;;  %v3157_v16 = vld [vmem:[%s5360_s1 + $0x101] sm:$0xff]  ;;  %1896 = vst [vmem:[#allocation2 + $0xa0] sm:$0xff] %v5382_v60 }
 0x268   :  { %1897 = vst [vmem:[#allocation2 + $0xa8] sm:$0x3] %v5382_v60 }
 0x269   :  { %1676 = vmatmul.f32.gmra.mxu1 %v3153_v0  ;;  %v4781_v22 = vpop.f32.mrf.mxu0  ;;  %v2139_v0 = vld [vmem:[#allocation9 + $0x1e8] sm:$0xff]  ;;  %2363 = vmatpush.msrb.mxu0 %v2118_v44  ;;  %v2136_v44 = vld [vmem:[#allocation9 + $0x1d0] sm:$0xff]  ;;  %1898 = vst [vmem:[#allocation2 + $0xb0] sm:$0xff] %v5382_v60 }
 0x26a   :  { %2423 = vmatpush.msrb.mxu1 %v2139_v0  ;;  %2300 = vmatpush.msrb.mxu3 %v2100_v14  ;;  %v3156_v0 = vld [vmem:[%s5360_s1 + $0x100] sm:$0xff]  ;;  %1899 = vst [vmem:[#allocation2 + $0xb8] sm:$0x3] %v5382_v60 }
 0x26b   :  { %2364 = vmatpush.msrb.mxu0 %v2117_v26  ;;  %v2115_v26 = vld [vmem:[#allocation9 + $0x128] sm:$0xff]  ;;  %1900 = vst [vmem:[#allocation2 + $0xc0] sm:$0xff] %v5382_v60 }
 0x26c   :  { %1549 = vmatmul.f32.gmra.mxu3 %v4272_v41  ;;  %1614 = vmatmul.f32.gmra.mxu0 %v3154_v3  ;;  %v2079_v41 = vld [vmem:[#allocation9 + $0x8] sm:$0xff]  ;;  %1901 = vst [vmem:[#allocation2 + $0xc8] sm:$0x3] %v5382_v60 }
 0x26d   :  { %2424 = vmatpush.msrb.mxu1 %v2138_v45  ;;  %2240 = vmatpush.msra.mxu2 %v2079_v41  ;;  %v2099_v3 = vld [vmem:[#allocation9 + $0xa8] sm:$0xff]  ;;  %v2098_v45 = vld [vmem:[#allocation9 + $0xa0] sm:$0xff]  ;;  %v4809_v41 = vpop.f32.mrf.mxu2  ;;  %1902 = vst [vmem:[#allocation2 + $0xd0] sm:$0xff] %v5382_v60 }
 0x26e   :  { %v4789_v21 = vpop.f32.mrf.mxu1  ;;  %2301 = vmatpush.msrb.mxu3 %v2099_v3  ;;  %2365 = vmatpush.msrb.mxu0 %v2116_v9  ;;  %v2096_v3 = vld [vmem:[#allocation9 + $0x90] sm:$0xff]  ;;  %v3158_v9 = vld [vmem:[%s5360_s1 + $0x102] sm:$0xff]  ;;  %1903 = vst [vmem:[#allocation2 + $0xd8] sm:$0x3] %v5382_v60 }
 0x26f   :  { %v4791_v49 = vpop.f32.mrf.mxu3  ;;  %2425 = vmatpush.msrb.mxu1 %v2137_v24  ;;  %v2078_v24 = vld [vmem:[#allocation9] sm:$0xff]  ;;  %1904 = vst [vmem:[#allocation2 + $0xe0] sm:$0xff] %v5382_v60 }
 0x270   :  { %2302 = vmatpush.msrb.mxu3 %v2098_v45  ;;  %2366 = vmatpush.msrb.mxu0 %v2115_v26  ;;  %v2113_v45 = vld [vmem:[#allocation9 + $0x118] sm:$0xff]  ;;  %v2095_v26 = vld [vmem:[#allocation9 + $0x88] sm:$0xff]  ;;  %1905 = vst [vmem:[#allocation2 + $0xe8] sm:$0x3] %v5382_v60 }
 0x271   :  { %1679 = vmatmul.f32.gmra.mxu1 %v3155_v27  ;;  %v4797_v13 = vpop.f32.mrf.mxu0  ;;  %v2097_v27 = vld [vmem:[#allocation9 + $0x98] sm:$0xff]  ;;  %2241 = vmatpush.msra.mxu2 %v2078_v24  ;;  %v2094_v24 = vld [vmem:[#allocation9 + $0x80] sm:$0xff]  ;;  %1906 = vst [vmem:[#allocation2 + $0xf0] sm:$0xff] %v5382_v60 }
 0x272   :  { %5421 = vst [vmem:[#allocation40_spill] sm:$0xff] %v4797_v13  ;;  %2426 = vmatpush.msrb.mxu1 %v2136_v44  ;;  %2303 = vmatpush.msrb.mxu3 %v2097_v27  ;;  %v2134_v44 = vld [vmem:[#allocation9 + $0x1c0] sm:$0xff]  ;;  %v3160_v27 = vld [vmem:[%s5360_s1 + $0x111] sm:$0xff] }
 0x273   :  { %2367 = vmatpush.msrb.mxu0 %v2114_v23  ;;  %v2133_v23 = vld [vmem:[#allocation9 + $0x1b8] sm:$0xff]  ;;  %2242 = vmatmul.f32.vlgmr.msra.gmra.mxu2 %v5382_v60  ;;  %1907 = vst [vmem:[#allocation2 + $0xf8] sm:$0x3] %v5382_v60 }
 0x274   :  { %1552 = vmatmul.f32.gmra.mxu3 %v3156_v0  ;;  %1617 = vmatmul.f32.gmra.mxu0 %v3157_v16  ;;  %v2135_v16 = vld [vmem:[#allocation9 + $0x1c8] sm:$0xff]  ;;  %1908 = vst [vmem:[#allocation2 + $0x100] sm:$0xff] %v5382_v60 }
 0x275   :  { %2427 = vmatpush.msrb.mxu1 %v2135_v16  ;;  %2304 = vmatpush.msrb.mxu3 %v2096_v3  ;;  %v2112_v16 = vld [vmem:[#allocation9 + $0x110] sm:$0xff]  ;;  %1909 = vst [vmem:[#allocation2 + $0x108] sm:$0x3] %v5382_v60 }
 0x276   :  { %v4812_v14 = vpop.f32.mrf.mxu1  ;;  %2368 = vmatpush.msrb.mxu0 %v2113_v45  ;;  %v2110_v45 = vld [vmem:[#allocation9 + $0x100] sm:$0xff]  ;;  %1910 = vst [vmem:[#allocation2 + $0x110] sm:$0xff] %v5382_v60 }
 0x277   :  { %5422 = vst [vmem:[#allocation41_spill] sm:$0xff] %v4812_v14  ;;  %v4815_v0 = vpop.f32.mrf.mxu3  ;;  %2428 = vmatpush.msrb.mxu1 %v2134_v44  ;;  %2305 = vmatpush.msrb.mxu3 %v2095_v26  ;;  %v2132_v44 = vld [vmem:[#allocation9 + $0x1b0] sm:$0xff] }
 0x278   :  { %2369 = vmatpush.msrb.mxu0 %v2112_v16  ;;  %v3161_v26 = vld [vmem:[%s5360_s1 + $0x112] sm:$0xff]  ;;  %v2130_v16 = vld [vmem:[#allocation9 + $0x1a0] sm:$0xff]  ;;  %1911 = vst [vmem:[#allocation2 + $0x118] sm:$0x3] %v5382_v60 }
 0x279   :  { %1682 = vmatmul.f32.gmra.mxu1 %v3158_v9  ;;  %v4822_v30 = vpop.f32.mrf.mxu0  ;;  %v3159_v9 = vld [vmem:[%s5360_s1 + $0x110] sm:$0xff]  ;;  %2306 = vmatpush.msrb.mxu3 %v2094_v24  ;;  %1912 = vst [vmem:[#allocation2 + $0x120] sm:$0xff] %v5382_v60 }
 0x27a   :  { %5423 = vst [vmem:[#allocation42_spill] sm:$0xff] %v4822_v30  ;;  %v4839_v30 = vpop.f32.mrf.mxu2  ;;  %2429 = vmatpush.msrb.mxu1 %v2133_v23  ;;  %v2131_v23 = vld [vmem:[#allocation9 + $0x1a8] sm:$0xff] }
 0x27b   :  { %1913 = vst [vmem:[#allocation2 + $0x128] sm:$0x3] %v5382_v60 }
 0x27c   :  { %1555 = vmatmul.f32.gmra.mxu3 %v3159_v9  ;;  %1620 = vmatmul.f32.gmra.mxu0 %v3160_v27  ;;  %v2111_v9 = vld [vmem:[#allocation9 + $0x108] sm:$0xff]  ;;  %1914 = vst [vmem:[#allocation2 + $0x130] sm:$0xff] %v5382_v60 }
 0x27d   :  { %2370 = vmatpush.msrb.mxu0 %v2111_v9  ;;  %2430 = vmatpush.msrb.mxu1 %v2132_v44  ;;  %v2156_v44 = vld [vmem:[#allocation9 + $0x270] sm:$0xff]  ;;  %1915 = vst [vmem:[#allocation2 + $0x138] sm:$0x3] %v5382_v60  ;;  %v5433_v60 = vld [vmem:[#allocation17_spill] sm:$0xff] }
 0x27e   :  { %v4835_v3 = vpop.f32.mrf.mxu1  ;;  %v1829_v17 = vmul.f32 %v4416_v28, %v5433_v60 }
 0x27f   :  { %5424 = vst [vmem:[#allocation43_spill] sm:$0xff] %v4835_v3  ;;  %v4841_v27 = vpop.f32.mrf.mxu3  ;;  %v2157_v3 = vld [vmem:[#allocation9 + $0x278] sm:$0xff]  ;;  %2371 = vmatpush.msrb.mxu0 %v2110_v45  ;;  %2431 = vmatpush.msrb.mxu1 %v2131_v23  ;;  %v2128_v45 = vld [vmem:[#allocation9 + $0x190] sm:$0xff]  ;;  %v2127_v23 = vld [vmem:[#allocation9 + $0x188] sm:$0xff] }
 0x280   :  { %5425 = vst [vmem:[#allocation44_spill] sm:$0xff] %v4841_v27  ;;  %2486 = vmatpush.msrb.mxu2 %v2157_v3  ;;  %v2129_v3 = vld [vmem:[#allocation9 + $0x198] sm:$0xff]  ;;  %v2154_v27 = vld [vmem:[#allocation9 + $0x260] sm:$0xff] }
 0x281   :  { %1685 = vmatmul.f32.gmra.mxu1 %v3161_v26  ;;  %v4848_v14 = vpop.f32.mrf.mxu0  ;;  %v3162_v26 = vld [vmem:[%s5360_s1 + $0x130] sm:$0xff] }
 0x282   :  { %5426 = vst [vmem:[#allocation45_spill] sm:$0xff] %v4848_v14  ;;  %2432 = vmatpush.msrb.mxu1 %v2130_v16  ;;  %2487 = vmatpush.msrb.mxu2 %v2156_v44  ;;  %v2126_v44 = vld [vmem:[#allocation9 + $0x180] sm:$0xff] }
 0x284   :  { %1558 = vmatmul.f32.gmra.mxu3 %v4599_v38  ;;  %1623 = vmatmul.f32.gmra.mxu0 %v4618_v29  ;;  %v4864_v38 = vpop.f32.mrf.mxu2 }
 0x285   :  { %2433 = vmatpush.msrb.mxu1 %v2129_v3 }
 0x286   :  { %v4857_v24 = vpop.f32.mrf.mxu1 }
 0x287   :  { %5427 = vst [vmem:[#allocation46_spill] sm:$0xff] %v4857_v24  ;;  %v4860_v9 = vpop.f32.mrf.mxu3  ;;  %2434 = vmatpush.msrb.mxu1 %v2128_v45  ;;  %v1949_v45 = vld [vmem:[#allocation2 + $0x1] sm:$0xff] }
 0x288   :  { %5428 = vst [vmem:[#allocation47_spill] sm:$0xff] %v4860_v9 }
 0x289   :  { %1688 = vmatmul.f32.gmra.mxu1 %v4611_v46  ;;  %v4867_v29 = vpop.f32.mrf.mxu0  ;;  %v3163_v46 = vld [vmem:[%s5360_s1 + $0x131] sm:$0xff] }
 0x28a   :  { %5429 = vst [vmem:[#allocation48_spill] sm:$0xff] %v4867_v29  ;;  %2435 = vmatpush.msrb.mxu1 %v2127_v23  ;;  %v2155_v29 = vld [vmem:[#allocation9 + $0x268] sm:$0xff]  ;;  %v1453_v23 = vadd.f32 %v4809_v41, %v4633_v55  ;;  %v1456_v55 = vadd.f32 %v4839_v30, %v4643_v31  ;;  %v1459_v30 = vadd.f32 %v4864_v38, %v4659_v15 }
 0x28b   :  { %2488 = vmatpush.msrb.mxu2 %v2155_v29 }
 0x28c   :  { %1561 = vmatmul.f32.gmra.mxu3 %v3162_v26  ;;  %1626 = vmatmul.f32.gmra.mxu0 %v3163_v46  ;;  %v3164_v26 = vld [vmem:[%s5360_s1 + $0x132] sm:$0xff] }
 0x28d   :  { %2436 = vmatpush.msrb.mxu1 %v2126_v44  ;;  %v5432_v44 = vld [vmem:[#allocation16_spill] sm:$0xff]  ;;  %2489 = vmatpush.msrb.mxu2 %v2154_v27  ;;  %v2153_v27 = vld [vmem:[#allocation9 + $0x258] sm:$0xff] }
 0x28e   :  { %v4880_v16 = vpop.f32.mrf.mxu1  ;;  %v1828_v29 = vmul.f32 %v4416_v28, %v5432_v44 }
 0x28f   :  { %5430 = vst [vmem:[#allocation49_spill] sm:$0xff] %v4880_v16  ;;  %v4883_v3 = vpop.f32.mrf.mxu3  ;;  %v1965_v16 = vld [vmem:[#allocation2 + $0x2] sm:$0xff]  ;;  %2490 = vmatpush.msrb.mxu2 %v2153_v27  ;;  %v5434_v27 = vld [vmem:[#allocation18_spill] sm:$0xff] }
 0x290   :  { %5431 = vst [vmem:[#allocation50_spill] sm:$0xff] %v4883_v3  ;;  %v1461_v3 = vpop.f32.mrf.mxu2 }
 0x291   :  { %1691 = vmatmul.f32.gmra.mxu1 %v3164_v26  ;;  %v1582_v46 = vpop.f32.mrf.mxu0 }
 0x294   :  { %2307 = vmatmul.f32.vlgmr.msrb.gmra.mxu3 %v1949_v45  ;;  %2372 = vmatmul.f32.vlgmr.msrb.gmra.mxu0 %v1965_v16  ;;  %v1844_v16 = vmul.f32 %v1828_v29, %v4374_v43 }
 0x296   :  { %v1647_v26 = vpop.f32.mrf.mxu1 }
 0x297   :  { %v1517_v24 = vpop.f32.mrf.mxu3 }
 0x298   :  { %v1518_v14 = vadd.f32 %v1517_v24, %v1453_v23  ;;  %v1464_v39 = vpop.f32.mrf.mxu2 }
 0x299   :  { %v1585_v9 = vpop.f32.mrf.mxu0 }
 0x29a   :  { %v1583_v10 = vadd.f32 %v1582_v46, %v1518_v14 }
 0x29c   :  { %v1648_v45 = vadd.f32 %v1647_v26, %v1583_v10  ;;  %v1845_v10 = vmul.f32 %v1829_v17, %v4406_v20 }
 0x29e   :  { %v4904_v41 = vadd.f32 %v1844_v16, %v1648_v45  ;;  %v1650_v56 = vpop.f32.mrf.mxu1 }
 0x29f   :  { %v1520_v13 = vpop.f32.mrf.mxu3 }
 0x2a0   :  { %1917 = vst [vmem:[#allocation2 + $0x11] sm:$0xff] %v4904_v41  ;;  %v1521_v24 = vadd.f32 %v1520_v13, %v1456_v55  ;;  %2310 = vmatmul.f32.gmra.mxu3 %v4904_v41  ;;  %v1467_v26 = vpop.f32.mrf.mxu2 }
 0x2a1   :  { %v1588_v14 = vpop.f32.mrf.mxu0 }
 0x2a2   :  { %v1586_v43 = vadd.f32 %v1585_v9, %v1521_v24  ;;  %v1462_v9 = vadd.f32 %v1461_v3, %v4675_v51  ;;  %v2151_v3 = vld [vmem:[#allocation9 + $0x248] sm:$0xff] }
 0x2a4   :  { %v1651_v46 = vadd.f32 %v1650_v56, %v1586_v43  ;;  %v2152_v56 = vld [vmem:[#allocation9 + $0x250] sm:$0xff]  ;;  %v1831_v43 = vmul.f32 %v4416_v28, %v5434_v27 }
 0x2a5   :  { %2491 = vmatpush.msrb.mxu2 %v2152_v56 }
 0x2a6   :  { %v4913_v31 = vadd.f32 %v1845_v10, %v1651_v46  ;;  %v1653_v23 = vpop.f32.mrf.mxu1  ;;  %v1847_v46 = vmul.f32 %v1831_v43, %v4444_v12  ;;  %v2150_v12 = vld [vmem:[#allocation9 + $0x240] sm:$0xff]  ;;  %v1468_v43 = vadd.f32 %v1467_v26, %v4707_v2  ;;  %v2149_v2 = vld [vmem:[#allocation9 + $0x238] sm:$0xff] }
 0x2a7   :  { %v1523_v60 = vpop.f32.mrf.mxu3  ;;  %v1934_v44 = vld [vmem:[#allocation2 + $0x10] sm:$0xff]  ;;  %2492 = vmatpush.msrb.mxu2 %v2151_v3 }
 0x2a8   :  { %v4915_v29 = vld [vmem:[#allocation2 + $0x12] sm:$0xff]  ;;  %1918 = vst [vmem:[#allocation2 + $0x21] sm:$0xff] %v4913_v31  ;;  %v1524_v13 = vadd.f32 %v1523_v60, %v1459_v30  ;;  %2245 = vmatmul.f32.gmra.mxu2 %v1934_v44  ;;  %2437 = vmatmul.f32.vlgmr.msrb.gmra.mxu1 %v1934_v44  ;;  %v1470_v51 = vpop.f32.mrf.mxu2 }
 0x2a9   :  { %2375 = vmatmul.f32.gmra.mxu0 %v4915_v29  ;;  %2313 = vmatmul.f32.gmra.mxu3 %v4913_v31  ;;  %v1591_v20 = vpop.f32.mrf.mxu0 }
 0x2aa   :  { %v1589_v17 = vadd.f32 %v1588_v14, %v1524_v13  ;;  %2493 = vmatpush.msrb.mxu2 %v2150_v12 }
 0x2ac   :  { %v1654_v15 = vadd.f32 %v1653_v23, %v1589_v17  ;;  %v1465_v23 = vadd.f32 %v1464_v39, %v4691_v33  ;;  %2494 = vmatpush.msrb.mxu2 %v2149_v2 }
 0x2ae   :  { %v4922_v38 = vadd.f32 %v4433_v53, %v1654_v15  ;;  %v1656_v16 = vpop.f32.mrf.mxu1  ;;  %v5435_v15 = vld [vmem:[#allocation19_spill] sm:$0xff] }
 0x2af   :  { %v1526_v45 = vpop.f32.mrf.mxu3  ;;  %v4924_v55 = vld [vmem:[#allocation2 + $0x20] sm:$0xff] }
 0x2b0   :  { %v4926_v24 = vld [vmem:[#allocation2 + $0x22] sm:$0xff]  ;;  %1919 = vst [vmem:[#allocation2 + $0x31] sm:$0xff] %v4922_v38  ;;  %v1527_v10 = vadd.f32 %v1526_v45, %v1462_v9  ;;  %2248 = vmatmul.f32.gmra.mxu2 %v4924_v55  ;;  %2440 = vmatmul.f32.gmra.mxu1 %v4924_v55  ;;  %v1832_v9 = vmul.f32 %v4416_v28, %v5435_v15 }
 0x2b1   :  { %2378 = vmatmul.f32.gmra.mxu0 %v4926_v24  ;;  %2316 = vmatmul.f32.gmra.mxu3 %v4922_v38  ;;  %v1594_v53 = vpop.f32.mrf.mxu0 }
 0x2b2   :  { %v1592_v14 = vadd.f32 %v1591_v20, %v1527_v10  ;;  %v1848_v45 = vmul.f32 %v1832_v9, %v4454_v61 }
 0x2b4   :  { %v1657_v30 = vadd.f32 %v1656_v16, %v1592_v14  ;;  %v1473_v16 = vpop.f32.mrf.mxu2 }
 0x2b5   :  { %v1474_v2 = vadd.f32 %v1473_v16, %v4731_v19  ;;  %v2147_v16 = vld [vmem:[#allocation9 + $0x228] sm:$0xff] }
 0x2b6   :  { %v4937_v60 = vadd.f32 %v1847_v46, %v1657_v30  ;;  %v1659_v44 = vpop.f32.mrf.mxu1 }
 0x2b7   :  { %v1529_v13 = vpop.f32.mrf.mxu3  ;;  %v4939_v56 = vld [vmem:[#allocation2 + $0x30] sm:$0xff] }
 0x2b8   :  { %v4941_v17 = vld [vmem:[#allocation2 + $0x32] sm:$0xff]  ;;  %1920 = vst [vmem:[#allocation2 + $0x41] sm:$0xff] %v4937_v60  ;;  %v1530_v20 = vadd.f32 %v1529_v13, %v1465_v23  ;;  %2251 = vmatmul.f32.gmra.mxu2 %v4939_v56  ;;  %2443 = vmatmul.f32.gmra.mxu1 %v4939_v56  ;;  %v5436_v23 = vld [vmem:[#allocation20_spill] sm:$0xff] }
 0x2b9   :  { %2381 = vmatmul.f32.gmra.mxu0 %v4941_v17  ;;  %2319 = vmatmul.f32.gmra.mxu3 %v4937_v60  ;;  %v1597_v39 = vpop.f32.mrf.mxu0  ;;  %v1833_v13 = vmul.f32 %v4416_v28, %v5436_v23 }
 0x2ba   :  { %v1595_v33 = vadd.f32 %v1594_v53, %v1530_v20  ;;  %v1471_v20 = vadd.f32 %v1470_v51, %v4715_v47  ;;  %v2148_v47 = vld [vmem:[#allocation9 + $0x230] sm:$0xff] }
 0x2bb   :  { %2495 = vmatpush.msrb.mxu2 %v2148_v47 }
 0x2bc   :  { %v1660_v27 = vadd.f32 %v1659_v44, %v1595_v33  ;;  %v1849_v44 = vmul.f32 %v1833_v13, %v4464_v40  ;;  %v1476_v9 = vpop.f32.mrf.mxu2  ;;  %v1155_v13 = vadd.f32 %v4524_v8, %v4602_v37 }
 0x2bd   :  { %2496 = vmatpush.msrb.mxu2 %v2147_v16 }
 0x2be   :  { %v4952_v10 = vadd.f32 %v1848_v45, %v1660_v27  ;;  %v1662_v3 = vpop.f32.mrf.mxu1 }
 0x2bf   :  { %v1532_v14 = vpop.f32.mrf.mxu3  ;;  %v4954_v46 = vld [vmem:[#allocation2 + $0x40] sm:$0xff] }
 0x2c0   :  { %v4956_v30 = vld [vmem:[#allocation2 + $0x42] sm:$0xff]  ;;  %1921 = vst [vmem:[#allocation2 + $0x51] sm:$0xff] %v4952_v10  ;;  %v1533_v53 = vadd.f32 %v1532_v14, %v1468_v43  ;;  %2254 = vmatmul.f32.gmra.mxu2 %v4954_v46  ;;  %2446 = vmatmul.f32.gmra.mxu1 %v4954_v46  ;;  %v5438_v14 = vld [vmem:[#allocation21_spill] sm:$0xff] }
 0x2c1   :  { %2384 = vmatmul.f32.gmra.mxu0 %v4956_v30  ;;  %2322 = vmatmul.f32.gmra.mxu3 %v4952_v10  ;;  %v1600_v61 = vpop.f32.mrf.mxu0  ;;  %v1834_v23 = vmul.f32 %v4416_v28, %v5438_v14 }
 0x2c2   :  { %v1598_v26 = vadd.f32 %v1597_v39, %v1533_v53 }
 0x2c4   :  { %v1663_v15 = vadd.f32 %v1662_v3, %v1598_v26  ;;  %v1850_v3 = vmul.f32 %v1834_v23, %v4479_v42  ;;  %v1220_v42 = vadd.f32 %v4668_v35, %v1155_v13  ;;  %v1158_v23 = vadd.f32 %v4535_v6, %v4602_v37 }
 0x2c6   :  { %v4967_v12 = vadd.f32 %v1849_v44, %v1663_v15  ;;  %v1665_v33 = vpop.f32.mrf.mxu1  ;;  %v1479_v15 = vpop.f32.mrf.mxu2 }
 0x2c7   :  { %v1535_v45 = vpop.f32.mrf.mxu3  ;;  %v4969_v27 = vld [vmem:[#allocation2 + $0x50] sm:$0xff] }
 0x2c8   :  { %5437 = vst [vmem:[#allocation16_spill] sm:$0xff] %v4967_v12  ;;  %v4971_v43 = vld [vmem:[#allocation2 + $0x52] sm:$0xff]  ;;  %v1536_v39 = vadd.f32 %v1535_v45, %v1471_v20  ;;  %2257 = vmatmul.f32.gmra.mxu2 %v4969_v27  ;;  %2449 = vmatmul.f32.gmra.mxu1 %v4969_v27 }
 0x2c9   :  { %1922 = vst [vmem:[#allocation2 + $0x61] sm:$0xff] %v4967_v12  ;;  %2387 = vmatmul.f32.gmra.mxu0 %v4971_v43  ;;  %2325 = vmatmul.f32.gmra.mxu3 %v4967_v12  ;;  %v1603_v40 = vpop.f32.mrf.mxu0  ;;  %v5439_v12 = vld [vmem:[#allocation22_spill] sm:$0xff] }
 0x2ca   :  { %v1601_v51 = vadd.f32 %v1600_v61, %v1536_v39  ;;  %v1835_v61 = vmul.f32 %v4416_v28, %v5439_v12  ;;  %v1285_v28 = vadd.f32 %v4759_v36, %v1220_v42 }
 0x2cc   :  { %v1666_v53 = vadd.f32 %v1665_v33, %v1601_v51  ;;  %v1412_v33 = vadd.f32 %v4740_v57, %v4749_v18  ;;  %v1851_v35 = vmul.f32 %v1835_v61, %v4503_v4  ;;  %v1350_v51 = vadd.f32 %v4747_v7, %v1285_v28  ;;  %v2171_v28 = vld [vmem:[#allocation9 + $0x2e8] sm:$0xff] }
 0x2cd   :  { %v1836_v18 = vmul.f32 %v4539_v63, %v4287_v48  ;;  %v1223_v4 = vadd.f32 %v4684_v54, %v1158_v23  ;;  %v2172_v54 = vld [vmem:[#allocation9 + $0x2f0] sm:$0xff] }
 0x2ce   :  { %v4984_v26 = vadd.f32 %v1850_v3, %v1666_v53  ;;  %v1668_v44 = vpop.f32.mrf.mxu1  ;;  %v1477_v47 = vadd.f32 %v1476_v9, %v1412_v33  ;;  %v1957_v53 = vld [vmem:[#allocation2 + $0xa1] sm:$0xff]  ;;  %v1482_v7 = vpop.f32.mrf.mxu2 }
 0x2cf   :  { %v1538_v20 = vpop.f32.mrf.mxu3  ;;  %v2146_v9 = vld [vmem:[#allocation9 + $0x220] sm:$0xff]  ;;  %v1288_v48 = vadd.f32 %v4776_v52, %v1223_v4  ;;  %v1852_v42 = vmul.f32 %v1836_v18, %v4519_v5  ;;  %v1837_v5 = vmul.f32 %v4539_v63, %v4291_v11  ;;  %v2188_v4 = vld [vmem:[#allocation9 + $0x370] sm:$0xff] }
 0x2d0   :  { %v4986_v45 = vld [vmem:[#allocation2 + $0x60] sm:$0xff]  ;;  %1923 = vst [vmem:[#allocation2 + $0x71] sm:$0xff] %v4984_v26  ;;  %v1539_v8 = vadd.f32 %v1538_v20, %v1474_v2  ;;  %2497 = vmatpush.msrb.mxu2 %v2146_v9  ;;  %v1164_v9 = vadd.f32 %v4563_v59, %v4602_v37 }
 0x2d1   :  { %v4988_v14 = vld [vmem:[#allocation2 + $0x62] sm:$0xff]  ;;  %2260 = vmatmul.f32.gmra.mxu2 %v4986_v45  ;;  %2452 = vmatmul.f32.gmra.mxu1 %v4986_v45  ;;  %v1606_v19 = vpop.f32.mrf.mxu0 }
 0x2d2   :  { %2390 = vmatmul.f32.gmra.mxu0 %v4988_v14  ;;  %2328 = vmatmul.f32.gmra.mxu3 %v4984_v26  ;;  %v1604_v12 = vadd.f32 %v1603_v40, %v1539_v8  ;;  %v2173_v40 = vld [vmem:[#allocation9 + $0x2f8] sm:$0xff]  ;;  %v1161_v8 = vadd.f32 %v4551_v50, %v4602_v37  ;;  %v1973_v33 = vld [vmem:[#allocation2 + $0xa2] sm:$0xff]  ;;  %v1229_v59 = vadd.f32 %v4723_v1, %v1164_v9 }
 0x2d3   :  { %2551 = vmatpush.msra.mxu3 %v2173_v40  ;;  %v2166_v1 = vld [vmem:[#allocation9 + $0x2c0] sm:$0xff] }
 0x2d4   :  { %v1669_v39 = vadd.f32 %v1668_v44, %v1604_v12  ;;  %v1415_v44 = vadd.f32 %v4757_v58, %v1350_v51  ;;  %v2145_v51 = vld [vmem:[#allocation9 + $0x218] sm:$0xff] }
 0x2d5   :  { %2552 = vmatpush.msra.mxu3 %v2172_v54  ;;  %2498 = vmatpush.msrb.mxu2 %v2145_v51  ;;  %v2165_v51 = vld [vmem:[#allocation9 + $0x2b8] sm:$0xff] }
 0x2d6   :  { %v5005_v3 = vadd.f32 %v1851_v35, %v1669_v39  ;;  %v1671_v13 = vpop.f32.mrf.mxu1  ;;  %v1480_v12 = vadd.f32 %v1479_v15, %v1415_v44  ;;  %v1353_v35 = vadd.f32 %v4766_v62, %v1288_v48  ;;  %v1226_v39 = vadd.f32 %v4705_v32, %v1161_v8  ;;  %v2170_v15 = vld [vmem:[#allocation9 + $0x2e0] sm:$0xff]  ;;  %v2169_v32 = vld [vmem:[#allocation9 + $0x2d8] sm:$0xff]  ;;  %v1485_v18 = vpop.f32.mrf.mxu2  ;;  %v2168_v44 = vld [vmem:[#allocation9 + $0x2d0] sm:$0xff] }
 0x2d7   :  { %v1541_v2 = vpop.f32.mrf.mxu3  ;;  %v5007_v20 = vld [vmem:[#allocation2 + $0x70] sm:$0xff]  ;;  %2553 = vmatpush.msra.mxu3 %v2171_v28  ;;  %v2185_v28 = vld [vmem:[#allocation9 + $0x358] sm:$0xff] }
 0x2d8   :  { %v5009_v57 = vld [vmem:[#allocation2 + $0x72] sm:$0xff]  ;;  %1924 = vst [vmem:[#allocation2 + $0x81] sm:$0xff] %v5005_v3  ;;  %v1542_v6 = vadd.f32 %v1541_v2, %v1477_v47  ;;  %v5440_v47 = vmov 0.0   ;;  %v1291_v11 = vadd.f32 %v4791_v49, %v1226_v39  ;;  %v2187_v48 = vld [vmem:[#allocation9 + $0x368] sm:$0xff] }
 0x2d9   :  { %2263 = vmatmul.f32.gmra.mxu2 %v5007_v20  ;;  %2455 = vmatmul.f32.gmra.mxu1 %v5007_v20  ;;  %v1609_v36 = vpop.f32.mrf.mxu0  ;;  %v2204_v39 = vld [vmem:[#allocation9 + $0x3f0] sm:$0xff] }
 0x2da   :  { %2393 = vmatmul.f32.gmra.mxu0 %v5009_v57  ;;  %2331 = vmatmul.f32.gmra.mxu3 %v1957_v53  ;;  %v1607_v61 = vadd.f32 %v1606_v19, %v1542_v6  ;;  %v1418_v53 = vadd.f32 %v4774_v34, %v1353_v35  ;;  %v1853_v6 = vmul.f32 %v1837_v5, %v4532_v25  ;;  %v2186_v25 = vld [vmem:[#allocation9 + $0x360] sm:$0xff]  ;;  %v2184_v5 = vld [vmem:[#allocation9 + $0x350] sm:$0xff] }
 0x2db   :  { %2554 = vmatpush.msra.mxu3 %v2170_v15  ;;  %v1356_v49 = vadd.f32 %v4781_v22, %v1291_v11  ;;  %v5443_v11 = vld [vmem:[#allocation25_spill] sm:$0xff] }
 0x2dc   :  { %v1672_v16 = vadd.f32 %v1671_v13, %v1607_v61  ;;  %v2189_v13 = vld [vmem:[#allocation9 + $0x378] sm:$0xff]  ;;  %v1483_v34 = vadd.f32 %v1482_v7, %v1418_v53  ;;  %v2167_v7 = vld [vmem:[#allocation9 + $0x2c8] sm:$0xff] }
 0x2dd   :  { %2616 = vmatpush.msra.mxu0 %v2189_v13  ;;  %2555 = vmatpush.msra.mxu3 %v2169_v32  ;;  %v1421_v35 = vadd.f32 %v4789_v21, %v1356_v49  ;;  %v2203_v53 = vld [vmem:[#allocation9 + $0x3e8] sm:$0xff] }
 0x2de   :  { %v5024_v23 = vadd.f32 %v1852_v42, %v1672_v16  ;;  %v1674_v58 = vpop.f32.mrf.mxu1  ;;  %v1488_v13 = vpop.f32.mrf.mxu2 }
 0x2df   :  { %v1544_v52 = vpop.f32.mrf.mxu3  ;;  %v5026_v19 = vld [vmem:[#allocation2 + $0x80] sm:$0xff]  ;;  %2617 = vmatpush.msra.mxu0 %v2188_v4  ;;  %2556 = vmatpush.msra.mxu3 %v2168_v44  ;;  %v1486_v21 = vadd.f32 %v1485_v18, %v1421_v35  ;;  %v5444_v44 = vld [vmem:[#allocation29_spill] sm:$0xff] }
 0x2e0   :  { %1925 = vst [vmem:[#allocation2 + $0xb1] sm:$0xff] %v5024_v23  ;;  %v1545_v50 = vadd.f32 %v1544_v52, %v1480_v12  ;;  %v2205_v12 = vld [vmem:[#allocation9 + $0x3f8] sm:$0xff] }
 0x2e1   :  { %2266 = vmatmul.f32.gmra.mxu2 %v5440_v47  ;;  %2458 = vmatmul.f32.gmra.mxu1 %v5026_v19  ;;  %v1612_v62 = vpop.f32.mrf.mxu0 }
 0x2e2   :  { %2396 = vmatmul.f32.gmra.mxu0 %v1973_v33  ;;  %2334 = vmatmul.f32.gmra.mxu3 %v5024_v23  ;;  %v1610_v2 = vadd.f32 %v1609_v36, %v1545_v50  ;;  %v2144_v33 = vld [vmem:[#allocation9 + $0x210] sm:$0xff]  ;;  %v5441_v50 = vld [vmem:[#allocation28_spill] sm:$0xff] }
 0x2e3   :  { %2618 = vmatpush.msra.mxu0 %v2187_v48  ;;  %2499 = vmatpush.msrb.mxu2 %v2144_v33  ;;  %v1167_v47 = vadd.f32 %v5441_v50, %v4602_v37  ;;  %v1839_v48 = vmul.f32 %v4539_v63, %v5444_v44  ;;  %v5449_v50 = vld [vmem:[#allocation27_spill] sm:$0xff] }
 0x2e4   :  { %v1675_v40 = vadd.f32 %v1674_v58, %v1610_v2  ;;  %v1294_v58 = vadd.f32 %v4815_v0, %v1229_v59  ;;  %2681 = vmatpush.msra.mxu1 %v2205_v12  ;;  %2557 = vmatpush.msra.mxu3 %v2167_v7  ;;  %v5442_v0 = vld [vmem:[#allocation40_spill] sm:$0xff]  ;;  %v2143_v59 = vld [vmem:[#allocation9 + $0x208] sm:$0xff] }
 0x2e5   :  { %2619 = vmatpush.msra.mxu0 %v2186_v25  ;;  %v2182_v25 = vld [vmem:[#allocation9 + $0x340] sm:$0xff]  ;;  %v5446_v7 = vld [vmem:[#allocation41_spill] sm:$0xff]  ;;  %2500 = vmatpush.msrb.mxu2 %v2143_v59 }
 0x2e6   :  { %v5041_v36 = vadd.f32 %v1853_v6, %v1675_v40  ;;  %v1677_v61 = vpop.f32.mrf.mxu1  ;;  %2682 = vmatpush.msra.mxu1 %v2204_v39  ;;  %2558 = vmatpush.msra.mxu3 %v2166_v1  ;;  %v2183_v40 = vld [vmem:[#allocation9 + $0x348] sm:$0xff]  ;;  %v2200_v1 = vld [vmem:[#allocation9 + $0x3d0] sm:$0xff]  ;;  %v2198_v59 = vld [vmem:[#allocation9 + $0x3c0] sm:$0xff] }
 0x2e7   :  { %v1547_v54 = vpop.f32.mrf.mxu3  ;;  %v1942_v42 = vld [vmem:[#allocation2 + $0xb0] sm:$0xff]  ;;  %2620 = vmatpush.msra.mxu0 %v2185_v28  ;;  %v5447_v28 = vld [vmem:[#allocation44_spill] sm:$0xff] }
 0x2e8   :  { %v5043_v8 = vld [vmem:[#allocation2 + $0xb2] sm:$0xff]  ;;  %1926 = vst [vmem:[#allocation2 + $0xc1] sm:$0xff] %v5041_v36  ;;  %v1548_v16 = vadd.f32 %v1547_v54, %v1483_v34  ;;  %2683 = vmatpush.msra.mxu1 %v2203_v53  ;;  %2559 = vmatpush.msra.mxu3 %v2165_v51  ;;  %v5445_v34 = vld [vmem:[#allocation37_spill] sm:$0xff]  ;;  %v2162_v51 = vld [vmem:[#allocation9 + $0x2a0] sm:$0xff] }
 0x2e9   :  { %2269 = vmatmul.f32.gmra.mxu2 %v1942_v42  ;;  %2461 = vmatmul.f32.gmra.mxu1 %v1942_v42  ;;  %v1615_v22 = vpop.f32.mrf.mxu0  ;;  %v1232_v18 = vadd.f32 %v5445_v34, %v1167_v47  ;;  %v2164_v54 = vld [vmem:[#allocation9 + $0x2b0] sm:$0xff]  ;;  %v1170_v47 = vadd.f32 %v5449_v50, %v4602_v37 }
 0x2ea   :  { %2399 = vmatmul.f32.gmra.mxu0 %v5043_v8  ;;  %2337 = vmatmul.f32.gmra.mxu3 %v5041_v36  ;;  %v1613_v52 = vadd.f32 %v1612_v62, %v1548_v16  ;;  %v1359_v62 = vadd.f32 %v5442_v0, %v1294_v58  ;;  %v2201_v16 = vld [vmem:[#allocation9 + $0x3d8] sm:$0xff]  ;;  %v2163_v58 = vld [vmem:[#allocation9 + $0x2a8] sm:$0xff]  ;;  %v5451_v34 = vld [vmem:[#allocation30_spill] sm:$0xff] }
 0x2eb   :  { %2621 = vmatpush.msra.mxu0 %v2184_v5  ;;  %v1297_v12 = vadd.f32 %v5447_v28, %v1232_v18  ;;  %2560 = vmatpush.msra.mxu3 %v2164_v54  ;;  %v5448_v5 = vld [vmem:[#allocation23_spill] sm:$0xff]  ;;  %v1840_v18 = vmul.f32 %v4539_v63, %v5451_v34 }
 0x2ec   :  { %v1678_v15 = vadd.f32 %v1677_v61, %v1613_v52  ;;  %v2202_v61 = vld [vmem:[#allocation9 + $0x3e0] sm:$0xff]  ;;  %v1424_v33 = vadd.f32 %v5446_v7, %v1359_v62  ;;  %v2181_v52 = vld [vmem:[#allocation9 + $0x338] sm:$0xff]  ;;  %v1855_v39 = vmul.f32 %v1839_v48, %v5448_v5 }
 0x2ed   :  { %2622 = vmatpush.msra.mxu0 %v2183_v40  ;;  %2684 = vmatpush.msra.mxu1 %v2202_v61  ;;  %v2161_v54 = vld [vmem:[#allocation9 + $0x298] sm:$0xff] }
 0x2ee   :  { %v5055_v2 = vadd.f32 %v5443_v11, %v1678_v15  ;;  %v1680_v32 = vpop.f32.mrf.mxu1  ;;  %2561 = vmatpush.msra.mxu3 %v2163_v58  ;;  %v1489_v53 = vadd.f32 %v1488_v13, %v1424_v33  ;;  %v2180_v11 = vld [vmem:[#allocation9 + $0x330] sm:$0xff]  ;;  %v5453_v7 = vld [vmem:[#allocation43_spill] sm:$0xff] }
 0x2ef   :  { %v1550_v4 = vpop.f32.mrf.mxu3  ;;  %v5057_v6 = vld [vmem:[#allocation2 + $0xc0] sm:$0xff]  ;;  %2623 = vmatpush.msra.mxu0 %v2182_v25  ;;  %2685 = vmatpush.msra.mxu1 %v2201_v16  ;;  %v5452_v13 = vld [vmem:[#allocation38_spill] sm:$0xff]  ;;  %v2179_v25 = vld [vmem:[#allocation9 + $0x328] sm:$0xff] }
 0x2f0   :  { %v5059_v9 = vld [vmem:[#allocation2 + $0xc2] sm:$0xff]  ;;  %1927 = vst [vmem:[#allocation2 + $0xd1] sm:$0xff] %v5055_v2  ;;  %v1551_v49 = vadd.f32 %v1550_v4, %v1486_v21  ;;  %v5450_v21 = vld [vmem:[#allocation42_spill] sm:$0xff]  ;;  %v1491_v4 = vpop.f32.mrf.mxu2  ;;  %2562 = vmatpush.msra.mxu3 %v2162_v51  ;;  %v5454_v28 = vld [vmem:[#allocation47_spill] sm:$0xff] }
 0x2f1   :  { %2272 = vmatmul.f32.gmra.mxu2 %v5057_v6  ;;  %2464 = vmatmul.f32.gmra.mxu1 %v5057_v6  ;;  %v1618_v42 = vpop.f32.mrf.mxu0  ;;  %v2142_v16 = vld [vmem:[#allocation9 + $0x200] sm:$0xff]  ;;  %v2160_v58 = vld [vmem:[#allocation9 + $0x290] sm:$0xff]  ;;  %v2197_v5 = vld [vmem:[#allocation9 + $0x3b8] sm:$0xff] }
 0x2f2   :  { %2402 = vmatmul.f32.gmra.mxu0 %v5059_v9  ;;  %2340 = vmatmul.f32.gmra.mxu3 %v5055_v2  ;;  %v1616_v35 = vadd.f32 %v1615_v22, %v1551_v49  ;;  %v1362_v22 = vadd.f32 %v5450_v21, %v1297_v12  ;;  %v1235_v49 = vadd.f32 %v5452_v13, %v1170_v47  ;;  %v5456_v47 = vld [vmem:[#allocation35_spill] sm:$0xff] }
 0x2f3   :  { %2624 = vmatpush.msra.mxu0 %v2181_v52  ;;  %2686 = vmatpush.msra.mxu1 %v2200_v1  ;;  %v2178_v1 = vld [vmem:[#allocation9 + $0x320] sm:$0xff] }
 0x2f4   :  { %v1681_v15 = vadd.f32 %v1680_v32, %v1616_v35  ;;  %v2199_v32 = vld [vmem:[#allocation9 + $0x3c8] sm:$0xff]  ;;  %v1427_v33 = vadd.f32 %v5453_v7, %v1362_v22  ;;  %v1300_v12 = vadd.f32 %v5454_v28, %v1235_v49  ;;  %2501 = vmatpush.msrb.mxu2 %v2142_v16  ;;  %2563 = vmatpush.msra.mxu3 %v2161_v54  ;;  %v2176_v16 = vld [vmem:[#allocation9 + $0x310] sm:$0xff] }
 0x2f5   :  { %2625 = vmatpush.msra.mxu0 %v2180_v11  ;;  %2687 = vmatpush.msra.mxu1 %v2199_v32  ;;  %v2177_v32 = vld [vmem:[#allocation9 + $0x318] sm:$0xff]  ;;  %v2195_v7 = vld [vmem:[#allocation9 + $0x3a8] sm:$0xff]  ;;  %v5460_v28 = vld [vmem:[#allocation46_spill] sm:$0xff] }
 0x2f6   :  { %v5075_v0 = vadd.f32 %v1855_v39, %v1681_v15  ;;  %v1683_v62 = vpop.f32.mrf.mxu1  ;;  %v5455_v39 = vld [vmem:[#allocation24_spill] sm:$0xff]  ;;  %v1173_v15 = vadd.f32 %v5456_v47, %v4602_v37  ;;  %2564 = vmatpush.msra.mxu3 %v2160_v58  ;;  %v1492_v21 = vadd.f32 %v1491_v4, %v1427_v33  ;;  %v2196_v37 = vld [vmem:[#allocation9 + $0x3b0] sm:$0xff]  ;;  %v2221_v33 = vld [vmem:[#allocation9 + $0x478] sm:$0xff] }
 0x2f7   :  { %v1553_v40 = vpop.f32.mrf.mxu3  ;;  %v5077_v44 = vld [vmem:[#allocation2 + $0xd0] sm:$0xff]  ;;  %v1856_v50 = vmul.f32 %v1840_v18, %v5455_v39  ;;  %2626 = vmatpush.msra.mxu0 %v2179_v25  ;;  %2688 = vmatpush.msra.mxu1 %v2198_v59  ;;  %v2158_v25 = vld [vmem:[#allocation9 + $0x280] sm:$0xff] }
 0x2f8   :  { %v5079_v48 = vld [vmem:[#allocation2 + $0xd2] sm:$0xff]  ;;  %1928 = vst [vmem:[#allocation2 + $0xe1] sm:$0xff] %v5075_v0  ;;  %v1554_v61 = vadd.f32 %v1553_v40, %v1489_v53  ;;  %v2159_v53 = vld [vmem:[#allocation9 + $0x288] sm:$0xff]  ;;  %v1494_v59 = vpop.f32.mrf.mxu2  ;;  %v2194_v39 = vld [vmem:[#allocation9 + $0x3a0] sm:$0xff]  ;;  %2746 = vmatpush.msra.mxu2 %v2221_v33 }
 0x2f9   :  { %2275 = vmatmul.f32.gmra.mxu2 %v5077_v44  ;;  %2467 = vmatmul.f32.gmra.mxu1 %v5077_v44  ;;  %v1621_v52 = vpop.f32.mrf.mxu0 }
 0x2fa   :  { %2405 = vmatmul.f32.gmra.mxu0 %v5079_v48  ;;  %2343 = vmatmul.f32.gmra.mxu3 %v5075_v0  ;;  %v1619_v35 = vadd.f32 %v1618_v42, %v1554_v61  ;;  %v5457_v42 = vld [vmem:[#allocation45_spill] sm:$0xff]  ;;  %v5459_v61 = vld [vmem:[#allocation39_spill] sm:$0xff] }
 0x2fb   :  { %v1365_v22 = vadd.f32 %v5457_v42, %v1300_v12  ;;  %2627 = vmatpush.msra.mxu0 %v2178_v1  ;;  %2689 = vmatpush.msra.mxu1 %v2197_v5  ;;  %v1238_v4 = vadd.f32 %v5459_v61, %v1173_v15  ;;  %v2175_v5 = vld [vmem:[#allocation9 + $0x308] sm:$0xff]  ;;  %v2193_v61 = vld [vmem:[#allocation9 + $0x398] sm:$0xff] }
 0x2fc   :  { %v1684_v51 = vadd.f32 %v1683_v62, %v1619_v35  ;;  %2565 = vmatpush.msra.mxu3 %v2159_v53  ;;  %v5458_v62 = vld [vmem:[#allocation31_spill] sm:$0xff]  ;;  %v5461_v35 = vld [vmem:[#allocation50_spill] sm:$0xff] }
 0x2fd   :  { %v1841_v49 = vmul.f32 %v4539_v63, %v5458_v62  ;;  %v1430_v12 = vadd.f32 %v5460_v28, %v1365_v22  ;;  %v1303_v58 = vadd.f32 %v5461_v35, %v1238_v4  ;;  %2628 = vmatpush.msra.mxu0 %v2177_v32  ;;  %2690 = vmatpush.msra.mxu1 %v2196_v37  ;;  %v2174_v22 = vld [vmem:[#allocation9 + $0x300] sm:$0xff]  ;;  %v2191_v28 = vld [vmem:[#allocation9 + $0x388] sm:$0xff] }
 0x2fe   :  { %v5095_v11 = vadd.f32 %v1856_v50, %v1684_v51  ;;  %v1686_v40 = vpop.f32.mrf.mxu1  ;;  %2566 = vmatpush.msra.mxu3 %v2158_v25  ;;  %v5462_v50 = vld [vmem:[#allocation26_spill] sm:$0xff] }
 0x2ff   :  { %v1556_v34 = vpop.f32.mrf.mxu3  ;;  %v5097_v13 = vld [vmem:[#allocation2 + $0xe0] sm:$0xff]  ;;  %v1857_v47 = vmul.f32 %v1841_v49, %v5462_v50  ;;  %2629 = vmatpush.msra.mxu0 %v2176_v16  ;;  %2691 = vmatpush.msra.mxu1 %v2195_v7  ;;  %v1495_v53 = vadd.f32 %v1494_v59, %v1430_v12  ;;  %v2220_v25 = vld [vmem:[#allocation9 + $0x470] sm:$0xff]  ;;  %v5465_v59 = vld [vmem:[#allocation49_spill] sm:$0xff] }
 0x300   :  { %v5099_v18 = vld [vmem:[#allocation2 + $0xe2] sm:$0xff]  ;;  %1929 = vst [vmem:[#allocation2 + $0xf1] sm:$0xff] %v5095_v11  ;;  %v1557_v54 = vadd.f32 %v1556_v34, %v1492_v21  ;;  %v1497_v33 = vpop.f32.mrf.mxu2  ;;  %2747 = vmatpush.msra.mxu2 %v2220_v25  ;;  %v5466_v12 = vld [vmem:[#allocation34_spill] sm:$0xff] }
 0x301   :  { %2278 = vmatmul.f32.gmra.mxu2 %v5097_v13  ;;  %2470 = vmatmul.f32.gmra.mxu1 %v5097_v13  ;;  %v1624_v51 = vpop.f32.mrf.mxu0  ;;  %v5463_v21 = vld [vmem:[#allocation48_spill] sm:$0xff] }
 0x302   :  { %2408 = vmatmul.f32.gmra.mxu0 %v5099_v18  ;;  %2346 = vmatmul.f32.gmra.mxu3 %v5095_v11  ;;  %v1622_v1 = vadd.f32 %v1621_v52, %v1557_v54  ;;  %v1368_v42 = vadd.f32 %v5463_v21, %v1303_v58  ;;  %v5464_v49 = vld [vmem:[#allocation32_spill] sm:$0xff]  ;;  %v2192_v54 = vld [vmem:[#allocation9 + $0x390] sm:$0xff] }
 0x303   :  { %2630 = vmatpush.msra.mxu0 %v2175_v5  ;;  %2692 = vmatpush.msra.mxu1 %v2194_v39 }
 0x304   :  { %v1687_v15 = vadd.f32 %v1686_v40, %v1622_v1  ;;  %v1842_v40 = vmul.f32 %v4539_v63, %v5464_v49  ;;  %v1433_v16 = vadd.f32 %v5465_v59, %v1368_v42  ;;  %v2218_v59 = vld [vmem:[#allocation9 + $0x460] sm:$0xff] }
 0x305   :  { %2631 = vmatpush.msra.mxu0 %v2174_v22  ;;  %2693 = vmatpush.msra.mxu1 %v2193_v61  ;;  %v5468_v61 = vld [vmem:[#allocation36_spill] sm:$0xff] }
 0x306   :  { %v5113_v34 = vadd.f32 %v1857_v47, %v1687_v15  ;;  %v1689_v62 = vpop.f32.mrf.mxu1  ;;  %v1858_v35 = vmul.f32 %v1842_v40, %v5466_v12  ;;  %v1498_v1 = vadd.f32 %v1497_v33, %v1433_v16  ;;  %v2217_v33 = vld [vmem:[#allocation9 + $0x458] sm:$0xff] }
 0x307   :  { %v1559_v52 = vpop.f32.mrf.mxu3  ;;  %v5115_v32 = vld [vmem:[#allocation2 + $0xf0] sm:$0xff]  ;;  %2694 = vmatpush.msra.mxu1 %v2192_v54 }
 0x308   :  { %v5117_v37 = vld [vmem:[#allocation2 + $0xf2] sm:$0xff]  ;;  %1930 = vst [vmem:[#allocation2 + $0x101] sm:$0xff] %v5113_v34  ;;  %v1560_v4 = vadd.f32 %v1559_v52, %v1495_v53  ;;  %v5467_v53 = vld [vmem:[#allocation33_spill] sm:$0xff] }
 0x309   :  { %2281 = vmatmul.f32.gmra.mxu2 %v5115_v32  ;;  %2473 = vmatmul.f32.gmra.mxu1 %v5115_v32  ;;  %v1627_v15 = vpop.f32.mrf.mxu0  ;;  %v1843_v21 = vmul.f32 %v4539_v63, %v5467_v53 }
 0x30a   :  { %2411 = vmatmul.f32.gmra.mxu0 %v5117_v37  ;;  %2349 = vmatmul.f32.gmra.mxu3 %v5113_v34  ;;  %v1625_v7 = vadd.f32 %v1624_v51, %v1560_v4  ;;  %v2190_v51 = vld [vmem:[#allocation9 + $0x380] sm:$0xff] }
 0x30b   :  { %2695 = vmatpush.msra.mxu1 %v2191_v28  ;;  %v1859_v49 = vmul.f32 %v1843_v21, %v5468_v61  ;;  %v5163_v28 = vpop.f32.mrf.mxu2 }
 0x30c   :  { %v1690_v58 = vadd.f32 %v1689_v62, %v1625_v7  ;;  %v2219_v62 = vld [vmem:[#allocation9 + $0x468] sm:$0xff] }
 0x30d   :  { %2696 = vmatpush.msra.mxu1 %v2190_v51  ;;  %2748 = vmatpush.msra.mxu2 %v2219_v62 }
 0x30e   :  { %v5128_v5 = vadd.f32 %v1858_v35, %v1690_v58  ;;  %v1692_v22 = vpop.f32.mrf.mxu1 }
 0x30f   :  { %v1562_v39 = vpop.f32.mrf.mxu3  ;;  %v5130_v50 = vld [vmem:[#allocation2 + $0x100] sm:$0xff]  ;;  %2749 = vmatpush.msra.mxu2 %v2218_v59 }
 0x310   :  { %v5132_v47 = vld [vmem:[#allocation2 + $0x102] sm:$0xff]  ;;  %1931 = vst [vmem:[#allocation2 + $0x111] sm:$0xff] %v5128_v5  ;;  %v1563_v42 = vadd.f32 %v1562_v39, %v1498_v1 }
 0x311   :  { %2284 = vmatmul.f32.gmra.mxu2 %v5130_v50  ;;  %2476 = vmatmul.f32.gmra.mxu1 %v5130_v50  ;;  %v5155_v16 = vpop.f32.mrf.mxu0 }
 0x312   :  { %2414 = vmatmul.f32.gmra.mxu0 %v5132_v47  ;;  %2352 = vmatmul.f32.gmra.mxu3 %v5128_v5  ;;  %v1628_v52 = vadd.f32 %v1627_v15, %v1563_v42 }
 0x313   :  { %2750 = vmatpush.msra.mxu2 %v2217_v33 }
 0x314   :  { %v1693_v40 = vadd.f32 %v1692_v22, %v1628_v52 }
 0x316   :  { %v5142_v63 = vadd.f32 %v1859_v49, %v1693_v40 }
 0x317   :  { %v5144_v4 = vld [vmem:[#allocation2 + $0x110] sm:$0xff]  ;;  %v5153_v25 = vpop.f32.mrf.mxu3 }
 0x318   :  { %v5146_v54 = vld [vmem:[#allocation2 + $0x112] sm:$0xff]  ;;  %1932 = vst [vmem:[#allocation2 + $0x121] sm:$0xff] %v5142_v63 }
 0x319   :  { %2287 = vmatmul.f32.gmra.mxu2 %v5144_v4  ;;  %2479 = vmatmul.f32.gmra.mxu1 %v5144_v4 }
 0x31a   :  { %2417 = vmatmul.f32.gmra.mxu0 %v5146_v54  ;;  %2567 = vmatmul.f32.vlgmr.msra.gmra.mxu3 %v4915_v29 }
 0x31f   :  { %v5157_v7 = vld [vmem:[#allocation2 + $0x120] sm:$0xff] }
 0x321   :  { %2502 = vmatmul.f32.vlgmr.msrb.gmra.mxu2 %v4904_v41  ;;  %2482 = vmatmul.f32.gmra.mxu1 %v5157_v7  ;;  %v5174_v41 = vld [vmem:[%s5364_s5] ss:$0 sm:$0xff]  ;;  %s3304_s5 = smov [#allocation11]  }
 0x322   :  { %2632 = vmatmul.f32.vlgmr.msra.gmra.mxu0 %v4924_v55  ;;  %2570 = vmatmul.f32.gmra.mxu3 %v4926_v24  ;;  %v2216_v55 = vld [vmem:[#allocation9 + $0x450] sm:$0xff]  ;;  %s2895_s20 = sshll.u32 %s3304_s5, 4  ;;  %s2896_s20 = int_to_ptr.vmem [resolvable:$true] %s2895_s20 }
 0x323   :  { %v2311_v29 = vpop.f32.mrf.mxu3  ;;  %2751 = vmatpush.msra.mxu2 %v2216_v55 }
 0x325   :  { %v5165_v35 = vpop.f32.mrf.mxu1 }
 0x326   :  { %v2376_v12 = vpop.f32.mrf.mxu0 }
 0x329   :  { %2505 = vmatmul.f32.gmra.mxu2 %v4913_v31  ;;  %2697 = vmatmul.f32.vlgmr.msra.gmra.mxu1 %v4913_v31 }
 0x32a   :  { %2635 = vmatmul.f32.gmra.mxu0 %v4939_v56  ;;  %2573 = vmatmul.f32.gmra.mxu3 %v4941_v17  ;;  %v2215_v56 = vld [vmem:[#allocation9 + $0x448] sm:$0xff] }
 0x32b   :  { %v2246_v24 = vpop.f32.mrf.mxu2  ;;  %2752 = vmatpush.msra.mxu2 %v2215_v56 }
 0x32c   :  { %v2247_v58 = vadd.f32 %v5174_v41, %v2246_v24  ;;  %v2314_v1 = vpop.f32.mrf.mxu3 }
 0x32d   :  { %v2441_v51 = vpop.f32.mrf.mxu1 }
 0x32e   :  { %v2379_v39 = vpop.f32.mrf.mxu0  ;;  %v2312_v15 = vadd.f32 %v2311_v29, %v2247_v58 }
 0x330   :  { %v2377_v53 = vadd.f32 %v2376_v12, %v2312_v15 }
 0x331   :  { %2508 = vmatmul.f32.gmra.mxu2 %v4922_v38  ;;  %2700 = vmatmul.f32.gmra.mxu1 %v4922_v38 }
 0x332   :  { %2638 = vmatmul.f32.gmra.mxu0 %v4954_v46  ;;  %2576 = vmatmul.f32.gmra.mxu3 %v4956_v30  ;;  %v5181_v31 = vadd.f32 %v2441_v51, %v2377_v53  ;;  %v2214_v46 = vld [vmem:[#allocation9 + $0x440] sm:$0xff] }
 0x333   :  { %v2249_v17 = vpop.f32.mrf.mxu2  ;;  %2753 = vmatpush.msra.mxu2 %v2214_v46  ;;  %v5469_v51 = vld [vmem:[#allocation16_spill] sm:$0xff] }
 0x334   :  { %v2250_v21 = vadd.f32 %v5174_v41, %v2249_v17  ;;  %v2317_v42 = vpop.f32.mrf.mxu3 }
 0x335   :  { %v2444_v62 = vpop.f32.mrf.mxu1 }
 0x336   :  { %v2382_v22 = vpop.f32.mrf.mxu0  ;;  %v2315_v52 = vadd.f32 %v2314_v1, %v2250_v21 }
 0x338   :  { %v2380_v61 = vadd.f32 %v2379_v39, %v2315_v52  ;;  %v2211_v52 = vld [vmem:[#allocation9 + $0x428] sm:$0xff] }
 0x339   :  { %2511 = vmatmul.f32.gmra.mxu2 %v4937_v60  ;;  %2703 = vmatmul.f32.gmra.mxu1 %v4937_v60 }
 0x33a   :  { %2641 = vmatmul.f32.gmra.mxu0 %v4969_v27  ;;  %2579 = vmatmul.f32.gmra.mxu3 %v4971_v43  ;;  %v5188_v38 = vadd.f32 %v2444_v62, %v2380_v61  ;;  %v2213_v27 = vld [vmem:[#allocation9 + $0x438] sm:$0xff] }
 0x33b   :  { %v2252_v30 = vpop.f32.mrf.mxu2  ;;  %2754 = vmatpush.msra.mxu2 %v2213_v27 }
 0x33c   :  { %v2253_v49 = vadd.f32 %v5174_v41, %v2252_v30  ;;  %v2320_v40 = vpop.f32.mrf.mxu3 }
 0x33d   :  { %v2447_v29 = vpop.f32.mrf.mxu1 }
 0x33e   :  { %v2385_v59 = vpop.f32.mrf.mxu0  ;;  %v2318_v33 = vadd.f32 %v2317_v42, %v2253_v49 }
 0x340   :  { %v2383_v12 = vadd.f32 %v2382_v22, %v2318_v33  ;;  %v2210_v33 = vld [vmem:[#allocation9 + $0x420] sm:$0xff] }
 0x341   :  { %2514 = vmatmul.f32.gmra.mxu2 %v4952_v10  ;;  %2706 = vmatmul.f32.gmra.mxu1 %v4952_v10 }
 0x342   :  { %2644 = vmatmul.f32.gmra.mxu0 %v4986_v45  ;;  %2582 = vmatmul.f32.gmra.mxu3 %v4988_v14  ;;  %v5195_v60 = vadd.f32 %v2447_v29, %v2383_v12  ;;  %v2212_v45 = vld [vmem:[#allocation9 + $0x430] sm:$0xff] }
 0x343   :  { %v2255_v43 = vpop.f32.mrf.mxu2  ;;  %2755 = vmatpush.msra.mxu2 %v2212_v45 }
 0x344   :  { %v2256_v55 = vadd.f32 %v5174_v41, %v2255_v43  ;;  %v2323_v24 = vpop.f32.mrf.mxu3 }
 0x345   :  { %v2450_v39 = vpop.f32.mrf.mxu1  ;;  %2756 = vmatpush.msra.mxu2 %v2211_v52 }
 0x346   :  { %v2388_v58 = vpop.f32.mrf.mxu0  ;;  %v2321_v1 = vadd.f32 %v2320_v40, %v2256_v55 }
 0x347   :  { %2757 = vmatpush.msra.mxu2 %v2210_v33 }
 0x348   :  { %v2386_v15 = vadd.f32 %v2385_v59, %v2321_v1 }
 0x349   :  { %2517 = vmatmul.f32.gmra.mxu2 %v5469_v51  ;;  %2709 = vmatmul.f32.gmra.mxu1 %v5469_v51 }
 0x34a   :  { %2647 = vmatmul.f32.gmra.mxu0 %v5007_v20  ;;  %2585 = vmatmul.f32.gmra.mxu3 %v5009_v57  ;;  %v5202_v10 = vadd.f32 %v2450_v39, %v2386_v15  ;;  %v5207_v20 = vld [vmem:[#allocation2 + $0x82] sm:$0xff] }
 0x34b   :  { %v2258_v14 = vpop.f32.mrf.mxu2 }
 0x34c   :  { %v2259_v53 = vadd.f32 %v5174_v41, %v2258_v14  ;;  %v2326_v56 = vpop.f32.mrf.mxu3 }
 0x34e   :  { %v2324_v21 = vadd.f32 %v2323_v24, %v2259_v53  ;;  %v2453_v42 = vpop.f32.mrf.mxu1 }
 0x34f   :  { %v2391_v17 = vpop.f32.mrf.mxu0 }
 0x350   :  { %v2389_v22 = vadd.f32 %v2388_v58, %v2324_v21  ;;  %v2053_v58 = vld [vmem:[#allocation2 + $0x91] sm:$0xff] }
 0x351   :  { %2520 = vmatmul.f32.gmra.mxu2 %v4984_v26  ;;  %2712 = vmatmul.f32.gmra.mxu1 %v4984_v26 }
 0x352   :  { %2650 = vmatmul.f32.gmra.mxu0 %v5026_v19  ;;  %2588 = vmatmul.f32.gmra.mxu3 %v5207_v20  ;;  %v5211_v57 = vadd.f32 %v2453_v42, %v2389_v22  ;;  %v5215_v19 = vld [vmem:[#allocation2] sm:$0xff] }
 0x354   :  { %v2261_v62 = vpop.f32.mrf.mxu2 }
 0x355   :  { %v2262_v61 = vadd.f32 %v5174_v41, %v2261_v62  ;;  %v2329_v46 = vpop.f32.mrf.mxu3 }
 0x356   :  { %v2456_v40 = vpop.f32.mrf.mxu1 }
 0x357   :  { %v2394_v30 = vpop.f32.mrf.mxu0  ;;  %v2327_v49 = vadd.f32 %v2326_v56, %v2262_v61 }
 0x359   :  { %v2392_v59 = vadd.f32 %v2391_v17, %v2327_v49  ;;  %2523 = vmatmul.f32.gmra.mxu2 %v5005_v3  ;;  %2715 = vmatmul.f32.gmra.mxu1 %v5005_v3 }
 0x35a   :  { %2653 = vmatmul.f32.gmra.mxu0 %v5215_v19  ;;  %2591 = vmatmul.f32.gmra.mxu3 %v5043_v8  ;;  %v2209_v8 = vld [vmem:[#allocation9 + $0x418] sm:$0xff] }
 0x35b   :  { %v5220_v26 = vadd.f32 %v2456_v40, %v2392_v59  ;;  %2758 = vmatpush.msra.mxu2 %v2209_v8 }
 0x35c   :  { %v2264_v29 = vpop.f32.mrf.mxu2 }
 0x35d   :  { %v2265_v12 = vadd.f32 %v5174_v41, %v2264_v29  ;;  %v2332_v27 = vpop.f32.mrf.mxu3 }
 0x35e   :  { %v2459_v24 = vpop.f32.mrf.mxu1 }
 0x35f   :  { %v2397_v43 = vpop.f32.mrf.mxu0  ;;  %v2330_v55 = vadd.f32 %v2329_v46, %v2265_v12 }
 0x361   :  { %v2395_v1 = vadd.f32 %v2394_v30, %v2330_v55  ;;  %2526 = vmatmul.f32.gmra.mxu2 %v5024_v23  ;;  %2718 = vmatmul.f32.gmra.mxu1 %v2053_v58 }
 0x362   :  { %2656 = vmatmul.f32.gmra.mxu0 %v5057_v6  ;;  %2594 = vmatmul.f32.gmra.mxu3 %v5059_v9  ;;  %v2208_v6 = vld [vmem:[#allocation9 + $0x410] sm:$0xff] }
 0x363   :  { %v5226_v3 = vadd.f32 %v2459_v24, %v2395_v1  ;;  %2759 = vmatpush.msra.mxu2 %v2208_v6 }
 0x364   :  { %v2267_v39 = vpop.f32.mrf.mxu2 }
 0x365   :  { %v2268_v15 = vadd.f32 %v5174_v41, %v2267_v39  ;;  %v2335_v51 = vpop.f32.mrf.mxu3 }
 0x366   :  { %v2462_v53 = vpop.f32.mrf.mxu1 }
 0x367   :  { %v2400_v45 = vpop.f32.mrf.mxu0  ;;  %v2333_v14 = vadd.f32 %v2332_v27, %v2268_v15 }
 0x369   :  { %v2398_v56 = vadd.f32 %v2397_v43, %v2333_v14  ;;  %2529 = vmatmul.f32.gmra.mxu2 %v5041_v36  ;;  %2721 = vmatmul.f32.gmra.mxu1 %v5041_v36 }
 0x36a   :  { %2659 = vmatmul.f32.gmra.mxu0 %v5077_v44  ;;  %2597 = vmatmul.f32.gmra.mxu3 %v5079_v48  ;;  %v2207_v44 = vld [vmem:[#allocation9 + $0x408] sm:$0xff] }
 0x36b   :  { %v5233_v23 = vadd.f32 %v2462_v53, %v2398_v56  ;;  %2760 = vmatpush.msra.mxu2 %v2207_v44  ;;  %v5266_v53 = vld [vmem:[#allocation2 + $0x122] sm:$0xff]  ;;  %v2061_v44 = vld [vmem:[#allocation2 + $0x131] sm:$0xff] }
 0x36c   :  { %v2270_v9 = vpop.f32.mrf.mxu2 }
 0x36d   :  { %v2271_v17 = vadd.f32 %v5174_v41, %v2270_v9  ;;  %v2338_v21 = vpop.f32.mrf.mxu3 }
 0x36e   :  { %v2465_v52 = vpop.f32.mrf.mxu1 }
 0x36f   :  { %v2403_v42 = vpop.f32.mrf.mxu0  ;;  %v2336_v22 = vadd.f32 %v2335_v51, %v2271_v17 }
 0x371   :  { %v2401_v62 = vadd.f32 %v2400_v45, %v2336_v22  ;;  %2532 = vmatmul.f32.gmra.mxu2 %v5055_v2  ;;  %2724 = vmatmul.f32.gmra.mxu1 %v5055_v2 }
 0x372   :  { %2662 = vmatmul.f32.gmra.mxu0 %v5097_v13  ;;  %2600 = vmatmul.f32.gmra.mxu3 %v5099_v18  ;;  %v2206_v13 = vld [vmem:[#allocation9 + $0x400] sm:$0xff] }
 0x373   :  { %v5240_v36 = vadd.f32 %v2465_v52, %v2401_v62  ;;  %2761 = vmatpush.msra.mxu2 %v2206_v13  ;;  %v2064_v13 = vld [vmem:[#allocation2 + $0x42] sm:$0xff] }
 0x374   :  { %v2273_v48 = vpop.f32.mrf.mxu2 }
 0x375   :  { %v2274_v61 = vadd.f32 %v5174_v41, %v2273_v48  ;;  %v2341_v46 = vpop.f32.mrf.mxu3 }
 0x376   :  { %v2468_v49 = vpop.f32.mrf.mxu1 }
 0x377   :  { %v2339_v30 = vadd.f32 %v2338_v21, %v2274_v61  ;;  %v2406_v40 = vpop.f32.mrf.mxu0  ;;  %v2062_v61 = vld [vmem:[#allocation2 + $0x22] sm:$0xff] }
 0x379   :  { %v2404_v59 = vadd.f32 %v2403_v42, %v2339_v30  ;;  %2535 = vmatmul.f32.gmra.mxu2 %v5075_v0  ;;  %2727 = vmatmul.f32.gmra.mxu1 %v5075_v0 }
 0x37a   :  { %2665 = vmatmul.f32.gmra.mxu0 %v5115_v32  ;;  %2603 = vmatmul.f32.gmra.mxu3 %v5117_v37 }
 0x37b   :  { %v5247_v2 = vadd.f32 %v2468_v49, %v2404_v59 }
 0x37c   :  { %v2276_v18 = vpop.f32.mrf.mxu2 }
 0x37d   :  { %v2277_v33 = vadd.f32 %v5174_v41, %v2276_v18  ;;  %v2344_v27 = vpop.f32.mrf.mxu3 }
 0x37e   :  { %v2471_v12 = vpop.f32.mrf.mxu1 }
 0x37f   :  { %v2342_v29 = vadd.f32 %v2341_v46, %v2277_v33  ;;  %v2409_v32 = vpop.f32.mrf.mxu0 }
 0x381   :  { %v2407_v43 = vadd.f32 %v2406_v40, %v2342_v29  ;;  %2538 = vmatmul.f32.gmra.mxu2 %v5095_v11  ;;  %2730 = vmatmul.f32.gmra.mxu1 %v5095_v11  ;;  %v2065_v29 = vld [vmem:[#allocation2 + $0x52] sm:$0xff] }
 0x382   :  { %2668 = vmatmul.f32.gmra.mxu0 %v5130_v50  ;;  %2606 = vmatmul.f32.gmra.mxu3 %v5132_v47 }
 0x383   :  { %v5254_v0 = vadd.f32 %v2471_v12, %v2407_v43  ;;  %v2066_v43 = vld [vmem:[#allocation2 + $0x62] sm:$0xff] }
 0x384   :  { %v2279_v37 = vpop.f32.mrf.mxu2 }
 0x385   :  { %v2280_v55 = vadd.f32 %v5174_v41, %v2279_v37  ;;  %v2347_v50 = vpop.f32.mrf.mxu3 }
 0x386   :  { %v2474_v58 = vpop.f32.mrf.mxu1 }
 0x387   :  { %v2345_v24 = vadd.f32 %v2344_v27, %v2280_v55  ;;  %v2412_v8 = vpop.f32.mrf.mxu0 }
 0x389   :  { %v2410_v1 = vadd.f32 %v2409_v32, %v2345_v24  ;;  %2541 = vmatmul.f32.gmra.mxu2 %v5113_v34  ;;  %2733 = vmatmul.f32.gmra.mxu1 %v5113_v34 }
 0x38a   :  { %2671 = vmatmul.f32.gmra.mxu0 %v5144_v4  ;;  %2609 = vmatmul.f32.gmra.mxu3 %v5146_v54 }
 0x38b   :  { %v5261_v11 = vadd.f32 %v2474_v58, %v2410_v1 }
 0x38c   :  { %v2282_v39 = vpop.f32.mrf.mxu2 }
 0x38d   :  { %v2283_v15 = vadd.f32 %v5174_v41, %v2282_v39  ;;  %v2350_v56 = vpop.f32.mrf.mxu3 }
 0x38e   :  { %v2477_v45 = vpop.f32.mrf.mxu1 }
 0x38f   :  { %v2348_v51 = vadd.f32 %v2347_v50, %v2283_v15  ;;  %v2415_v9 = vpop.f32.mrf.mxu0 }
 0x391   :  { %v2413_v14 = vadd.f32 %v2412_v8, %v2348_v51  ;;  %2544 = vmatmul.f32.gmra.mxu2 %v5128_v5  ;;  %2736 = vmatmul.f32.gmra.mxu1 %v5128_v5 }
 0x392   :  { %2674 = vmatmul.f32.gmra.mxu0 %v5157_v7  ;;  %2612 = vmatmul.f32.gmra.mxu3 %v5266_v53 }
 0x393   :  { %v5270_v34 = vadd.f32 %v2477_v45, %v2413_v14 }
 0x394   :  { %v2285_v4 = vpop.f32.mrf.mxu2 }
 0x395   :  { %v2286_v6 = vadd.f32 %v5174_v41, %v2285_v4  ;;  %v2353_v52 = vpop.f32.mrf.mxu3 }
 0x396   :  { %v2480_v21 = vpop.f32.mrf.mxu1 }
 0x397   :  { %v2351_v17 = vadd.f32 %v2350_v56, %v2286_v6  ;;  %v2418_v48 = vpop.f32.mrf.mxu0 }
 0x399   :  { %v2416_v42 = vadd.f32 %v2415_v9, %v2351_v17  ;;  %2547 = vmatmul.f32.gmra.mxu2 %v5142_v63  ;;  %2739 = vmatmul.f32.gmra.mxu1 %v5142_v63 }
 0x39a   :  { %2677 = vmatmul.f32.gmra.mxu0 %v5215_v19  ;;  %v2063_v19 = vld [vmem:[#allocation2 + $0x32] sm:$0xff] }
 0x39b   :  { %v5276_v7 = vadd.f32 %v2480_v21, %v2416_v42 }
 0x39c   :  { %v2288_v5 = vpop.f32.mrf.mxu2 }
 0x39d   :  { %v2289_v22 = vadd.f32 %v5174_v41, %v2288_v5  ;;  %v2568_v14 = vpop.f32.mrf.mxu3 }
 0x39e   :  { %v2483_v30 = vpop.f32.mrf.mxu1 }
 0x39f   :  { %v2354_v62 = vadd.f32 %v2353_v52, %v2289_v22 }
 0x3a1   :  { %v2419_v46 = vadd.f32 %v2418_v48, %v2354_v62  ;;  %2762 = vmatmul.f32.vlgmr.msra.gmra.mxu2 %v2062_v61  ;;  %2742 = vmatmul.f32.gmra.mxu1 %v2061_v44 }
 0x3a3   :  { %v5279_v49 = vadd.f32 %v2483_v30, %v2419_v46 }
 0x3a4   :  { %v5281_v40 = vpop.f32.mrf.mxu2 }
 0x3a5   :  { %v2571_v17 = vpop.f32.mrf.mxu3 }
 0x3a6   :  { %v2698_v6 = vpop.f32.mrf.mxu1 }
 0x3a9   :  { %2765 = vmatmul.f32.gmra.mxu2 %v2063_v19 }
 0x3ac   :  { %v2506_v63 = vpop.f32.mrf.mxu2 }
 0x3ad   :  { %v5284_v59 = vadd.f32 %v2506_v63, %v5181_v31  ;;  %v2067_v31 = vld [vmem:[#allocation2 + $0x72] sm:$0xff] }
 0x3ae   :  { %v2701_v22 = vpop.f32.mrf.mxu1 }
 0x3b1   :  { %2768 = vmatmul.f32.gmra.mxu2 %v2064_v13 }
 0x3b4   :  { %v2509_v18 = vpop.f32.mrf.mxu2 }
 0x3b5   :  { %v5287_v33 = vadd.f32 %v2509_v18, %v5188_v38 }
 0x3b9   :  { %2771 = vmatmul.f32.gmra.mxu2 %v2065_v29 }
 0x3bc   :  { %v2512_v12 = vpop.f32.mrf.mxu2 }
 0x3bd   :  { %v5290_v27 = vadd.f32 %v2512_v12, %v5195_v60  ;;  %v2069_v60 = vld [vmem:[#allocation2 + $0x92] sm:$0xff] }
 0x3c1   :  { %2774 = vmatmul.f32.gmra.mxu2 %v2066_v43 }
 0x3c4   :  { %v2515_v32 = vpop.f32.mrf.mxu2 }
 0x3c5   :  { %v5293_v37 = vadd.f32 %v2515_v32, %v5202_v10  ;;  %v2070_v10 = vld [vmem:[#allocation2 + $0xc2] sm:$0xff] }
 0x3c9   :  { %2777 = vmatmul.f32.gmra.mxu2 %v2067_v31 }
 0x3cc   :  { %v2518_v55 = vpop.f32.mrf.mxu2 }
 0x3cd   :  { %v5296_v24 = vadd.f32 %v2518_v55, %v5211_v57  ;;  %v2071_v57 = vld [vmem:[#allocation2 + $0xd2] sm:$0xff] }
 0x3d1   :  { %2780 = vmatmul.f32.gmra.mxu2 %v5207_v20 }
 0x3d4   :  { %v2521_v38 = vpop.f32.mrf.mxu2 }
 0x3d5   :  { %v5300_v58 = vadd.f32 %v2521_v38, %v5220_v26  ;;  %v2072_v26 = vld [vmem:[#allocation2 + $0xe2] sm:$0xff] }
 0x3d9   :  { %2783 = vmatmul.f32.gmra.mxu2 %v2069_v60 }
 0x3dc   :  { %v2524_v1 = vpop.f32.mrf.mxu2 }
 0x3dd   :  { %v5303_v50 = vadd.f32 %v2524_v1, %v5226_v3  ;;  %v2073_v3 = vld [vmem:[#allocation2 + $0xf2] sm:$0xff] }
 0x3e1   :  { %2786 = vmatmul.f32.gmra.mxu2 %v2070_v10 }
 0x3e4   :  { %v2527_v8 = vpop.f32.mrf.mxu2 }
 0x3e5   :  { %v5306_v39 = vadd.f32 %v2527_v8, %v5233_v23  ;;  %v2633_v23 = vpop.f32.mrf.mxu0 }
 0x3e9   :  { %2789 = vmatmul.f32.gmra.mxu2 %v2071_v57 }
 0x3ec   :  { %v2530_v15 = vpop.f32.mrf.mxu2 }
 0x3ed   :  { %v5309_v20 = vadd.f32 %v2530_v15, %v5240_v36  ;;  %v2636_v21 = vpop.f32.mrf.mxu0 }
 0x3f1   :  { %2792 = vmatmul.f32.gmra.mxu2 %v2072_v26 }
 0x3f4   :  { %v2533_v51 = vpop.f32.mrf.mxu2 }
 0x3f5   :  { %v5312_v45 = vadd.f32 %v2533_v51, %v5247_v2  ;;  %v2244_v2 = vadd.f32 %v5174_v41, %v5163_v28 }
 0x3f7   :  { %v2309_v5 = vadd.f32 %v5153_v25, %v2244_v2  ;;  %v2704_v25 = vpop.f32.mrf.mxu1 }
 0x3f9   :  { %2795 = vmatmul.f32.gmra.mxu2 %v2073_v3  ;;  %v2374_v52 = vadd.f32 %v5155_v16, %v2309_v5 }
 0x3fb   :  { %v2439_v44 = vadd.f32 %v5165_v35, %v2374_v52  ;;  %v2572_v35 = vadd.f32 %v2571_v17, %v5284_v59 }
 0x3fc   :  { %v2536_v4 = vpop.f32.mrf.mxu2 }
 0x3fd   :  { %v5315_v56 = vadd.f32 %v2536_v4, %v5254_v0  ;;  %v2504_v41 = vadd.f32 %v5281_v40, %v2439_v44  ;;  %v2637_v18 = vadd.f32 %v2636_v21, %v2572_v35 }
 0x3ff   :  { %v2569_v48 = vadd.f32 %v2568_v14, %v2504_v41  ;;  %v2707_v30 = vpop.f32.mrf.mxu1  ;;  %v2702_v32 = vadd.f32 %v2701_v22, %v2637_v18 }
 0x401   :  { %2798 = vmatmul.f32.gmra.mxu2 %v5132_v47  ;;  %v2574_v47 = vpop.f32.mrf.mxu3 }
 0x402   :  { %v2575_v31 = vadd.f32 %v2574_v47, %v5287_v33 }
 0x404   :  { %v2539_v9 = vpop.f32.mrf.mxu2 }
 0x405   :  { %v5319_v36 = vadd.f32 %v2539_v9, %v5261_v11  ;;  %v2639_v11 = vpop.f32.mrf.mxu0 }
 0x406   :  { %v2640_v1 = vadd.f32 %v2639_v11, %v2575_v31 }
 0x408   :  { %v2705_v15 = vadd.f32 %v2704_v25, %v2640_v1 }
 0x409   :  { %2801 = vmatmul.f32.gmra.mxu2 %v5146_v54  ;;  %v2077_v54 = vld [vmem:[#allocation2 + $0x132] sm:$0xff] }
 0x40c   :  { %v2542_v42 = vpop.f32.mrf.mxu2 }
 0x40d   :  { %v5326_v0 = vadd.f32 %v2542_v42, %v5270_v34  ;;  %v2577_v34 = vpop.f32.mrf.mxu3  ;;  %v2642_v16 = vpop.f32.mrf.mxu0 }
 0x40e   :  { %v2578_v26 = vadd.f32 %v2577_v34, %v5290_v27 }
 0x410   :  { %v2643_v4 = vadd.f32 %v2642_v16, %v2578_v26 }
 0x411   :  { %2804 = vmatmul.f32.gmra.mxu2 %v5266_v53  ;;  %v2634_v53 = vadd.f32 %v2633_v23, %v2569_v48 }
 0x412   :  { %v2708_v17 = vadd.f32 %v2707_v30, %v2643_v4 }
 0x413   :  { %v2699_v19 = vadd.f32 %v2698_v6, %v2634_v53 }
 0x414   :  { %v2545_v62 = vpop.f32.mrf.mxu2 }
 0x415   :  { %v5332_v28 = vadd.f32 %v2545_v62, %v5276_v7  ;;  %v2580_v63 = vpop.f32.mrf.mxu3  ;;  %v2645_v29 = vpop.f32.mrf.mxu0 }
 0x416   :  { %v2581_v2 = vadd.f32 %v2580_v63, %v5293_v37 }
 0x418   :  { %v2646_v22 = vadd.f32 %v2645_v29, %v2581_v2 }
 0x419   :  { %2807 = vmatmul.f32.gmra.mxu2 %v2077_v54 }
 0x41c   :  { %v2548_v61 = vpop.f32.mrf.mxu2 }
 0x41d   :  { %v5336_v46 = vadd.f32 %v2548_v61, %v5279_v49  ;;  %v2710_v49 = vpop.f32.mrf.mxu1  ;;  %v2583_v60 = vpop.f32.mrf.mxu3 }
 0x41e   :  { %v2648_v8 = vpop.f32.mrf.mxu0  ;;  %v2711_v44 = vadd.f32 %v2710_v49, %v2646_v22  ;;  %v2584_v54 = vadd.f32 %v2583_v60, %v5296_v24 }
 0x420   :  { %v2649_v48 = vadd.f32 %v2648_v8, %v2584_v54 }
 0x424   :  { %v2763_v7 = vpop.f32.mrf.mxu2 }
 0x425   :  { %v2764_v13 = vadd.f32 %v2763_v7, %v2699_v19  ;;  %v2713_v14 = vpop.f32.mrf.mxu1  ;;  %v2586_v23 = vpop.f32.mrf.mxu3 }
 0x426   :  { %v2651_v21 = vpop.f32.mrf.mxu0  ;;  %v2714_v30 = vadd.f32 %v2713_v14, %v2649_v48  ;;  %v2587_v19 = vadd.f32 %v2586_v23, %v5300_v58 }
 0x427   :  { %vm2811_vm7 = vcmp.ge.f32.partialorder %v2764_v13, 0.0  ;;  %v2827_v40 = vmul.f32 0.2, %v2764_v13 }
 0x429   :  { %v2843_v12 = vsel %vm2811_vm7, %v2764_v13, %v2827_v40  ;;  %v2652_v13 = vadd.f32 %v2651_v21, %v2587_v19 }
 0x42a   :  { %v2859_v43 = vmul.f32 1.4142135, %v2843_v12 }
 0x42c   :  { %2875 = vst [vmem:[#allocation11] sm:$0xff] %v2859_v43  ;;  %v2766_v55 = vpop.f32.mrf.mxu2 }
 0x42d   :  { %v2767_v38 = vadd.f32 %v2766_v55, %v2702_v32  ;;  %v2716_v47 = vpop.f32.mrf.mxu1  ;;  %v2589_v11 = vpop.f32.mrf.mxu3 }
 0x42e   :  { %v2654_v34 = vpop.f32.mrf.mxu0  ;;  %v2717_v12 = vadd.f32 %v2716_v47, %v2652_v13  ;;  %v2590_v43 = vadd.f32 %v2589_v11, %v5303_v50 }
 0x42f   :  { %vm2812_vm8 = vcmp.ge.f32.partialorder %v2767_v38, 0.0  ;;  %v2828_v59 = vmul.f32 0.2, %v2767_v38 }
 0x431   :  { %v2844_v10 = vsel %vm2812_vm8, %v2767_v38, %v2828_v59  ;;  %v2655_v38 = vadd.f32 %v2654_v34, %v2590_v43 }
 0x432   :  { %v2860_v57 = vmul.f32 1.4142135, %v2844_v10 }
 0x434   :  { %2876 = vst [vmem:[#allocation11 + $0x8] sm:$0xff] %v2860_v57  ;;  %v2769_v51 = vpop.f32.mrf.mxu2 }
 0x435   :  { %v2770_v3 = vadd.f32 %v2769_v51, %v2705_v15  ;;  %v2719_v16 = vpop.f32.mrf.mxu1  ;;  %v2592_v35 = vpop.f32.mrf.mxu3 }
 0x436   :  { %v2657_v18 = vpop.f32.mrf.mxu0  ;;  %v2720_v10 = vadd.f32 %v2719_v16, %v2655_v38  ;;  %v2593_v8 = vadd.f32 %v2592_v35, %v5306_v39 }
 0x437   :  { %vm2813_vm9 = vcmp.ge.f32.partialorder %v2770_v3, 0.0  ;;  %v2829_v33 = vmul.f32 0.2, %v2770_v3 }
 0x438   :  { %v2658_v51 = vadd.f32 %v2657_v18, %v2593_v8 }
 0x439   :  { %v2845_v6 = vsel %vm2813_vm9, %v2770_v3, %v2829_v33 }
 0x43a   :  { %v2861_v9 = vmul.f32 1.4142135, %v2845_v6 }
 0x43c   :  { %2877 = vst [vmem:[#allocation11 + $0x10] sm:$0xff] %v2861_v9  ;;  %v2772_v42 = vpop.f32.mrf.mxu2 }
 0x43d   :  { %v2773_v5 = vadd.f32 %v2772_v42, %v2708_v17  ;;  %v2722_v32 = vpop.f32.mrf.mxu1  ;;  %v2595_v55 = vpop.f32.mrf.mxu3 }
 0x43e   :  { %v2660_v1 = vpop.f32.mrf.mxu0  ;;  %v2723_v33 = vadd.f32 %v2722_v32, %v2658_v51  ;;  %v2596_v23 = vadd.f32 %v2595_v55, %v5309_v20 }
 0x43f   :  { %vm2814_vm10 = vcmp.ge.f32.partialorder %v2773_v5, 0.0  ;;  %v2830_v27 = vmul.f32 0.2, %v2773_v5 }
 0x440   :  { %v2661_v2 = vadd.f32 %v2660_v1, %v2596_v23 }
 0x441   :  { %v2846_v52 = vsel %vm2814_vm10, %v2773_v5, %v2830_v27 }
 0x442   :  { %v2862_v62 = vmul.f32 1.4142135, %v2846_v52 }
 0x444   :  { %2878 = vst [vmem:[#allocation11 + $0x18] sm:$0xff] %v2862_v62  ;;  %v2775_v41 = vpop.f32.mrf.mxu2 }
 0x445   :  { %v2776_v25 = vadd.f32 %v2775_v41, %v2711_v44  ;;  %v2725_v26 = vpop.f32.mrf.mxu1  ;;  %v2598_v3 = vpop.f32.mrf.mxu3 }
 0x446   :  { %v2663_v6 = vpop.f32.mrf.mxu0  ;;  %v2726_v27 = vadd.f32 %v2725_v26, %v2661_v2  ;;  %v2599_v47 = vadd.f32 %v2598_v3, %v5312_v45 }
 0x447   :  { %vm2815_vm11 = vcmp.ge.f32.partialorder %v2776_v25, 0.0  ;;  %v2831_v37 = vmul.f32 0.2, %v2776_v25 }
 0x448   :  { %v2664_v44 = vadd.f32 %v2663_v6, %v2599_v47 }
 0x449   :  { %v2847_v61 = vsel %vm2815_vm11, %v2776_v25, %v2831_v37 }
 0x44a   :  { %v2863_v53 = vmul.f32 1.4142135, %v2847_v61 }
 0x44c   :  { %2879 = vst [vmem:[#allocation11 + $0x20] sm:$0xff] %v2863_v53  ;;  %v2778_v63 = vpop.f32.mrf.mxu2 }
 0x44d   :  { %v2779_v7 = vadd.f32 %v2778_v63, %v2714_v30  ;;  %v2728_v21 = vpop.f32.mrf.mxu1  ;;  %v2601_v5 = vpop.f32.mrf.mxu3 }
 0x44e   :  { %v2666_v62 = vpop.f32.mrf.mxu0  ;;  %v2729_v34 = vadd.f32 %v2728_v21, %v2664_v44  ;;  %v2602_v48 = vadd.f32 %v2601_v5, %v5315_v56 }
 0x44f   :  { %vm2816_vm12 = vcmp.ge.f32.partialorder %v2779_v7, 0.0  ;;  %v2832_v24 = vmul.f32 0.2, %v2779_v7 }
 0x450   :  { %v2667_v53 = vadd.f32 %v2666_v62, %v2602_v48 }
 0x451   :  { %v2848_v40 = vsel %vm2816_vm12, %v2779_v7, %v2832_v24 }
 0x452   :  { %v2864_v29 = vmul.f32 1.4142135, %v2848_v40 }
 0x454   :  { %2880 = vst [vmem:[#allocation11 + $0x28] sm:$0xff] %v2864_v29  ;;  %v2781_v31 = vpop.f32.mrf.mxu2 }
 0x455   :  { %v2782_v49 = vadd.f32 %v2781_v31, %v2717_v12  ;;  %v2731_v41 = vpop.f32.mrf.mxu1  ;;  %v2604_v37 = vpop.f32.mrf.mxu3 }
 0x456   :  { %v2669_v30 = vpop.f32.mrf.mxu0  ;;  %v2732_v63 = vadd.f32 %v2731_v41, %v2667_v53  ;;  %v2605_v7 = vadd.f32 %v2604_v37, %v5319_v36 }
 0x457   :  { %vm2817_vm13 = vcmp.ge.f32.partialorder %v2782_v49, 0.0  ;;  %v2833_v58 = vmul.f32 0.2, %v2782_v49 }
 0x458   :  { %v2670_v29 = vadd.f32 %v2669_v30, %v2605_v7 }
 0x459   :  { %v2849_v60 = vsel %vm2817_vm13, %v2782_v49, %v2833_v58 }
 0x45a   :  { %v2865_v59 = vmul.f32 1.4142135, %v2849_v60 }
 0x45c   :  { %2881 = vst [vmem:[#allocation11 + $0x30] sm:$0xff] %v2865_v59  ;;  %v2784_v57 = vpop.f32.mrf.mxu2 }
 0x45d   :  { %v2785_v15 = vadd.f32 %v2784_v57, %v2720_v10  ;;  %v2734_v13 = vpop.f32.mrf.mxu1  ;;  %v2607_v40 = vpop.f32.mrf.mxu3 }
 0x45e   :  { %v2672_v43 = vpop.f32.mrf.mxu0  ;;  %v2735_v31 = vadd.f32 %v2734_v13, %v2670_v29  ;;  %v2608_v49 = vadd.f32 %v2607_v40, %v5326_v0 }
 0x45f   :  { %vm2818_vm14 = vcmp.ge.f32.partialorder %v2785_v15, 0.0  ;;  %v2834_v50 = vmul.f32 0.2, %v2785_v15 }
 0x460   :  { %v2673_v60 = vadd.f32 %v2672_v43, %v2608_v49 }
 0x461   :  { %v2850_v14 = vsel %vm2818_vm14, %v2785_v15, %v2834_v50 }
 0x462   :  { %v2866_v4 = vmul.f32 1.4142135, %v2850_v14 }
 0x464   :  { %2882 = vst [vmem:[#allocation11 + $0x38] sm:$0xff] %v2866_v4  ;;  %v2787_v9 = vpop.f32.mrf.mxu2 }
 0x465   :  { %v2788_v17 = vadd.f32 %v2787_v9, %v2723_v33  ;;  %v2737_v58 = vpop.f32.mrf.mxu1  ;;  %v2610_v1 = vpop.f32.mrf.mxu3 }
 0x466   :  { %v2738_v8 = vadd.f32 %v2737_v58, %v2673_v60  ;;  %v2611_v57 = vadd.f32 %v2610_v1, %v5332_v28  ;;  %v2675_v15 = vpop.f32.mrf.mxu0 }
 0x467   :  { %vm2819_vm15 = vcmp.ge.f32.partialorder %v2788_v17, 0.0  ;;  %v2835_v39 = vmul.f32 0.2, %v2788_v17 }
 0x468   :  { %v2676_v50 = vadd.f32 %v2675_v15, %v2611_v57 }
 0x469   :  { %v2851_v42 = vsel %vm2819_vm15, %v2788_v17, %v2835_v39 }
 0x46a   :  { %v2867_v22 = vmul.f32 1.4142135, %v2851_v42 }
 0x46c   :  { %2883 = vst [vmem:[#allocation11 + $0x40] sm:$0xff] %v2867_v22  ;;  %v2790_v52 = vpop.f32.mrf.mxu2 }
 0x46d   :  { %v2791_v11 = vadd.f32 %v2790_v52, %v2726_v27  ;;  %v2740_v3 = vpop.f32.mrf.mxu1  ;;  %v2613_v4 = vpop.f32.mrf.mxu3 }
 0x46e   :  { %v2741_v23 = vadd.f32 %v2740_v3, %v2676_v50  ;;  %v2614_v6 = vadd.f32 %v2613_v4, %v5336_v46  ;;  %v2678_v9 = vpop.f32.mrf.mxu0 }
 0x46f   :  { %vm2820_vm0 = vcmp.ge.f32.partialorder %v2791_v11, 0.0  ;;  %v2836_v20 = vmul.f32 0.2, %v2791_v11 }
 0x470   :  { %v2679_v39 = vadd.f32 %v2678_v9, %v2614_v6 }
 0x471   :  { %v2852_v54 = vsel %vm2820_vm0, %v2791_v11, %v2836_v20 }
 0x472   :  { %v2868_v25 = vmul.f32 1.4142135, %v2852_v54 }
 0x474   :  { %2884 = vst [vmem:[#allocation11 + $0x48] sm:$0xff] %v2868_v25  ;;  %v2793_v61 = vpop.f32.mrf.mxu2 }
 0x475   :  { %v2794_v16 = vadd.f32 %v2793_v61, %v2729_v34  ;;  %v2743_v21 = vpop.f32.mrf.mxu1 }
 0x476   :  { %v2744_v22 = vadd.f32 %v2743_v21, %v2679_v39 }
 0x477   :  { %vm2821_vm1 = vcmp.ge.f32.partialorder %v2794_v16, 0.0  ;;  %v2837_v45 = vmul.f32 0.2, %v2794_v16 }
 0x479   :  { %v2853_v19 = vsel %vm2821_vm1, %v2794_v16, %v2837_v45 }
 0x47a   :  { %v2869_v35 = vmul.f32 1.4142135, %v2853_v19 }
 0x47c   :  { %2885 = vst [vmem:[#allocation11 + $0x50] sm:$0xff] %v2869_v35  ;;  %v2796_v24 = vpop.f32.mrf.mxu2 }
 0x47d   :  { %v2797_v18 = vadd.f32 %v2796_v24, %v2732_v63 }
 0x47f   :  { %vm2822_vm2 = vcmp.ge.f32.partialorder %v2797_v18, 0.0  ;;  %v2838_v56 = vmul.f32 0.2, %v2797_v18 }
 0x481   :  { %v2854_v12 = vsel %vm2822_vm2, %v2797_v18, %v2838_v56 }
 0x482   :  { %v2870_v32 = vmul.f32 1.4142135, %v2854_v12 }
 0x484   :  { %2886 = vst [vmem:[#allocation11 + $0x58] sm:$0xff] %v2870_v32  ;;  %v2799_v55 = vpop.f32.mrf.mxu2 }
 0x485   :  { %v2800_v38 = vadd.f32 %v2799_v55, %v2735_v31 }
 0x487   :  { %vm2823_vm3 = vcmp.ge.f32.partialorder %v2800_v38, 0.0  ;;  %v2839_v36 = vmul.f32 0.2, %v2800_v38 }
 0x489   :  { %v2855_v59 = vsel %vm2823_vm3, %v2800_v38, %v2839_v36 }
 0x48a   :  { %v2871_v10 = vmul.f32 1.4142135, %v2855_v59 }
 0x48c   :  { %2887 = vst [vmem:[#allocation11 + $0x60] sm:$0xff] %v2871_v10  ;;  %v2802_v26 = vpop.f32.mrf.mxu2 }
 0x48d   :  { %v2803_v51 = vadd.f32 %v2802_v26, %v2738_v8 }
 0x48f   :  { %vm2824_vm4 = vcmp.ge.f32.partialorder %v2803_v51, 0.0  ;;  %v2840_v0 = vmul.f32 0.2, %v2803_v51 }
 0x491   :  { %v2856_v14 = vsel %vm2824_vm4, %v2803_v51, %v2840_v0 }
 0x492   :  { %v2872_v33 = vmul.f32 1.4142135, %v2856_v14 }
 0x494   :  { %2888 = vst [vmem:[#allocation11 + $0x68] sm:$0xff] %v2872_v33  ;;  %v2805_v17 = vpop.f32.mrf.mxu2 }
 0x495   :  { %v2806_v2 = vadd.f32 %v2805_v17, %v2741_v23 }
 0x497   :  { %vm2825_vm5 = vcmp.ge.f32.partialorder %v2806_v2, 0.0  ;;  %v2841_v28 = vmul.f32 0.2, %v2806_v2 }
 0x499   :  { %v2857_v42 = vsel %vm2825_vm5, %v2806_v2, %v2841_v28 }
 0x49a   :  { %v2873_v5 = vmul.f32 1.4142135, %v2857_v42 }
 0x49c   :  { %2889 = vst [vmem:[#allocation11 + $0x70] sm:$0xff] %v2873_v5  ;;  %v2808_v27 = vpop.f32.mrf.mxu2 }
 0x49d   :  { %v2809_v47 = vadd.f32 %v2808_v27, %v2744_v22 }
 0x49f   :  { %vm2826_vm6 = vcmp.ge.f32.partialorder %v2809_v47, 0.0  ;;  %v2842_v52 = vmul.f32 0.2, %v2809_v47 }
 0x4a1   :  { %v2858_v46 = vsel %vm2826_vm6, %v2809_v47, %v2842_v52 }
 0x4a2   :  { %v2874_v11 = vmul.f32 1.4142135, %v2858_v46 }
 0x4a4   :  { %2890 = vst [vmem:[#allocation11 + $0x78] sm:$0xff] %v2874_v11 }
 0x4a5   :  { %2903 = dma.vmem_to_hbm [thread:$0]  %s2896_s20, 2048, %s2898_s23, [#allocation5], %s3298_s9, %s3298_s9, %s3299_s10  }
 0x4a6   :  { %3292 = dma.done.wait [#allocation5], 2048  }
 0x4a7   :  { %3293 = vsyncadd [#allocation5], 4294965248 }
 0x4a8   :  { %2908 = vsyncpa [#allocation4], 1 }
 0x4a9   :  { %2909 = vsyncpa [#allocation7], 1 }
 0x4aa   :  { %2910 = vsyncpa [#allocation10], 1 }
 0x4ab   :  { %2911 = vsyncpa [#allocation5], 1 }

</bundles_post_ra>
